<compile_context>
chip_gen: v7x
topology: tpu7x:2x2x1
jax: 0.10.0
libtpu: 0.0.40
codegen_flags: <defaults>
</compile_context>

<pallas_src>
import functools
import math

import jax
import jax.numpy as jnp
from jax.experimental import pallas as pl
from jax.experimental.pallas import tpu as pltpu


def _eeg_graph_transformer_kernel(
    x_ref, adj_ref,
    w_fold_ref, b_fold_ref,
    wr_ref, br_ref,
    out_ref,
    *, num_heads, head_dim, graphs_per_step, num_nodes,
):
    H, C = num_heads, head_dim
    HC = H * C
    Bt, N = graphs_per_step, num_nodes
    BtN = Bt * N
    T = x_ref.shape[-1]

    # One (Bt, N, T) slab -> single M = Bt*N rows for the fused projection.
    x = x_ref[...].reshape(BtN, T)                         # bf16
    adj = adj_ref[...]                                     # (BtN, BtN) block-diag f32
    neg_bias = (adj - 1.0) * 1e30                          # 0 on edges, -1e30 off (hoisted)

    # Folded input_proj ∘ {q|k|v|skip}: one lane-dense (BtN, T) @ (T, 4*HC) matmul.
    proj = (jnp.dot(x, w_fold_ref[...], preferred_element_type=jnp.float32)
            + b_fold_ref[...])                             # (BtN, 4*HC) f32

    # Single packed bf16 cast for the matmul operands (q | k); v stays f32
    # because it is only used elementwise below.
    qk_bf = proj[:, :2 * HC].astype(jnp.bfloat16)          # (BtN, 2*HC)

    # TODO(synk): TransformerConv attention dropout — eval-mode identity assumed.
    scale = 1.0 / math.sqrt(C)
    inv_n = 1.0 / N
    head_reps = []
    for h in range(H):                                     # static tiny head loop (H == 2)
        qh = qk_bf[:, h * C:(h + 1) * C]                   # (BtN, C) bf16
        kh = qk_bf[:, HC + h * C:HC + (h + 1) * C]         # (BtN, C) bf16
        vh = proj[:, 2 * HC + h * C:2 * HC + (h + 1) * C]  # (BtN, C) f32

        # Block-diagonal attention over all Bt graphs at once: one 128-ish
        # square matmul instead of Bt tiny per-graph ones.
        s = jax.lax.dot_general(qh, kh, (((1,), (1,)), ((), ())),
                                preferred_element_type=jnp.float32) * scale
        s = s + neg_bias                                   # masked row-max guard
        m = jnp.max(s, axis=-1, keepdims=True)
        p = jnp.exp(s - m) * adj                           # non-edges exactly 0
        denom = jnp.sum(p, axis=-1, keepdims=True)
        inv_d = pl.reciprocal(jnp.where(denom > 0.0, denom, 1.0), approx=True)
        alpha = p * inv_d                                  # isolated nodes -> 0

        # mean_i(alpha @ v) per graph == (1/N) * segsum_j (colsum alpha)[j] * v[j,:]
        # (alpha is block-diagonal, so column sums never mix graphs).
        col_w = jnp.sum(alpha, axis=0)[:, None]            # (BtN, 1)
        head_reps.append(
            (col_w * vh).reshape(Bt, N, C).sum(axis=1) * inv_n)   # (Bt, C)

    # Graph readout: node mean of (attention-out + skip), then final linear.
    skip_rep = proj[:, 3 * HC:].reshape(Bt, N, HC).sum(axis=1) * inv_n    # (Bt, HC)
    graph_rep = jnp.concatenate(head_reps, axis=-1) + skip_rep            # (Bt, HC)

    # Lane-dense (Bt, O_pad) store; real O columns are sliced outside.
    out_ref[...] = (jnp.dot(graph_rep.astype(jnp.bfloat16), wr_ref[...],
                            preferred_element_type=jnp.float32)
                    + br_ref[...])


def eeg_graph_transformer(x, adj, params, *, num_heads, head_dim,
                          graphs_per_step=None):
    """x: (B, N, T) float, adj: (N, N) mask (adj[tgt, src] = 1).
    params: PyTorch-convention (out, in) weights + biases. Returns (B, O) f32."""
    (w_in, b_in, wq, bq, wk, bk, wv, bv, wskip, bskip, wr, br) = params
    B, N, T = x.shape
    O = wr.shape[0]
    HC = num_heads * head_dim

    # --- fold input_proj into the fused q|k|v|skip projection (exact: no
    # nonlinearity in between).  All folding math in f32, operands cast to bf16.
    w_qkvs = jnp.concatenate(
        [jnp.asarray(w).T for w in (wq, wk, wv, wskip)], axis=1
    ).astype(jnp.float32)                                                  # (E, 4*HC)
    b_qkvs = jnp.concatenate(
        [jnp.asarray(b) for b in (bq, bk, bv, bskip)]).astype(jnp.float32) # (4*HC,)
    w_fold = (jnp.asarray(w_in).T.astype(jnp.float32) @ w_qkvs
              ).astype(jnp.bfloat16)                                       # (T, 4*HC)
    b_fold = (jnp.asarray(b_in).astype(jnp.float32) @ w_qkvs
              + b_qkvs)[None, :].astype(jnp.float32)                       # (1, 4*HC)

    # Readout weight zero-padded to a 128-lane output slab (full-vreg store).
    O_pad = 128 * max(1, -(-O // 128))
    wr_pad = jnp.zeros((HC, O_pad), jnp.float32).at[:, :O].set(
        jnp.asarray(wr).T.astype(jnp.float32)).astype(jnp.bfloat16)        # (HC, O_pad)
    br_pad = jnp.zeros((1, O_pad), jnp.float32).at[0, :O].set(
        jnp.asarray(br).astype(jnp.float32))                               # (1, O_pad)

    adj = jnp.asarray(adj).astype(jnp.float32)
    x = jnp.asarray(x).astype(jnp.bfloat16)

    # --- grid sizing: one grid step per TensorCore.  v7x has 2 TCs/chip, so an
    # even grid keeps both busy; v5e/v6e are single-TC, so one big step
    # (M = B*N rows) avoids duplicated per-step overhead.
    if graphs_per_step is None:
        try:
            kind = jax.devices()[0].device_kind.lower()
        except Exception:
            kind = ""
        n_tc = 2 if "v7" in kind else 1
        graphs_per_step = -(-B // n_tc)
    bt = max(1, min(graphs_per_step, B))
    bt = max(1, min(bt, max(1, 512 // N)))        # keep (bt*N)^2 attention matrix sane

    pad = (-B) % bt
    if pad:
        x = jnp.concatenate([x, jnp.zeros((pad, N, T), x.dtype)], axis=0)
    Bp = B + pad

    # Block-diagonal adjacency for the bt graphs processed per step.
    adj_bd = jnp.kron(jnp.eye(bt, dtype=jnp.float32), adj)                 # (bt*N, bt*N)

    def whole(a):
        return pl.BlockSpec(a.shape, lambda i: (0,) * a.ndim)

    kernel = functools.partial(
        _eeg_graph_transformer_kernel,
        num_heads=num_heads, head_dim=head_dim,
        graphs_per_step=bt, num_nodes=N)

    out = pl.pallas_call(
        kernel,
        out_shape=jax.ShapeDtypeStruct((Bp, O_pad), jnp.float32),
        grid=(Bp // bt,),
        in_specs=[
            pl.BlockSpec((bt, N, T), lambda i: (i, 0, 0)),   # bt graphs per step
            whole(adj_bd),
            whole(w_fold), whole(b_fold),
            whole(wr_pad), whole(br_pad),
        ],
        out_specs=pl.BlockSpec((bt, O_pad), lambda i: (i, 0)),
        compiler_params=pltpu.CompilerParams(
            dimension_semantics=("parallel",)),   # independent graphs -> both v7x TCs
    )(x, adj_bd, w_fold, b_fold, wr_pad, br_pad)
    return out[:B, :O]


if __name__ == "__main__":
    B = 16           # batch_size
    N = 16           # num_channels (graph nodes)
    T = 32           # num_timepoints
    E = 32           # embed_dim
    H = 2            # num_heads
    C = 16           # graph_embed_dim (per head)
    O = 4            # output_dim
    HC = H * C

    key = jax.random.PRNGKey(0)
    keys = jax.random.split(key, 16)

    def init_linear(kw, kb, out_dim, in_dim):
        lim = 1.0 / math.sqrt(in_dim)
        w = jax.random.uniform(kw, (out_dim, in_dim), jnp.float32, -lim, lim)
        b = jax.random.uniform(kb, (out_dim,), jnp.float32, -lim, lim)
        return w, b

    # Parameters (PyTorch nn.Linear convention: weight is (out, in)).
    w_in, b_in = init_linear(keys[0], keys[1], E, T)        # input_proj
    wq, bq = init_linear(keys[2], keys[3], HC, E)           # graph_conv.lin_query
    wk, bk = init_linear(keys[4], keys[5], HC, E)           # graph_conv.lin_key
    wv, bv = init_linear(keys[6], keys[7], HC, E)           # graph_conv.lin_value
    wskip, bskip = init_linear(keys[8], keys[9], HC, E)     # graph_conv.lin_skip
    wr, br = init_linear(keys[10], keys[11], O, HC)         # readout

    x = jax.random.normal(keys[12], (B, N, T), jnp.float32)

    # Bidirectional ring graph, COO edge_index (row 0 = source, row 1 = target).
    idx = jnp.arange(N)
    src = jnp.concatenate([idx, (idx + 1) % N])
    tgt = jnp.concatenate([(idx + 1) % N, idx])
    edge_index = jnp.stack([src, tgt], axis=0)               # (2, num_edges)

    # Densify edge list -> adjacency mask adj[target, source] = 1.0.
    adj = jnp.zeros((N, N), jnp.float32).at[edge_index[1], edge_index[0]].set(1.0)

    params = (w_in, b_in, wq, bq, wk, bk, wv, bv, wskip, bskip, wr, br)
    out = eeg_graph_transformer(x, adj, params, num_heads=H, head_dim=C)
    out = jax.block_until_ready(out)

    # Pure-JAX f32 reference (eval-mode TransformerConv semantics).
    def ref_forward(x):
        xp = x @ w_in.T + b_in                                   # (B, N, E)
        q = (xp @ wq.T + bq).reshape(B, N, H, C)
        k = (xp @ wk.T + bk).reshape(B, N, H, C)
        v = (xp @ wv.T + bv).reshape(B, N, H, C)
        s = jnp.einsum('bihc,bjhc->bhij', q, k) / math.sqrt(C)
        s = jnp.where(adj[None, None] > 0, s, -1e30)
        p = jnp.exp(s - s.max(-1, keepdims=True)) * adj[None, None]
        den = p.sum(-1, keepdims=True)
        alpha = p / jnp.where(den > 0, den, 1.0)
        o = jnp.einsum('bhij,bjhc->bihc', alpha, v).reshape(B, N, HC)
        node_out = o + xp @ wskip.T + bskip
        rep = node_out.mean(axis=1)
        return rep @ wr.T + br

    ref = ref_forward(x)
    assert out.shape == (B, O)
    # bf16 matmul operands / folded weights (f32 accumulation) vs. f32 reference.
    assert jnp.allclose(out, ref, rtol=2e-2, atol=2e-2), (out, ref)
    print("KERNEL_OK")
</pallas_src>

<mosaic_0001>
module attributes {stable_mosaic.version = 11 : i64} {
  func.func @_eeg_graph_transformer_kernel(%arg0: i32, %arg1: memref<16x16x32xbf16, #tpu.memory_space<vmem>>, %arg2: memref<256x256xf32, #tpu.memory_space<vmem>>, %arg3: memref<32x128xbf16, #tpu.memory_space<vmem>>, %arg4: memref<1x128xf32, #tpu.memory_space<vmem>>, %arg5: memref<32x128xbf16, #tpu.memory_space<vmem>>, %arg6: memref<1x128xf32, #tpu.memory_space<vmem>>, %arg7: memref<16x128xf32, #tpu.memory_space<vmem>>) attributes {dimension_semantics = [#tpu.dimension_semantics<parallel>], iteration_bounds = array<i64: 1>, scalar_prefetch = 0 : i64, scratch_operands = 0 : i64, tpu.core_type = #tpu.core_type<tc>, window_params = [{transform_indices = @transform_0, window_bounds = array<i64: 16, 16, 32>}, {pipeline_mode = #tpu.pipeline_mode<synchronous>, transform_indices = @transform_1, window_bounds = array<i64: 256, 256>}, {pipeline_mode = #tpu.pipeline_mode<synchronous>, transform_indices = @transform_2, window_bounds = array<i64: 32, 128>}, {pipeline_mode = #tpu.pipeline_mode<synchronous>, transform_indices = @transform_3, window_bounds = array<i64: 1, 128>}, {pipeline_mode = #tpu.pipeline_mode<synchronous>, transform_indices = @transform_4, window_bounds = array<i64: 32, 128>}, {pipeline_mode = #tpu.pipeline_mode<synchronous>, transform_indices = @transform_5, window_bounds = array<i64: 1, 128>}, {transform_indices = @transform_6, window_bounds = array<i64: 16, 128>}]} {
    %c0 = arith.constant 0 : index
    %c0_0 = arith.constant 0 : index
    %c0_1 = arith.constant 0 : index
    %0 = vector.load %arg1[%c0, %c0_0, %c0_1] : memref<16x16x32xbf16, #tpu.memory_space<vmem>>, vector<16x16x32xbf16>
    %1 = vector.shape_cast %0 : vector<16x16x32xbf16> to vector<256x32xbf16>
    %c0_2 = arith.constant 0 : index
    %c0_3 = arith.constant 0 : index
    %2 = vector.load %arg2[%c0_2, %c0_3] : memref<256x256xf32, #tpu.memory_space<vmem>>, vector<256x256xf32>
    %cst = arith.constant 1.000000e+00 : f32
    %3 = vector.broadcast %cst : f32 to vector<256x256xf32>
    %4 = arith.subf %2, %3 : vector<256x256xf32>
    %cst_4 = arith.constant 1.000000e+30 : f32
    %5 = vector.broadcast %cst_4 : f32 to vector<256x256xf32>
    %6 = arith.mulf %4, %5 : vector<256x256xf32>
    %c0_5 = arith.constant 0 : index
    %c0_6 = arith.constant 0 : index
    %7 = vector.load %arg3[%c0_5, %c0_6] : memref<32x128xbf16, #tpu.memory_space<vmem>>, vector<32x128xbf16>
    %cst_7 = arith.constant dense<0.000000e+00> : vector<256x128xf32>
    %8 = tpu.matmul %1, %7, %cst_7 {dimension_numbers = #tpu.dot_dimension_numbers<[1], [0], [0], [1], [0, 0, 1, 1], [], []>} : vector<256x32xbf16>, vector<32x128xbf16>, vector<256x128xf32> -> vector<256x128xf32>
    %c0_8 = arith.constant 0 : index
    %c0_9 = arith.constant 0 : index
    %9 = vector.load %arg4[%c0_8, %c0_9] : memref<1x128xf32, #tpu.memory_space<vmem>>, vector<1x128xf32>
    %10 = vector.broadcast %9 : vector<1x128xf32> to vector<256x128xf32>
    %11 = arith.addf %8, %10 : vector<256x128xf32>
    %12 = vector.extract_strided_slice %11 {offsets = [0, 0], sizes = [256, 64], strides = [1, 1]} : vector<256x128xf32> to vector<256x64xf32>
    %13 = arith.truncf %12 : vector<256x64xf32> to vector<256x64xbf16>
    %14 = vector.extract_strided_slice %13 {offsets = [0, 0], sizes = [256, 16], strides = [1, 1]} : vector<256x64xbf16> to vector<256x16xbf16>
    %15 = vector.extract_strided_slice %13 {offsets = [0, 32], sizes = [256, 16], strides = [1, 1]} : vector<256x64xbf16> to vector<256x16xbf16>
    %16 = vector.extract_strided_slice %11 {offsets = [0, 64], sizes = [256, 16], strides = [1, 1]} : vector<256x128xf32> to vector<256x16xf32>
    %cst_10 = arith.constant dense<0.000000e+00> : vector<256x256xf32>
    %17 = tpu.matmul %14, %15, %cst_10 {dimension_numbers = #tpu.dot_dimension_numbers<[1], [1], [0], [0], [0, 0, 1, 0], [], []>} : vector<256x16xbf16>, vector<256x16xbf16>, vector<256x256xf32> -> vector<256x256xf32>
    %cst_11 = arith.constant 2.500000e-01 : f32
    %18 = vector.broadcast %cst_11 : f32 to vector<256x256xf32>
    %19 = arith.mulf %17, %18 : vector<256x256xf32>
    %20 = arith.addf %19, %6 : vector<256x256xf32>
    %cst_12 = arith.constant dense<0xFF800000> : vector<256xf32>
    %21 = vector.multi_reduction <maximumf>, %20, %cst_12 [1] : vector<256x256xf32> to vector<256xf32>
    %22 = vector.shape_cast %21 : vector<256xf32> to vector<256x1xf32>
    %23 = vector.broadcast %22 : vector<256x1xf32> to vector<256x256xf32>
    %24 = arith.subf %20, %23 : vector<256x256xf32>
    %25 = math.exp %24 : vector<256x256xf32>
    %26 = arith.mulf %25, %2 : vector<256x256xf32>
    %cst_13 = arith.constant dense<0.000000e+00> : vector<256xf32>
    %27 = vector.multi_reduction <add>, %26, %cst_13 [1] : vector<256x256xf32> to vector<256xf32>
    %28 = vector.shape_cast %27 : vector<256xf32> to vector<256x1xf32>
    %cst_14 = arith.constant 0.000000e+00 : f32
    %29 = vector.broadcast %cst_14 : f32 to vector<256x1xf32>
    %30 = arith.cmpf ogt, %28, %29 : vector<256x1xf32>
    %cst_15 = arith.constant 1.000000e+00 : f32
    %31 = vector.broadcast %cst_15 : f32 to vector<256x1xf32>
    %32 = arith.select %30, %28, %31 : vector<256x1xi1>, vector<256x1xf32>
    %33 = tpu.reciprocal %32 {approx = true} : vector<256x1xf32> -> vector<256x1xf32>
    %34 = vector.broadcast %33 : vector<256x1xf32> to vector<256x256xf32>
    %35 = arith.mulf %26, %34 : vector<256x256xf32>
    %cst_16 = arith.constant dense<0.000000e+00> : vector<256xf32>
    %36 = vector.multi_reduction <add>, %35, %cst_16 [0] : vector<256x256xf32> to vector<256xf32>
    %37 = vector.shape_cast %36 : vector<256xf32> to vector<256x1xf32>
    %38 = vector.broadcast %37 : vector<256x1xf32> to vector<256x16xf32>
    %39 = arith.mulf %38, %16 : vector<256x16xf32>
    %40 = vector.shape_cast %39 : vector<256x16xf32> to vector<16x16x16xf32>
    %cst_17 = arith.constant dense<0.000000e+00> : vector<16x16xf32>
    %41 = vector.multi_reduction <add>, %40, %cst_17 [1] : vector<16x16x16xf32> to vector<16x16xf32>
    %cst_18 = arith.constant 6.250000e-02 : f32
    %42 = vector.broadcast %cst_18 : f32 to vector<16x16xf32>
    %43 = arith.mulf %41, %42 : vector<16x16xf32>
    %44 = vector.extract_strided_slice %13 {offsets = [0, 16], sizes = [256, 16], strides = [1, 1]} : vector<256x64xbf16> to vector<256x16xbf16>
    %45 = vector.extract_strided_slice %13 {offsets = [0, 48], sizes = [256, 16], strides = [1, 1]} : vector<256x64xbf16> to vector<256x16xbf16>
    %46 = vector.extract_strided_slice %11 {offsets = [0, 80], sizes = [256, 16], strides = [1, 1]} : vector<256x128xf32> to vector<256x16xf32>
    %cst_19 = arith.constant dense<0.000000e+00> : vector<256x256xf32>
    %47 = tpu.matmul %44, %45, %cst_19 {dimension_numbers = #tpu.dot_dimension_numbers<[1], [1], [0], [0], [0, 0, 1, 0], [], []>} : vector<256x16xbf16>, vector<256x16xbf16>, vector<256x256xf32> -> vector<256x256xf32>
    %cst_20 = arith.constant 2.500000e-01 : f32
    %48 = vector.broadcast %cst_20 : f32 to vector<256x256xf32>
    %49 = arith.mulf %47, %48 : vector<256x256xf32>
    %50 = arith.addf %49, %6 : vector<256x256xf32>
    %cst_21 = arith.constant dense<0xFF800000> : vector<256xf32>
    %51 = vector.multi_reduction <maximumf>, %50, %cst_21 [1] : vector<256x256xf32> to vector<256xf32>
    %52 = vector.shape_cast %51 : vector<256xf32> to vector<256x1xf32>
    %53 = vector.broadcast %52 : vector<256x1xf32> to vector<256x256xf32>
    %54 = arith.subf %50, %53 : vector<256x256xf32>
    %55 = math.exp %54 : vector<256x256xf32>
    %56 = arith.mulf %55, %2 : vector<256x256xf32>
    %cst_22 = arith.constant dense<0.000000e+00> : vector<256xf32>
    %57 = vector.multi_reduction <add>, %56, %cst_22 [1] : vector<256x256xf32> to vector<256xf32>
    %58 = vector.shape_cast %57 : vector<256xf32> to vector<256x1xf32>
    %cst_23 = arith.constant 0.000000e+00 : f32
    %59 = vector.broadcast %cst_23 : f32 to vector<256x1xf32>
    %60 = arith.cmpf ogt, %58, %59 : vector<256x1xf32>
    %cst_24 = arith.constant 1.000000e+00 : f32
    %61 = vector.broadcast %cst_24 : f32 to vector<256x1xf32>
    %62 = arith.select %60, %58, %61 : vector<256x1xi1>, vector<256x1xf32>
    %63 = tpu.reciprocal %62 {approx = true} : vector<256x1xf32> -> vector<256x1xf32>
    %64 = vector.broadcast %63 : vector<256x1xf32> to vector<256x256xf32>
    %65 = arith.mulf %56, %64 : vector<256x256xf32>
    %cst_25 = arith.constant dense<0.000000e+00> : vector<256xf32>
    %66 = vector.multi_reduction <add>, %65, %cst_25 [0] : vector<256x256xf32> to vector<256xf32>
    %67 = vector.shape_cast %66 : vector<256xf32> to vector<256x1xf32>
    %68 = vector.broadcast %67 : vector<256x1xf32> to vector<256x16xf32>
    %69 = arith.mulf %68, %46 : vector<256x16xf32>
    %70 = vector.shape_cast %69 : vector<256x16xf32> to vector<16x16x16xf32>
    %cst_26 = arith.constant dense<0.000000e+00> : vector<16x16xf32>
    %71 = vector.multi_reduction <add>, %70, %cst_26 [1] : vector<16x16x16xf32> to vector<16x16xf32>
    %cst_27 = arith.constant 6.250000e-02 : f32
    %72 = vector.broadcast %cst_27 : f32 to vector<16x16xf32>
    %73 = arith.mulf %71, %72 : vector<16x16xf32>
    %74 = vector.extract_strided_slice %11 {offsets = [0, 96], sizes = [256, 32], strides = [1, 1]} : vector<256x128xf32> to vector<256x32xf32>
    %75 = vector.shape_cast %74 : vector<256x32xf32> to vector<16x16x32xf32>
    %cst_28 = arith.constant dense<0.000000e+00> : vector<16x32xf32>
    %76 = vector.multi_reduction <add>, %75, %cst_28 [1] : vector<16x16x32xf32> to vector<16x32xf32>
    %cst_29 = arith.constant 6.250000e-02 : f32
    %77 = vector.broadcast %cst_29 : f32 to vector<16x32xf32>
    %78 = arith.mulf %76, %77 : vector<16x32xf32>
    %79 = tpu.concatenate %43, %73 in 1 : vector<16x16xf32>, vector<16x16xf32> -> vector<16x32xf32>
    %80 = arith.addf %79, %78 : vector<16x32xf32>
    %81 = arith.truncf %80 : vector<16x32xf32> to vector<16x32xbf16>
    %c0_30 = arith.constant 0 : index
    %c0_31 = arith.constant 0 : index
    %82 = vector.load %arg5[%c0_30, %c0_31] : memref<32x128xbf16, #tpu.memory_space<vmem>>, vector<32x128xbf16>
    %cst_32 = arith.constant dense<0.000000e+00> : vector<16x128xf32>
    %83 = tpu.matmul %81, %82, %cst_32 {dimension_numbers = #tpu.dot_dimension_numbers<[1], [0], [0], [1], [0, 0, 1, 1], [], []>} : vector<16x32xbf16>, vector<32x128xbf16>, vector<16x128xf32> -> vector<16x128xf32>
    %c0_33 = arith.constant 0 : index
    %c0_34 = arith.constant 0 : index
    %84 = vector.load %arg6[%c0_33, %c0_34] : memref<1x128xf32, #tpu.memory_space<vmem>>, vector<1x128xf32>
    %85 = vector.broadcast %84 : vector<1x128xf32> to vector<16x128xf32>
    %86 = arith.addf %83, %85 : vector<16x128xf32>
    %c0_35 = arith.constant 0 : index
    %c0_36 = arith.constant 0 : index
    %87 = vector.load %arg7[%c0_35, %c0_36] : memref<16x128xf32, #tpu.memory_space<vmem>>, vector<16x128xf32>
    tpu.vector_store %arg7[%c0_35, %c0_36], %86 {strides = array<i32>} : memref<16x128xf32, #tpu.memory_space<vmem>>, vector<16x128xf32>,
    return
  }
  func.func @transform_0(%arg0: i32) -> (i32, i32, i32) {
    %c0_i32 = arith.constant 0 : i32
    %c0_i32_0 = arith.constant 0 : i32
    %c0_i32_1 = arith.constant 0 : i32
    return %arg0, %c0_i32, %c0_i32_0 : i32, i32, i32
  }
  func.func @transform_1(%arg0: i32) -> (i32, i32) {
    %c0_i32 = arith.constant 0 : i32
    %c0_i32_0 = arith.constant 0 : i32
    %c0_i32_1 = arith.constant 0 : i32
    return %c0_i32, %c0_i32_0 : i32, i32
  }
  func.func @transform_2(%arg0: i32) -> (i32, i32) {
    %c0_i32 = arith.constant 0 : i32
    %c0_i32_0 = arith.constant 0 : i32
    %c0_i32_1 = arith.constant 0 : i32
    return %c0_i32, %c0_i32_0 : i32, i32
  }
  func.func @transform_3(%arg0: i32) -> (i32, i32) {
    %c0_i32 = arith.constant 0 : i32
    %c0_i32_0 = arith.constant 0 : i32
    %c0_i32_1 = arith.constant 0 : i32
    return %c0_i32, %c0_i32_0 : i32, i32
  }
  func.func @transform_4(%arg0: i32) -> (i32, i32) {
    %c0_i32 = arith.constant 0 : i32
    %c0_i32_0 = arith.constant 0 : i32
    %c0_i32_1 = arith.constant 0 : i32
    return %c0_i32, %c0_i32_0 : i32, i32
  }
  func.func @transform_5(%arg0: i32) -> (i32, i32) {
    %c0_i32 = arith.constant 0 : i32
    %c0_i32_0 = arith.constant 0 : i32
    %c0_i32_1 = arith.constant 0 : i32
    return %c0_i32, %c0_i32_0 : i32, i32
  }
  func.func @transform_6(%arg0: i32) -> (i32, i32) {
    %c0_i32 = arith.constant 0 : i32
    %c0_i32_0 = arith.constant 0 : i32
    return %arg0, %c0_i32 : i32, i32
  }
}

</mosaic_0001>

<bundles_post_ra>
// kernel: tpu_custom_call.1
= control target key start
LH: loop header
LB: loop body
LE: loop exit
PB: predicated region body
PF: predicated region fallthrough
CT: control target
= control target key end

     0   :  { %11 = vsyncpa [#allocation3], 0  ;;  %s7130_s0 = inlined_call_operand.hbm [shape: bf16[16,16,32], index: 0, kind: input, shape index: {}]   ;;  %s7131_s1 = inlined_call_operand.hbm [shape: f32[256,256], index: 1, kind: input, shape index: {}]   ;;  %s7132_s2 = inlined_call_operand.hbm [shape: bf16[32,128], index: 2, kind: input, shape index: {}]   ;;  %s7133_s3 = inlined_call_operand.vmem [shape: f32[1,128], index: 3, kind: input, shape index: {}]   ;;  %s7134_s4 = inlined_call_operand.hbm [shape: bf16[32,128], index: 4, kind: input, shape index: {}]   ;;  %s7135_s5 = inlined_call_operand.vmem [shape: f32[1,128], index: 5, kind: input, shape index: {}]   ;;  %s7136_s6 = inlined_call_operand.hbm [shape: f32[16,128], index: 6, kind: output, shape index: {}]  }
   0x1   :  { %12 = vsyncpa [#allocation6], 0 }
   0x2   :  { %13 = vsyncpa [#allocation9], 0 }
   0x3   :  { %14 = vsyncpa [#allocation4], 0  ;;  %s4866_s21 = smov [#allocation5]   ;;  %s4748_s25 = scalar_lea.hbm %s7131_s1, 8192 }
   0x4   :  { %s32_s22 = sshll.u32 %s4866_s21, 4  ;;  %p4749_p0 = scmp.ne.s32.totalorder %s7131_s1, %s4748_s25  ;;  %s33_s22 = int_to_ptr.vmem [resolvable:$true] %s32_s22 }
   0x5   :  { %p4752_p1 = scmp.lt.u32.totalorder %s4748_s25, %s7131_s1 }
   0x7   :  { %p4754_p2 = pnand %p4752_p1, %p4749_p0 }
   0x9   :  { %4757 = shalt.err (!%p4754_p2)
}
   0xa   :  { %s4758_s30 = scalar_lea.vmem %s33_s22, 8192  ;;  %p4763_p4 = scmp.lt.s32.totalorder %s33_s22, %s33_s22 }
   0xb   :  { %p4759_p3 = scmp.ne.s32.totalorder %s33_s22, %s4758_s30  ;;  %p4764_p5 = scmp.lt.s32.totalorder %s4758_s30, %s4758_s30 }
   0xd   :  { %p4765_p6 = por %p4764_p5, %p4763_p4 }
   0xf   :  { %p4766_p7 = pnand %p4765_p6, %p4759_p3 }
  0x11   :  { %4769 = shalt.err (!%p4766_p7)
}
  0x12   :  { %s4867_s7 = smov 256   ;;  %s4868_s8 = smov 16  }
  0x13   :  { %38 = dma.hbm_to_vmem [thread:$0]  %s7131_s1, 8192, %s33_s22, [#allocation6], %s4867_s7, %s4867_s7, %s4868_s8  }
  0x14   :  { %s4869_s11 = smov [#allocation2]   ;;  %s4770_s15 = scalar_lea.hbm %s7130_s0, 2048 }
  0x15   :  { %s20_s12 = sshll.u32 %s4869_s11, 4  ;;  %p4771_p8 = scmp.ne.s32.totalorder %s7130_s0, %s4770_s15  ;;  %s21_s12 = int_to_ptr.vmem [resolvable:$true] %s20_s12 }
  0x16   :  { %p4774_p9 = scmp.lt.u32.totalorder %s4770_s15, %s7130_s0 }
  0x18   :  { %p4776_p10 = pnand %p4774_p9, %p4771_p8 }
  0x1a   :  { %4779 = shalt.err (!%p4776_p10)
}
  0x1b   :  { %s4780_s20 = scalar_lea.vmem %s21_s12, 2048  ;;  %p4785_p12 = scmp.lt.s32.totalorder %s21_s12, %s21_s12 }
  0x1c   :  { %p4781_p11 = scmp.ne.s32.totalorder %s21_s12, %s4780_s20  ;;  %p4786_p13 = scmp.lt.s32.totalorder %s4780_s20, %s4780_s20 }
  0x1e   :  { %p4787_p0 = por %p4786_p13, %p4785_p12 }
  0x20   :  { %p4788_p1 = pnand %p4787_p0, %p4781_p11 }
  0x22   :  { %4791 = shalt.err (!%p4788_p1)
}
  0x23   :  { %s4870_s1 = smov 64   ;;  %s4871_s21 = smov 4  }
  0x24   :  { %26 = dma.hbm_to_vmem [thread:$0]  %s7130_s0, 2048, %s21_s12, [#allocation3], %s4870_s1, %s4870_s1, %s4871_s21  }
  0x25   :  { %s4872_s24 = smov [#allocation7]   ;;  %s4873_s26 = smov [#allocation8]  }
  0x26   :  { %s44_s25 = sshll.u32 %s4872_s24, 4  ;;  %s58_s27 = sshll.u32 %s4873_s26, 4  ;;  %s45_s25 = int_to_ptr.vmem [resolvable:$true] %s44_s25  ;;  %s4945_s27 = int_to_ptr.vmem [resolvable:$true] %s58_s27 }
  0x27   :  { %s4792_s30 = scalar_lea.hbm %s7132_s2, 256 }
  0x28   :  { %p4793_p2 = scmp.ne.s32.totalorder %s7132_s2, %s4792_s30  ;;  %p4796_p3 = scmp.lt.u32.totalorder %s4792_s30, %s7132_s2 }
  0x2a   :  { %p4798_p4 = pnand %p4796_p3, %p4793_p2 }
  0x2c   :  { %4801 = shalt.err (!%p4798_p4)
}
  0x2d   :  { %s4802_s0 = scalar_lea.vmem %s45_s25, 256  ;;  %p4807_p6 = scmp.lt.s32.totalorder %s45_s25, %s45_s25 }
  0x2e   :  { %p4803_p5 = scmp.ne.s32.totalorder %s45_s25, %s4802_s0  ;;  %p4808_p7 = scmp.lt.s32.totalorder %s4802_s0, %s4802_s0 }
  0x30   :  { %p4809_p8 = por %p4808_p7, %p4807_p6 }
  0x32   :  { %p4810_p9 = pnand %p4809_p8, %p4803_p5 }
  0x34   :  { %4813 = shalt.err (!%p4810_p9)
}
  0x35   :  { %50 = dma.hbm_to_vmem [thread:$0]  %s7132_s2, 256, %s45_s25, [#allocation6], %s4870_s1, %s4870_s1, %s4871_s21  }
  0x36   :  { %s4814_s15 = scalar_lea.hbm %s7134_s4, 256 }
  0x37   :  { %p4815_p10 = scmp.ne.s32.totalorder %s7134_s4, %s4814_s15  ;;  %p4818_p11 = scmp.lt.u32.totalorder %s4814_s15, %s7134_s4 }
  0x39   :  { %p4820_p12 = pnand %p4818_p11, %p4815_p10 }
  0x3b   :  { %4823 = shalt.err (!%p4820_p12)
}
  0x3c   :  { %s4824_s20 = scalar_lea.vmem %s4945_s27, 256  ;;  %p4829_p0 = scmp.lt.s32.totalorder %s4945_s27, %s4945_s27 }
  0x3d   :  { %p4825_p13 = scmp.ne.s32.totalorder %s4945_s27, %s4824_s20  ;;  %p4830_p1 = scmp.lt.s32.totalorder %s4824_s20, %s4824_s20 }
  0x3f   :  { %p4831_p2 = por %p4830_p1, %p4829_p0 }
  0x41   :  { %p4832_p3 = pnand %p4831_p2, %p4825_p13 }
  0x43   :  { %4835 = shalt.err (!%p4832_p3)
}
  0x44   :  { %64 = dma.hbm_to_vmem [thread:$0]  %s7134_s4, 256, %s4945_s27, [#allocation9], %s4870_s1, %s4870_s1, %s4871_s21  }
  0x45   :  { %4858 = dma.done.wait [#allocation3], 2048  }
  0x46   :  { %4859 = vsyncadd [#allocation3], 4294965248 }
  0x47   :  { %4860 = dma.done.wait [#allocation6], 8448  }
  0x48   :  { %4861 = vsyncadd [#allocation6], 4294958848 }
  0x49   :  { %4862 = dma.done.wait [#allocation9], 256  }
  0x4a   :  { %4863 = vsyncadd [#allocation9], 4294967040  ;;  %v4280_v0 = vld [vmem:[#allocation7] sm:$0xff]   ;;  %v4281_v1 = vld [vmem:[#allocation7 + $0x8] sm:$0xff]   ;;  %vm407_vm0 = vcmask 261120   ;;  %vm681_vm1 = vcmask 130048  }
  0x4b   :  { %4203 = vmatprep.subr.bf16.mxu0 %v4280_v0  ;;  %v4282_v2 = vld [vmem:[#allocation2] sm:$0xff]   ;;  %v4283_v3 = vld [vmem:[#allocation2 + $0x8] sm:$0xff]   ;;  %v4284_v4 = vld [vmem:[#allocation2 + $0x10] sm:$0xff]   ;;  %s4874_s23 = smov 80   ;;  %s4876_s24 = smov 112  }
  0x4c   :  { %4204 = vmatpush3.bf16.msra.mxu0 %v4280_v0  ;;  %4207 = vmatprep.mubr.msk.bf16.mxu0 %vm407_vm0, %v4282_v2  ;;  %v4285_v5 = vld [vmem:[#allocation2 + $0x18] sm:$0xff]   ;;  %v4286_v6 = vld [vmem:[#allocation2 + $0x20] sm:$0xff]   ;;  %v4287_v7 = vld [vmem:[#allocation2 + $0x28] sm:$0xff]   ;;  %s4879_s25 = smov 32   ;;  %s4880_s27 = smov [#allocation10]  }
  0x4d   :  { %4205 = vmatprep.subr.bf16.mxu0 %v4281_v1  ;;  %v4288_v8 = vld [vmem:[#allocation2 + $0x30] sm:$0xff]   ;;  %v4289_v9 = vld [vmem:[#allocation2 + $0x38] sm:$0xff]   ;;  %v4290_v10 = vld [vmem:[#allocation2 + $0x40] sm:$0xff]   ;;  %s3937_s28 = sshll.u32 %s4880_s27, 4  ;;  %s3938_s28 = int_to_ptr.vmem [resolvable:$true] %s3937_s28 }
  0x4e   :  { %v4291_v11 = vld [vmem:[#allocation2 + $0x48] sm:$0xff]   ;;  %v4292_v12 = vld [vmem:[#allocation2 + $0x50] sm:$0xff]   ;;  %v4293_v13 = vld [vmem:[#allocation2 + $0x58] sm:$0xff]   ;;  %s4836_s29 = scalar_lea.vmem %s3938_s28, 256  ;;  %p4841_p5 = scmp.lt.s32.totalorder %s3938_s28, %s3938_s28 }
  0x4f   :  { %v4294_v14 = vld [vmem:[#allocation2 + $0x60] sm:$0xff]   ;;  %v4295_v15 = vld [vmem:[#allocation2 + $0x68] sm:$0xff]   ;;  %v4296_v16 = vld [vmem:[#allocation2 + $0x70] sm:$0xff]   ;;  %p4837_p4 = scmp.ne.s32.totalorder %s3938_s28, %s4836_s29  ;;  %p4842_p6 = scmp.lt.s32.totalorder %s4836_s29, %s4836_s29 }
  0x50   :  { %4206 = vmatpush3.bf16.msra.mxu0 %v4281_v1  ;;  %v4297_v17 = vld [vmem:[#allocation2 + $0x78] sm:$0xff]   ;;  %v5001_v19 = vld [vmem:[%s7133_s3] ss:$0 sm:$0xff]  ;;  %s4875_s3 = smov 96  }
  0x51   :  { %p4843_p7 = por %p4842_p6, %p4841_p5 }
  0x53   :  { %4208 = vmatmul.mubr.msk.bf16.vlgmr.msra.gmra.mrb[0].mxu0 %vm407_vm0, %v4283_v3  ;;  %p4844_p8 = pnand %p4843_p7, %p4837_p4 }
  0x54   :  { %4211 = vmatprep.mubr.msk.bf16.mxu0 %vm407_vm0, %v4284_v4 }
  0x5b   :  { %4212 = vmatmul.mubr.msk.bf16.gmra.mrb[4].mxu0 %vm407_vm0, %v4285_v5 }
  0x5c   :  { %4215 = vmatprep.mubr.msk.bf16.mxu0 %vm407_vm0, %v4286_v6 }
  0x63   :  { %4216 = vmatmul.mubr.msk.bf16.gmra.mrb[8].mxu0 %vm407_vm0, %v4287_v7 }
  0x64   :  { %4219 = vmatprep.mubr.msk.bf16.mxu0 %vm407_vm0, %v4288_v8 }
  0x6b   :  { %4220 = vmatmul.mubr.msk.bf16.gmra.mrb[12].mxu0 %vm407_vm0, %v4289_v9 }
  0x6c   :  { %4223 = vmatprep.mubr.msk.bf16.mxu0 %vm407_vm0, %v4290_v10 }
  0x73   :  { %4224 = vmatmul.mubr.msk.bf16.gmra.mrb[16].mxu0 %vm407_vm0, %v4291_v11 }
  0x74   :  { %4227 = vmatprep.mubr.msk.bf16.mxu0 %vm407_vm0, %v4292_v12 }
  0x7b   :  { %4228 = vmatmul.mubr.msk.bf16.gmra.mrb[20].mxu0 %vm407_vm0, %v4293_v13 }
  0x7c   :  { %4231 = vmatprep.mubr.msk.bf16.mxu0 %vm407_vm0, %v4294_v14 }
  0x83   :  { %4232 = vmatmul.mubr.msk.bf16.gmra.mrb[24].mxu0 %vm407_vm0, %v4295_v15 }
  0x84   :  { %4235 = vmatprep.mubr.msk.bf16.mxu0 %vm407_vm0, %v4296_v16 }
  0x8b   :  { %4236 = vmatmul.mubr.msk.bf16.gmra.mrb[28].mxu0 %vm407_vm0, %v4297_v17 }
 0x126   :  { %v4209_v18 = vpop.f32.mrb[0].mxu0 }
 0x127   :  { %v490_v20 = vpop.f32.mrb[1].mxu0  ;;  %v5058_v53 = vadd.f32 %v4209_v18, %v5001_v19 }
 0x128   :  { %v4210_v21 = vpop.f32.mrb[2].mxu0  ;;  %v5004_v23 = vadd.f32 %v5001_v19, %v490_v20 }
 0x129   :  { %v493_v22 = vpop.f32.mrb[3].mxu0  ;;  %v5048_v50 = vadd.f32 %v4210_v21, %v5001_v19  ;;  %7388 = vst [vmem:[#allocation27_spill] sm:$0xff] %v5058_v53 }
 0x12a   :  { %7376 = vst [vmem:[#allocation15_spill] sm:$0xff] %v5004_v23  ;;  %v5007_v24 = vadd.f32 %v5001_v19, %v493_v22 }
 0x12b   :  { %7386 = vst [vmem:[#allocation25_spill] sm:$0xff] %v5048_v50  ;;  %v5069_v57 = vpack.c.bf16 %v5048_v50, %v5058_v53  ;;  %v137_v53 = vld [vmem:[#allocation5 + $0xc8] sm:$0xff] }
 0x12c   :  { %7377 = vst [vmem:[#allocation16_spill] sm:$0xff] %v5007_v24  ;;  %v5011_v25 = vpack.c.bf16 %v5007_v24, %v5004_v23 }
 0x12e   :  { %v4213_v26 = vpop.f32.mrb[4].mxu0  ;;  %2132 = vrot.lane.b32.xlu1 %v5011_v25, %s4874_s23  ;;  %649 = vrot.lane.b32.xlu0 %v5011_v25, %s4875_s3 }
 0x12f   :  { %4120 = vmatprep.mubr.msk.bf16.mxu1 %vm681_vm1, %v5011_v25  ;;  %v506_v27 = vpop.f32.mrb[5].mxu0  ;;  %v5117_v10 = vadd.f32 %v4213_v26, %v5001_v19 }
 0x130   :  { %v4214_v28 = vpop.f32.mrb[6].mxu0  ;;  %v5089_v0 = vadd.f32 %v5001_v19, %v506_v27 }
 0x131   :  { %v509_v29 = vpop.f32.mrb[7].mxu0  ;;  %v5114_v9 = vadd.f32 %v4214_v28, %v5001_v19  ;;  %7397 = vst [vmem:[#allocation36_spill] sm:$0xff] %v5117_v10 }
 0x132   :  { %v5080_v61 = vadd.f32 %v5001_v19, %v509_v29  ;;  %7393 = vst [vmem:[#allocation32_spill] sm:$0xff] %v5089_v0 }
 0x133   :  { %7396 = vst [vmem:[#allocation35_spill] sm:$0xff] %v5114_v9  ;;  %v5134_v16 = vpack.c.bf16 %v5114_v9, %v5117_v10 }
 0x134   :  { %7390 = vst [vmem:[#allocation29_spill] sm:$0xff] %v5080_v61  ;;  %v5104_v5 = vpack.c.bf16 %v5080_v61, %v5089_v0 }
 0x136   :  { %v4217_v30 = vpop.f32.mrb[8].mxu0 }
 0x137   :  { %v5020_v31 = vadd.f32 %v4217_v30, %v5001_v19  ;;  %v5022_v32 = vpop.f32.mrb[9].mxu0 }
 0x138   :  { %v4218_v33 = vpop.f32.mrb[10].mxu0  ;;  %v5165_v30 = vadd.f32 %v5001_v19, %v5022_v32 }
 0x139   :  { %7378 = vst [vmem:[#allocation17_spill] sm:$0xff] %v5020_v31  ;;  %v5025_v34 = vadd.f32 %v4218_v33, %v5001_v19  ;;  %v5027_v35 = vpop.f32.mrb[11].mxu0 }
 0x13a   :  { %v5155_v27 = vadd.f32 %v5001_v19, %v5027_v35  ;;  %7407 = vst [vmem:[#allocation46_spill] sm:$0xff] %v5165_v30 }
 0x13b   :  { %7379 = vst [vmem:[#allocation18_spill] sm:$0xff] %v5025_v34 }
 0x13c   :  { %7404 = vst [vmem:[#allocation43_spill] sm:$0xff] %v5155_v27  ;;  %v5177_v35 = vpack.c.bf16 %v5155_v27, %v5165_v30  ;;  %v133_v27 = vld [vmem:[#allocation5 + $0xa8] sm:$0xff] }
 0x13e   :  { %v4221_v36 = vpop.f32.mrb[12].mxu0 }
 0x13f   :  { %v5030_v37 = vadd.f32 %v4221_v36, %v5001_v19  ;;  %v538_v38 = vpop.f32.mrb[13].mxu0 }
 0x140   :  { %v5033_v39 = vadd.f32 %v5001_v19, %v538_v38  ;;  %v4222_v40 = vpop.f32.mrb[14].mxu0 }
 0x141   :  { %7380 = vst [vmem:[#allocation19_spill] sm:$0xff] %v5030_v37  ;;  %v5036_v41 = vadd.f32 %v4222_v40, %v5001_v19  ;;  %v541_v42 = vpop.f32.mrb[15].mxu0 }
 0x142   :  { %7381 = vst [vmem:[#allocation20_spill] sm:$0xff] %v5033_v39  ;;  %v5039_v43 = vadd.f32 %v5001_v19, %v541_v42 }
 0x143   :  { %7382 = vst [vmem:[#allocation21_spill] sm:$0xff] %v5036_v41  ;;  %v5221_v40 = vpack.c.bf16 %v5036_v41, %v5030_v37  ;;  %v129_v41 = vld [vmem:[#allocation5 + $0x88] sm:$0xff] }
 0x144   :  { %7383 = vst [vmem:[#allocation22_spill] sm:$0xff] %v5039_v43  ;;  %v5209_v38 = vpack.c.bf16 %v5039_v43, %v5033_v39 }
 0x146   :  { %v4225_v44 = vpop.f32.mrb[16].mxu0 }
 0x147   :  { %v554_v45 = vpop.f32.mrb[17].mxu0  ;;  %v5061_v54 = vadd.f32 %v4225_v44, %v5001_v19 }
 0x148   :  { %v4226_v46 = vpop.f32.mrb[18].mxu0  ;;  %v5042_v48 = vadd.f32 %v5001_v19, %v554_v45 }
 0x149   :  { %v557_v47 = vpop.f32.mrb[19].mxu0  ;;  %v5051_v51 = vadd.f32 %v4226_v46, %v5001_v19  ;;  %7389 = vst [vmem:[#allocation28_spill] sm:$0xff] %v5061_v54 }
 0x14a   :  { %7384 = vst [vmem:[#allocation23_spill] sm:$0xff] %v5042_v48  ;;  %v5045_v49 = vadd.f32 %v5001_v19, %v557_v47 }
 0x14b   :  { %7387 = vst [vmem:[#allocation26_spill] sm:$0xff] %v5051_v51  ;;  %v5073_v58 = vpack.c.bf16 %v5051_v51, %v5061_v54 }
 0x14c   :  { %7385 = vst [vmem:[#allocation24_spill] sm:$0xff] %v5045_v49  ;;  %v5055_v52 = vpack.c.bf16 %v5045_v49, %v5042_v48 }
 0x14e   :  { %v4229_v55 = vpop.f32.mrb[20].mxu0  ;;  %2148 = vrot.lane.b32.xlu1 %v5055_v52, %s4874_s23  ;;  %665 = vrot.lane.b32.xlu0 %v5055_v52, %s4875_s3 }
 0x14f   :  { %v570_v56 = vpop.f32.mrb[21].mxu0  ;;  %v5120_v11 = vadd.f32 %v4229_v55, %v5001_v19 }
 0x150   :  { %v4230_v59 = vpop.f32.mrb[22].mxu0  ;;  %v5083_v62 = vadd.f32 %v5001_v19, %v570_v56 }
 0x151   :  { %v573_v60 = vpop.f32.mrb[23].mxu0  ;;  %7398 = vst [vmem:[#allocation37_spill] sm:$0xff] %v5120_v11  ;;  %v5123_v12 = vadd.f32 %v4230_v59, %v5001_v19 }
 0x152   :  { %667 = vrot.lane.b32.xlu1 %v5073_v58, %s4875_s3  ;;  %651 = vrot.lane.b32.xlu0 %v5069_v57, %s4875_s3  ;;  %7391 = vst [vmem:[#allocation30_spill] sm:$0xff] %v5083_v62  ;;  %v5086_v63 = vadd.f32 %v5001_v19, %v573_v60 }
 0x153   :  { %7399 = vst [vmem:[#allocation38_spill] sm:$0xff] %v5123_v12  ;;  %v5138_v17 = vpack.c.bf16 %v5123_v12, %v5120_v11 }
 0x154   :  { %7392 = vst [vmem:[#allocation31_spill] sm:$0xff] %v5086_v63  ;;  %v5093_v1 = vpack.c.bf16 %v5086_v63, %v5083_v62 }
 0x156   :  { %v4233_v2 = vpop.f32.mrb[24].mxu0  ;;  %2150 = vrot.lane.b32.xlu1 %v5073_v58, %s4874_s23  ;;  %2134 = vrot.lane.b32.xlu0 %v5069_v57, %s4874_s23 }
 0x157   :  { %v5100_v3 = vadd.f32 %v4233_v2, %v5001_v19  ;;  %v586_v4 = vpop.f32.mrb[25].mxu0 }
 0x158   :  { %v4234_v6 = vpop.f32.mrb[26].mxu0  ;;  %v5158_v28 = vadd.f32 %v5001_v19, %v586_v4 }
 0x159   :  { %7394 = vst [vmem:[#allocation33_spill] sm:$0xff] %v5100_v3  ;;  %v5107_v7 = vadd.f32 %v4234_v6, %v5001_v19  ;;  %v589_v8 = vpop.f32.mrb[27].mxu0 }
 0x15a   :  { %669 = vrot.lane.b32.xlu1 %v5093_v1, %s4875_s3  ;;  %653 = vrot.lane.b32.xlu0 %v5104_v5, %s4875_s3  ;;  %7405 = vst [vmem:[#allocation44_spill] sm:$0xff] %v5158_v28  ;;  %v5161_v29 = vadd.f32 %v5001_v19, %v589_v8 }
 0x15b   :  { %7395 = vst [vmem:[#allocation34_spill] sm:$0xff] %v5107_v7  ;;  %v5193_v32 = vpack.c.bf16 %v5107_v7, %v5100_v3  ;;  %v127_v7 = vld [vmem:[#allocation5 + $0x78] sm:$0xff] }
 0x15c   :  { %7406 = vst [vmem:[#allocation45_spill] sm:$0xff] %v5161_v29  ;;  %v5169_v33 = vpack.c.bf16 %v5161_v29, %v5158_v28 }
 0x15e   :  { %v4237_v13 = vpop.f32.mrb[28].mxu0  ;;  %2152 = vrot.lane.b32.xlu1 %v5093_v1, %s4874_s23  ;;  %2136 = vrot.lane.b32.xlu0 %v5104_v5, %s4874_s23 }
 0x15f   :  { %v5130_v14 = vadd.f32 %v4237_v13, %v5001_v19  ;;  %v602_v15 = vpop.f32.mrb[29].mxu0 }
 0x160   :  { %v5141_v18 = vadd.f32 %v5001_v19, %v602_v15  ;;  %v4238_v20 = vpop.f32.mrb[30].mxu0 }
 0x161   :  { %7400 = vst [vmem:[#allocation39_spill] sm:$0xff] %v5130_v14  ;;  %v5144_v21 = vadd.f32 %v4238_v20, %v5001_v19  ;;  %v605_v22 = vpop.f32.mrb[31].mxu0 }
 0x162   :  { %7401 = vst [vmem:[#allocation40_spill] sm:$0xff] %v5141_v18  ;;  %v5147_v26 = vadd.f32 %v5001_v19, %v605_v22  ;;  %671 = vrot.lane.b32.xlu1 %v5138_v17, %s4875_s3  ;;  %655 = vrot.lane.b32.xlu0 %v5134_v16, %s4875_s3  ;;  %v5189_v19 = vpack.c.bf16 %v5025_v34, %v5020_v31 }
 0x163   :  { %7402 = vst [vmem:[#allocation41_spill] sm:$0xff] %v5144_v21  ;;  %v5225_v42 = vpack.c.bf16 %v5144_v21, %v5130_v14 }
 0x164   :  { %7403 = vst [vmem:[#allocation42_spill] sm:$0xff] %v5147_v26  ;;  %v5201_v36 = vpack.c.bf16 %v5147_v26, %v5141_v18 }
 0x166   :  { %2154 = vrot.lane.b32.xlu1 %v5138_v17, %s4874_s23  ;;  %2138 = vrot.lane.b32.xlu0 %v5134_v16, %s4874_s23 }
 0x16a   :  { %673 = vrot.lane.b32.xlu1 %v5169_v33, %s4875_s3  ;;  %657 = vrot.lane.b32.xlu0 %v5177_v35, %s4875_s3 }
 0x16e   :  { %2156 = vrot.lane.b32.xlu1 %v5169_v33, %s4874_s23  ;;  %2140 = vrot.lane.b32.xlu0 %v5177_v35, %s4874_s23 }
 0x172   :  { %675 = vrot.lane.b32.xlu1 %v5193_v32, %s4875_s3  ;;  %659 = vrot.lane.b32.xlu0 %v5189_v19, %s4875_s3 }
 0x176   :  { %2158 = vrot.lane.b32.xlu1 %v5193_v32, %s4874_s23  ;;  %2142 = vrot.lane.b32.xlu0 %v5189_v19, %s4874_s23 }
 0x17a   :  { %677 = vrot.lane.b32.xlu1 %v5201_v36, %s4875_s3  ;;  %661 = vrot.lane.b32.xlu0 %v5209_v38, %s4875_s3 }
 0x17e   :  { %2160 = vrot.lane.b32.xlu1 %v5201_v36, %s4874_s23  ;;  %2144 = vrot.lane.b32.xlu0 %v5209_v38, %s4874_s23 }
 0x182   :  { %679 = vrot.lane.b32.xlu1 %v5225_v42, %s4875_s3  ;;  %663 = vrot.lane.b32.xlu0 %v5221_v40, %s4875_s3 }
 0x186   :  { %2162 = vrot.lane.b32.xlu1 %v5225_v42, %s4874_s23  ;;  %2146 = vrot.lane.b32.xlu0 %v5221_v40, %s4874_s23 }
 0x18a   :  { %2102 = vrot.lane.b32.xlu1 %v5069_v57, %s4876_s24  ;;  %2100 = vrot.lane.b32.xlu0 %v5011_v25, %s4876_s24 }
 0x18e   :  { %2106 = vrot.lane.b32.xlu1 %v5134_v16, %s4876_s24  ;;  %2104 = vrot.lane.b32.xlu0 %v5104_v5, %s4876_s24 }
 0x192   :  { %2110 = vrot.lane.b32.xlu1 %v5189_v19, %s4876_s24  ;;  %2108 = vrot.lane.b32.xlu0 %v5177_v35, %s4876_s24 }
 0x196   :  { %2114 = vrot.lane.b32.xlu1 %v5221_v40, %s4876_s24  ;;  %2112 = vrot.lane.b32.xlu0 %v5209_v38, %s4876_s24 }
 0x19a   :  { %2118 = vrot.lane.b32.xlu1 %v5073_v58, %s4876_s24  ;;  %2116 = vrot.lane.b32.xlu0 %v5055_v52, %s4876_s24 }
 0x19e   :  { %2122 = vrot.lane.b32.xlu1 %v5138_v17, %s4876_s24  ;;  %2120 = vrot.lane.b32.xlu0 %v5093_v1, %s4876_s24 }
 0x1a0   :  { %v2133_v44 = vpop.permute.xlu1 %2132  ;;  %v650_v45 = vpop.permute.xlu0 %649 }
 0x1a1   :  { %v2213_v55 = vsel %vm681_vm1, %v2133_v44, 0  ;;  %v731_v56 = vsel %vm681_vm1, %v650_v45, 0 }
 0x1a2   :  { %2126 = vrot.lane.b32.xlu1 %v5193_v32, %s4876_s24  ;;  %2124 = vrot.lane.b32.xlu0 %v5169_v33, %s4876_s24 }
 0x1a6   :  { %2130 = vrot.lane.b32.xlu1 %v5225_v42, %s4876_s24  ;;  %2128 = vrot.lane.b32.xlu0 %v5201_v36, %s4876_s24 }
 0x1c0   :  { %v2149_v46 = vpop.permute.xlu1 %2148  ;;  %v666_v47 = vpop.permute.xlu0 %665 }
 0x1c1   :  { %4247 = vmatprep.subr.msk.bf16.mxu1 %vm681_vm1, %v666_v47  ;;  %4255 = vmatprep.subr.msk.bf16.mxu0 %vm681_vm1, %v2149_v46 }
 0x1c2   :  { %4105 = vmatpush3.bf16.xpose.msra.mxu1 %v731_v56  ;;  %4153 = vmatpush3.bf16.xpose.msra.mxu0 %v2213_v55 }
 0x1c4   :  { %v668_v59 = vpop.permute.xlu1 %667  ;;  %v652_v60 = vpop.permute.xlu0 %651 }
 0x1c5   :  { %4248 = vmatprep.subr.msk.bf16.mxu1 %vm681_vm1, %v668_v59  ;;  %v734_v8 = vsel %vm681_vm1, %v652_v60, 0 }
 0x1c8   :  { %v2151_v2 = vpop.permute.xlu1 %2150  ;;  %v2135_v4 = vpop.permute.xlu0 %2134 }
 0x1c9   :  { %v2216_v6 = vsel %vm681_vm1, %v2135_v4, 0  ;;  %4256 = vmatprep.subr.msk.bf16.mxu0 %vm681_vm1, %v2151_v2 }
 0x1ca   :  { %4107 = vmatpush3.bf16.xpose.msra.mxu1 %v734_v8  ;;  %4155 = vmatpush3.bf16.xpose.msra.mxu0 %v2216_v6 }
 0x1cc   :  { %v670_v13 = vpop.permute.xlu1 %669  ;;  %v654_v15 = vpop.permute.xlu0 %653 }
 0x1cd   :  { %4249 = vmatprep.subr.msk.bf16.mxu1 %vm681_vm1, %v670_v13  ;;  %v737_v45 = vsel %vm681_vm1, %v654_v15, 0 }
 0x1d0   :  { %v2153_v20 = vpop.permute.xlu1 %2152  ;;  %v2137_v22 = vpop.permute.xlu0 %2136 }
 0x1d1   :  { %v2219_v44 = vsel %vm681_vm1, %v2137_v22, 0  ;;  %4257 = vmatprep.subr.msk.bf16.mxu0 %vm681_vm1, %v2153_v20 }
 0x1d2   :  { %4109 = vmatpush3.bf16.xpose.msra.mxu1 %v737_v45  ;;  %4157 = vmatpush3.bf16.xpose.msra.mxu0 %v2219_v44 }
 0x1d4   :  { %v672_v46 = vpop.permute.xlu1 %671  ;;  %v656_v47 = vpop.permute.xlu0 %655 }
 0x1d5   :  { %4250 = vmatprep.subr.msk.bf16.mxu1 %vm681_vm1, %v672_v46  ;;  %v740_v60 = vsel %vm681_vm1, %v656_v47, 0 }
 0x1d8   :  { %v2155_v55 = vpop.permute.xlu1 %2154  ;;  %v2139_v56 = vpop.permute.xlu0 %2138 }
 0x1d9   :  { %v2222_v59 = vsel %vm681_vm1, %v2139_v56, 0  ;;  %4258 = vmatprep.subr.msk.bf16.mxu0 %vm681_vm1, %v2155_v55 }
 0x1da   :  { %4111 = vmatpush3.bf16.xpose.msra.mxu1 %v740_v60  ;;  %4159 = vmatpush3.bf16.xpose.msra.mxu0 %v2222_v59 }
 0x1dc   :  { %v674_v2 = vpop.permute.xlu1 %673  ;;  %v658_v4 = vpop.permute.xlu0 %657 }
 0x1dd   :  { %4251 = vmatprep.subr.msk.bf16.mxu1 %vm681_vm1, %v674_v2  ;;  %v743_v15 = vsel %vm681_vm1, %v658_v4, 0 }
 0x1e0   :  { %v2157_v6 = vpop.permute.xlu1 %2156  ;;  %v2141_v8 = vpop.permute.xlu0 %2140 }
 0x1e1   :  { %v2225_v13 = vsel %vm681_vm1, %v2141_v8, 0  ;;  %4259 = vmatprep.subr.msk.bf16.mxu0 %vm681_vm1, %v2157_v6 }
 0x1e2   :  { %4113 = vmatpush3.bf16.xpose.msra.mxu1 %v743_v15  ;;  %4161 = vmatpush3.bf16.xpose.msra.mxu0 %v2225_v13 }
 0x1e4   :  { %v676_v20 = vpop.permute.xlu1 %675  ;;  %v660_v22 = vpop.permute.xlu0 %659 }
 0x1e5   :  { %4252 = vmatprep.subr.msk.bf16.mxu1 %vm681_vm1, %v676_v20  ;;  %v746_v47 = vsel %vm681_vm1, %v660_v22, 0 }
 0x1e8   :  { %v2159_v44 = vpop.permute.xlu1 %2158  ;;  %v2143_v45 = vpop.permute.xlu0 %2142 }
 0x1e9   :  { %v2228_v46 = vsel %vm681_vm1, %v2143_v45, 0  ;;  %4260 = vmatprep.subr.msk.bf16.mxu0 %vm681_vm1, %v2159_v44 }
 0x1ea   :  { %4115 = vmatpush3.bf16.xpose.msra.mxu1 %v746_v47  ;;  %4163 = vmatpush3.bf16.xpose.msra.mxu0 %v2228_v46 }
 0x1ec   :  { %v678_v55 = vpop.permute.xlu1 %677  ;;  %v662_v56 = vpop.permute.xlu0 %661 }
 0x1ed   :  { %4253 = vmatprep.subr.msk.bf16.mxu1 %vm681_vm1, %v678_v55  ;;  %v749_v4 = vsel %vm681_vm1, %v662_v56, 0  ;;  %v114_v55 = vld [vmem:[#allocation5 + $0x10] sm:$0xff]  ;;  %v115_v56 = vld [vmem:[#allocation5 + $0x18] sm:$0xff] }
 0x1f0   :  { %v2161_v59 = vpop.permute.xlu1 %2160  ;;  %v2145_v60 = vpop.permute.xlu0 %2144 }
 0x1f1   :  { %v2231_v2 = vsel %vm681_vm1, %v2145_v60, 0  ;;  %4261 = vmatprep.subr.msk.bf16.mxu0 %vm681_vm1, %v2161_v59 }
 0x1f2   :  { %4117 = vmatpush3.bf16.xpose.msra.mxu1 %v749_v4  ;;  %4165 = vmatpush3.bf16.xpose.msra.mxu0 %v2231_v2  ;;  %v3953_v2 = vadd.f32 -1.0, %v114_v55  ;;  %v116_v4 = vld [vmem:[#allocation5 + $0x20] sm:$0xff] }
 0x1f4   :  { %v680_v6 = vpop.permute.xlu1 %679  ;;  %v664_v8 = vpop.permute.xlu0 %663 }
 0x1f5   :  { %4254 = vmatprep.subr.msk.bf16.mxu1 %vm681_vm1, %v680_v6  ;;  %v752_v22 = vsel %vm681_vm1, %v664_v8, 0  ;;  %v117_v6 = vld [vmem:[#allocation5 + $0x28] sm:$0xff] }
 0x1f8   :  { %v2163_v13 = vpop.permute.xlu1 %2162  ;;  %v2147_v15 = vpop.permute.xlu0 %2146 }
 0x1f9   :  { %v2234_v20 = vsel %vm681_vm1, %v2147_v15, 0  ;;  %4262 = vmatprep.subr.msk.bf16.mxu0 %vm681_vm1, %v2163_v13  ;;  %v242_v15 = vmul.f32 1e+30, %v3953_v2 }
 0x1fa   :  { %4119 = vmatpush3.bf16.xpose.msra.mxu1 %v752_v22  ;;  %4167 = vmatpush3.bf16.xpose.msra.mxu0 %v2234_v20 }
 0x1fc   :  { %v2101_v44 = vpop.permute.xlu0 %2100  ;;  %v2103_v45 = vpop.permute.xlu1 %2102 }
 0x1fd   :  { %4168 = vmatprep.mubr.msk.bf16.mxu0 %vm681_vm1, %v2101_v44 }
 0x200   :  { %v2105_v46 = vpop.permute.xlu0 %2104  ;;  %v2107_v47 = vpop.permute.xlu1 %2106 }
 0x201   :  { %4121 = vmatmul.mubr.msk.bf16.vlgmr.msra.gmra.mrb[0].mxu1 %vm681_vm1, %v5011_v25  ;;  %4169 = vmatmul.mubr.msk.bf16.vlgmr.msra.gmra.mrb[32].mxu0 %vm681_vm1, %v2101_v44  ;;  %v3955_v44 = vadd.f32 -1.0, %v116_v4 }
 0x202   :  { %4122 = vmatprep.mubr.msk.bf16.mxu1 %vm681_vm1, %v5069_v57  ;;  %4170 = vmatprep.mubr.msk.bf16.mxu0 %vm681_vm1, %v2103_v45 }
 0x204   :  { %v2109_v25 = vpop.permute.xlu0 %2108 }
 0x209   :  { %4123 = vmatmul.mubr.msk.bf16.gmra.mrb[4].mxu1 %vm681_vm1, %v5069_v57  ;;  %4171 = vmatmul.mubr.msk.bf16.gmra.mrb[36].mxu0 %vm681_vm1, %v2103_v45  ;;  %v2111_v57 = vpop.permute.xlu1 %2110  ;;  %v118_v45 = vld [vmem:[#allocation5 + $0x30] sm:$0xff] }
 0x20a   :  { %4124 = vmatprep.mubr.msk.bf16.mxu1 %vm681_vm1, %v5104_v5  ;;  %4172 = vmatprep.mubr.msk.bf16.mxu0 %vm681_vm1, %v2105_v46 }
 0x211   :  { %4125 = vmatmul.mubr.msk.bf16.gmra.mrb[8].mxu1 %vm681_vm1, %v5104_v5  ;;  %4173 = vmatmul.mubr.msk.bf16.gmra.mrb[40].mxu0 %vm681_vm1, %v2105_v46  ;;  %v2113_v5 = vpop.permute.xlu0 %2112 }
 0x212   :  { %4126 = vmatprep.mubr.msk.bf16.mxu1 %vm681_vm1, %v5134_v16  ;;  %4174 = vmatprep.mubr.msk.bf16.mxu0 %vm681_vm1, %v2107_v47 }
 0x219   :  { %4127 = vmatmul.mubr.msk.bf16.gmra.mrb[12].mxu1 %vm681_vm1, %v5134_v16  ;;  %4175 = vmatmul.mubr.msk.bf16.gmra.mrb[44].mxu0 %vm681_vm1, %v2107_v47  ;;  %v2115_v16 = vpop.permute.xlu1 %2114 }
 0x21a   :  { %4128 = vmatprep.mubr.msk.bf16.mxu1 %vm681_vm1, %v5177_v35  ;;  %4176 = vmatprep.mubr.msk.bf16.mxu0 %vm681_vm1, %v2109_v25 }
 0x221   :  { %4129 = vmatmul.mubr.msk.bf16.gmra.mrb[16].mxu1 %vm681_vm1, %v5177_v35  ;;  %4177 = vmatmul.mubr.msk.bf16.gmra.mrb[48].mxu0 %vm681_vm1, %v2109_v25  ;;  %v2117_v35 = vpop.permute.xlu0 %2116 }
 0x222   :  { %4130 = vmatprep.mubr.msk.bf16.mxu1 %vm681_vm1, %v5189_v19  ;;  %4178 = vmatprep.mubr.msk.bf16.mxu0 %vm681_vm1, %v2111_v57 }
 0x229   :  { %4131 = vmatmul.mubr.msk.bf16.gmra.mrb[20].mxu1 %vm681_vm1, %v5189_v19  ;;  %4179 = vmatmul.mubr.msk.bf16.gmra.mrb[52].mxu0 %vm681_vm1, %v2111_v57  ;;  %v2119_v19 = vpop.permute.xlu1 %2118 }
 0x22a   :  { %4132 = vmatprep.mubr.msk.bf16.mxu1 %vm681_vm1, %v5209_v38  ;;  %4180 = vmatprep.mubr.msk.bf16.mxu0 %vm681_vm1, %v2113_v5 }
 0x231   :  { %4133 = vmatmul.mubr.msk.bf16.gmra.mrb[24].mxu1 %vm681_vm1, %v5209_v38  ;;  %4181 = vmatmul.mubr.msk.bf16.gmra.mrb[56].mxu0 %vm681_vm1, %v2113_v5  ;;  %v2121_v38 = vpop.permute.xlu0 %2120  ;;  %v3956_v5 = vadd.f32 -1.0, %v117_v6  ;;  %v120_v6 = vld [vmem:[#allocation5 + $0x40] sm:$0xff] }
 0x232   :  { %4134 = vmatprep.mubr.msk.bf16.mxu1 %vm681_vm1, %v5221_v40  ;;  %4182 = vmatprep.mubr.msk.bf16.mxu0 %vm681_vm1, %v2115_v16 }
 0x233   :  { %v245_v4 = vmul.f32 1e+30, %v3956_v5  ;;  %v3959_v5 = vadd.f32 -1.0, %v120_v6 }
 0x239   :  { %4135 = vmatmul.mubr.msk.bf16.gmra.mrb[28].mxu1 %vm681_vm1, %v5221_v40  ;;  %4183 = vmatmul.mubr.msk.bf16.gmra.mrb[60].mxu0 %vm681_vm1, %v2115_v16  ;;  %v2123_v40 = vpop.permute.xlu1 %2122 }
 0x23a   :  { %4136 = vmatprep.mubr.msk.bf16.mxu1 %vm681_vm1, %v5055_v52  ;;  %4184 = vmatprep.mubr.msk.bf16.mxu0 %vm681_vm1, %v2117_v35 }
 0x241   :  { %4137 = vmatmul.mubr.msk.bf16.gmra.mrb[32].mxu1 %vm681_vm1, %v5055_v52  ;;  %4185 = vmatmul.mubr.msk.bf16.gmra.mrb[64].mxu0 %vm681_vm1, %v2117_v35  ;;  %v2125_v52 = vpop.permute.xlu0 %2124 }
 0x242   :  { %4138 = vmatprep.mubr.msk.bf16.mxu1 %vm681_vm1, %v5073_v58  ;;  %4186 = vmatprep.mubr.msk.bf16.mxu0 %vm681_vm1, %v2119_v19 }
 0x249   :  { %4139 = vmatmul.mubr.msk.bf16.gmra.mrb[36].mxu1 %vm681_vm1, %v5073_v58  ;;  %4187 = vmatmul.mubr.msk.bf16.gmra.mrb[68].mxu0 %vm681_vm1, %v2119_v19  ;;  %v2127_v58 = vpop.permute.xlu1 %2126 }
 0x24a   :  { %4140 = vmatprep.mubr.msk.bf16.mxu1 %vm681_vm1, %v5093_v1  ;;  %4188 = vmatprep.mubr.msk.bf16.mxu0 %vm681_vm1, %v2121_v38 }
 0x251   :  { %4141 = vmatmul.mubr.msk.bf16.gmra.mrb[40].mxu1 %vm681_vm1, %v5093_v1  ;;  %4189 = vmatmul.mubr.msk.bf16.gmra.mrb[72].mxu0 %vm681_vm1, %v2121_v38  ;;  %v2129_v1 = vpop.permute.xlu0 %2128 }
 0x252   :  { %4142 = vmatprep.mubr.msk.bf16.mxu1 %vm681_vm1, %v5138_v17  ;;  %4190 = vmatprep.mubr.msk.bf16.mxu0 %vm681_vm1, %v2123_v40 }
 0x259   :  { %4143 = vmatmul.mubr.msk.bf16.gmra.mrb[44].mxu1 %vm681_vm1, %v5138_v17  ;;  %4191 = vmatmul.mubr.msk.bf16.gmra.mrb[76].mxu0 %vm681_vm1, %v2123_v40  ;;  %v2131_v17 = vpop.permute.xlu1 %2130 }
 0x25a   :  { %4144 = vmatprep.mubr.msk.bf16.mxu1 %vm681_vm1, %v5169_v33  ;;  %4192 = vmatprep.mubr.msk.bf16.mxu0 %vm681_vm1, %v2125_v52 }
 0x261   :  { %4145 = vmatmul.mubr.msk.bf16.gmra.mrb[48].mxu1 %vm681_vm1, %v5169_v33  ;;  %4193 = vmatmul.mubr.msk.bf16.gmra.mrb[80].mxu0 %vm681_vm1, %v2125_v52  ;;  %v112_v33 = vld [vmem:[#allocation5] sm:$0xff] }
 0x262   :  { %4146 = vmatprep.mubr.msk.bf16.mxu1 %vm681_vm1, %v5193_v32  ;;  %4194 = vmatprep.mubr.msk.bf16.mxu0 %vm681_vm1, %v2127_v58  ;;  %v3951_v59 = vadd.f32 -1.0, %v112_v33  ;;  %v3957_v33 = vadd.f32 -1.0, %v118_v45 }
 0x264   :  { %v240_v8 = vmul.f32 1e+30, %v3951_v59  ;;  %v244_v59 = vmul.f32 1e+30, %v3955_v44 }
 0x269   :  { %4147 = vmatmul.mubr.msk.bf16.gmra.mrb[52].mxu1 %vm681_vm1, %v5193_v32  ;;  %4195 = vmatmul.mubr.msk.bf16.gmra.mrb[84].mxu0 %vm681_vm1, %v2127_v58  ;;  %v113_v32 = vld [vmem:[#allocation5 + $0x8] sm:$0xff] }
 0x26a   :  { %4148 = vmatprep.mubr.msk.bf16.mxu1 %vm681_vm1, %v5201_v36  ;;  %4196 = vmatprep.mubr.msk.bf16.mxu0 %vm681_vm1, %v2129_v1  ;;  %v3952_v60 = vadd.f32 -1.0, %v113_v32 }
 0x26c   :  { %v241_v13 = vmul.f32 1e+30, %v3952_v60 }
 0x271   :  { %4149 = vmatmul.mubr.msk.bf16.gmra.mrb[56].mxu1 %vm681_vm1, %v5201_v36  ;;  %4197 = vmatmul.mubr.msk.bf16.gmra.mrb[88].mxu0 %vm681_vm1, %v2129_v1  ;;  %v3954_v36 = vadd.f32 -1.0, %v115_v56 }
 0x272   :  { %4150 = vmatprep.mubr.msk.bf16.mxu1 %vm681_vm1, %v5225_v42  ;;  %4198 = vmatprep.mubr.msk.bf16.mxu0 %vm681_vm1, %v2131_v17 }
 0x273   :  { %v243_v57 = vmul.f32 1e+30, %v3954_v36 }
 0x279   :  { %4151 = vmatmul.mubr.msk.bf16.gmra.mrb[60].mxu1 %vm681_vm1, %v5225_v42  ;;  %4199 = vmatmul.mubr.msk.bf16.gmra.mrb[92].mxu0 %vm681_vm1, %v2131_v17  ;;  %v119_v42 = vld [vmem:[#allocation5 + $0x38] sm:$0xff] }
 0x27a   :  { %v3958_v32 = vadd.f32 -1.0, %v119_v42  ;;  %v246_v42 = vmul.f32 1e+30, %v3957_v33 }
 0x2d4   :  { %v812_v20 = vpop.f32.mrb[0].mxu1  ;;  %v2294_v22 = vpop.f32.mrb[32].mxu0 }
 0x2d5   :  { %v971_v46 = vmul.f32 0.25, %v812_v20  ;;  %v814_v47 = vpop.f32.mrb[1].mxu1  ;;  %v2296_v25 = vpop.f32.mrb[33].mxu0  ;;  %v2453_v16 = vmul.f32 0.25, %v2294_v22 }
 0x2d6   :  { %v972_v35 = vmul.f32 0.25, %v814_v47  ;;  %v2454_v19 = vmul.f32 0.25, %v2296_v25  ;;  %v816_v38 = vpop.f32.mrb[2].mxu1  ;;  %v2298_v40 = vpop.f32.mrb[34].mxu0  ;;  %v247_v47 = vmul.f32 1e+30, %v3958_v32 }
 0x2d7   :  { %v5377_v52 = vadd.f32 %v971_v46, %v240_v8  ;;  %v973_v58 = vmul.f32 0.25, %v816_v38  ;;  %v818_v1 = vpop.f32.mrb[3].mxu1  ;;  %v2300_v17 = vpop.f32.mrb[35].mxu0  ;;  %v2455_v2 = vmul.f32 0.25, %v2298_v40  ;;  %v5383_v20 = vadd.f32 %v2453_v16, %v240_v8  ;;  %v121_v25 = vld [vmem:[#allocation5 + $0x48] sm:$0xff]  ;;  %v122_v40 = vld [vmem:[#allocation5 + $0x50] sm:$0xff] }
 0x2d8   :  { %v5379_v55 = vadd.f32 %v972_v35, %v241_v13  ;;  %v974_v56 = vmul.f32 0.25, %v818_v1  ;;  %v2456_v36 = vmul.f32 0.25, %v2300_v17  ;;  %v5385_v22 = vadd.f32 %v2454_v19, %v241_v13  ;;  %v123_v8 = vld [vmem:[#allocation5 + $0x58] sm:$0xff] }
 0x2d9   :  { %v5381_v60 = vadd.f32 %v973_v58, %v242_v15  ;;  %v5393_v16 = vadd.f32 %v2455_v2, %v242_v15  ;;  %v3960_v21 = vadd.f32 -1.0, %v121_v25  ;;  %v124_v25 = vld [vmem:[#allocation5 + $0x60] sm:$0xff] }
 0x2da   :  { %v5387_v46 = vadd.f32 %v974_v56, %v243_v57  ;;  %v1099_v45 = vmax.f32 %v5377_v52, %v5379_v55  ;;  %v5395_v13 = vadd.f32 %v2456_v36, %v243_v57  ;;  %v2581_v26 = vmax.f32 %v5383_v20, %v5385_v22 }
 0x2db   :  { %v3961_v57 = vadd.f32 -1.0, %v122_v40  ;;  %v3962_v36 = vadd.f32 -1.0, %v123_v8 }
 0x2dc   :  { %v2304_v35 = vpop.f32.mrb[36].mxu0  ;;  %1100 = vmax.xlane.f32.xlu0 %v1099_v45  ;;  %v822_v44 = vpop.f32.mrb[4].mxu1  ;;  %v1102_v38 = vmax.f32 %v5381_v60, %v5387_v46  ;;  %v2584_v29 = vmax.f32 %v5393_v16, %v5395_v13 }
 0x2dd   :  { %v2457_v19 = vmul.f32 0.25, %v2304_v35  ;;  %v975_v58 = vmul.f32 0.25, %v822_v44  ;;  %v824_v1 = vpop.f32.mrb[5].mxu1  ;;  %v2306_v17 = vpop.f32.mrb[37].mxu0 }
 0x2de   :  { %v976_v33 = vmul.f32 0.25, %v824_v1  ;;  %v2458_v32 = vmul.f32 0.25, %v2306_v17  ;;  %v2308_v56 = vpop.f32.mrb[38].mxu0  ;;  %1103 = vmax.xlane.f32.xlu1 %v1102_v38  ;;  %v826_v45 = vpop.f32.mrb[6].mxu1  ;;  %v248_v1 = vmul.f32 1e+30, %v3959_v5 }
 0x2df   :  { %v5399_v6 = vadd.f32 %v975_v58, %v244_v59  ;;  %v977_v18 = vmul.f32 0.25, %v826_v45  ;;  %v828_v15 = vpop.f32.mrb[7].mxu1  ;;  %v2310_v2 = vpop.f32.mrb[39].mxu0  ;;  %v5403_v17 = vadd.f32 %v2457_v19, %v244_v59  ;;  %v2459_v38 = vmul.f32 0.25, %v2308_v56  ;;  %v125_v58 = vld [vmem:[#allocation5 + $0x68] sm:$0xff] }
 0x2e0   :  { %v5401_v35 = vadd.f32 %v976_v33, %v245_v4  ;;  %v978_v44 = vmul.f32 0.25, %v828_v15  ;;  %2582 = vmax.xlane.f32.xlu0 %v2581_v26  ;;  %v2460_v14 = vmul.f32 0.25, %v2310_v2  ;;  %v5407_v28 = vadd.f32 %v2458_v32, %v245_v4  ;;  %v126_v2 = vld [vmem:[#allocation5 + $0x70] sm:$0xff] }
 0x2e1   :  { %v5409_v45 = vadd.f32 %v977_v18, %v246_v42  ;;  %v249_v26 = vmul.f32 1e+30, %v3960_v21  ;;  %v250_v5 = vmul.f32 1e+30, %v3961_v57  ;;  %v251_v59 = vmul.f32 1e+30, %v3962_v36 }
 0x2e2   :  { %v5411_v40 = vadd.f32 %v978_v44, %v247_v47  ;;  %v1105_v8 = vmax.f32 %v5399_v6, %v5401_v35  ;;  %v3963_v56 = vadd.f32 -1.0, %v124_v25  ;;  %v3964_v15 = vadd.f32 -1.0, %v125_v58 }
 0x2e3   :  { %v5415_v4 = vadd.f32 %v2459_v38, %v246_v42  ;;  %v5417_v18 = vadd.f32 %v2460_v14, %v247_v47  ;;  %v3965_v47 = vadd.f32 -1.0, %v126_v2 }
 0x2e4   :  { %v2314_v19 = vpop.f32.mrb[40].mxu0  ;;  %2585 = vmax.xlane.f32.xlu0 %v2584_v29  ;;  %1106 = vmax.xlane.f32.xlu1 %v1105_v8  ;;  %v832_v33 = vpop.f32.mrb[8].mxu1  ;;  %v2587_v29 = vmax.f32 %v5403_v17, %v5407_v28  ;;  %v1108_v25 = vmax.f32 %v5409_v45, %v5411_v40  ;;  %v3966_v8 = vadd.f32 -1.0, %v127_v7  ;;  %v253_v2 = vmul.f32 1e+30, %v3964_v15 }
 0x2e5   :  { %v2461_v32 = vmul.f32 0.25, %v2314_v19  ;;  %v979_v44 = vmul.f32 0.25, %v832_v33  ;;  %v834_v3 = vpop.f32.mrb[9].mxu1  ;;  %v2316_v12 = vpop.f32.mrb[41].mxu0  ;;  %v2590_v43 = vmax.f32 %v5415_v4, %v5417_v18 }
 0x2e6   :  { %v980_v11 = vmul.f32 0.25, %v834_v3  ;;  %v2462_v21 = vmul.f32 0.25, %v2316_v12  ;;  %v836_v57 = vpop.f32.mrb[10].mxu1  ;;  %v2318_v36 = vpop.f32.mrb[42].mxu0  ;;  %v252_v3 = vmul.f32 1e+30, %v3963_v56 }
 0x2e7   :  { %v5423_v58 = vadd.f32 %v979_v44, %v248_v1  ;;  %v981_v42 = vmul.f32 0.25, %v836_v57  ;;  %v838_v38 = vpop.f32.mrb[11].mxu1  ;;  %v2320_v14 = vpop.f32.mrb[43].mxu0  ;;  %v5427_v12 = vadd.f32 %v2461_v32, %v248_v1  ;;  %v2463_v63 = vmul.f32 0.25, %v2318_v36  ;;  %v128_v44 = vld [vmem:[#allocation5 + $0x80] sm:$0xff] }
 0x2e8   :  { %v5425_v19 = vadd.f32 %v980_v11, %v249_v26  ;;  %v982_v33 = vmul.f32 0.25, %v838_v38  ;;  %2588 = vmax.xlane.f32.xlu0 %v2587_v29  ;;  %1109 = vmax.xlane.f32.xlu1 %v1108_v25  ;;  %v2464_v62 = vmul.f32 0.25, %v2320_v14  ;;  %v5431_v57 = vadd.f32 %v2462_v21, %v249_v26  ;;  %v130_v38 = vld [vmem:[#allocation5 + $0x90] sm:$0xff]  ;;  %v131_v14 = vld [vmem:[#allocation5 + $0x98] sm:$0xff] }
 0x2e9   :  { %v5433_v39 = vadd.f32 %v981_v42, %v250_v5  ;;  %v254_v56 = vmul.f32 1e+30, %v3965_v47  ;;  %v255_v1 = vmul.f32 1e+30, %v3966_v8  ;;  %v3967_v29 = vadd.f32 -1.0, %v128_v44 }
 0x2ea   :  { %v5435_v7 = vadd.f32 %v982_v33, %v251_v59  ;;  %v1111_v11 = vmax.f32 %v5423_v58, %v5425_v19  ;;  %v3968_v25 = vadd.f32 -1.0, %v129_v41  ;;  %v5439_v26 = vadd.f32 %v2463_v63, %v250_v5 }
 0x2eb   :  { %v5441_v21 = vadd.f32 %v2464_v62, %v251_v59  ;;  %v3969_v59 = vadd.f32 -1.0, %v130_v38 }
 0x2ec   :  { %v2324_v32 = vpop.f32.mrb[44].mxu0  ;;  %2591 = vmax.xlane.f32.xlu0 %v2590_v43  ;;  %1112 = vmax.xlane.f32.xlu1 %v1111_v11  ;;  %v842_v36 = vpop.f32.mrb[12].mxu1  ;;  %v2593_v43 = vmax.f32 %v5427_v12, %v5431_v57  ;;  %v1114_v41 = vmax.f32 %v5433_v39, %v5435_v7  ;;  %v3970_v11 = vadd.f32 -1.0, %v131_v14  ;;  %v257_v14 = vmul.f32 1e+30, %v3968_v25 }
 0x2ed   :  { %v2465_v42 = vmul.f32 0.25, %v2324_v32  ;;  %v983_v33 = vmul.f32 0.25, %v842_v36  ;;  %v844_v37 = vpop.f32.mrb[13].mxu1  ;;  %v2326_v51 = vpop.f32.mrb[45].mxu0  ;;  %v2596_v48 = vmax.f32 %v5439_v26, %v5441_v21 }
 0x2ee   :  { %v984_v54 = vmul.f32 0.25, %v844_v37  ;;  %v2466_v15 = vmul.f32 0.25, %v2326_v51  ;;  %v846_v47 = vpop.f32.mrb[14].mxu1  ;;  %v2328_v8 = vpop.f32.mrb[46].mxu0  ;;  %v256_v37 = vmul.f32 1e+30, %v3967_v29 }
 0x2ef   :  { %v5447_v44 = vadd.f32 %v983_v33, %v252_v3  ;;  %v985_v63 = vmul.f32 0.25, %v846_v47  ;;  %v848_v5 = vpop.f32.mrb[15].mxu1  ;;  %v2330_v62 = vpop.f32.mrb[47].mxu0  ;;  %v5451_v51 = vadd.f32 %v2465_v42, %v252_v3  ;;  %v2467_v49 = vmul.f32 0.25, %v2328_v8  ;;  %v132_v33 = vld [vmem:[#allocation5 + $0xa0] sm:$0xff] }
 0x2f0   :  { %v5449_v32 = vadd.f32 %v984_v54, %v253_v2  ;;  %v986_v36 = vmul.f32 0.25, %v848_v5  ;;  %2594 = vmax.xlane.f32.xlu0 %v2593_v43  ;;  %1115 = vmax.xlane.f32.xlu1 %v1114_v41  ;;  %v2468_v30 = vmul.f32 0.25, %v2330_v62  ;;  %v5455_v47 = vadd.f32 %v2466_v15, %v253_v2  ;;  %v134_v5 = vld [vmem:[#allocation5 + $0xb0] sm:$0xff]  ;;  %v135_v62 = vld [vmem:[#allocation5 + $0xb8] sm:$0xff] }
 0x2f1   :  { %v5457_v31 = vadd.f32 %v985_v63, %v254_v56  ;;  %v258_v29 = vmul.f32 1e+30, %v3969_v59  ;;  %v259_v3 = vmul.f32 1e+30, %v3970_v11  ;;  %v3971_v43 = vadd.f32 -1.0, %v132_v33 }
 0x2f2   :  { %v5459_v38 = vadd.f32 %v986_v36, %v255_v1  ;;  %v1117_v54 = vmax.f32 %v5447_v44, %v5449_v32  ;;  %v3972_v41 = vadd.f32 -1.0, %v133_v27  ;;  %v5463_v2 = vadd.f32 %v2467_v49, %v254_v56 }
 0x2f3   :  { %v5465_v15 = vadd.f32 %v2468_v30, %v255_v1  ;;  %v3973_v1 = vadd.f32 -1.0, %v134_v5 }
 0x2f4   :  { %v2334_v42 = vpop.f32.mrb[48].mxu0  ;;  %2597 = vmax.xlane.f32.xlu0 %v2596_v48  ;;  %1118 = vmax.xlane.f32.xlu1 %v1117_v54  ;;  %v852_v8 = vpop.f32.mrb[16].mxu1  ;;  %v2599_v48 = vmax.f32 %v5451_v51, %v5455_v47  ;;  %v1120_v27 = vmax.f32 %v5457_v31, %v5459_v38  ;;  %v3974_v54 = vadd.f32 -1.0, %v135_v62  ;;  %v261_v62 = vmul.f32 1e+30, %v3972_v41 }
 0x2f5   :  { %7408 = vst [vmem:[#allocation47_spill] sm:$0xff] %v5465_v15  ;;  %v2469_v63 = vmul.f32 0.25, %v2334_v42  ;;  %v987_v36 = vmul.f32 0.25, %v852_v8  ;;  %v854_v34 = vpop.f32.mrb[17].mxu1  ;;  %v2336_v0 = vpop.f32.mrb[49].mxu0  ;;  %v2602_v23 = vmax.f32 %v5463_v2, %v5465_v15 }
 0x2f6   :  { %v988_v61 = vmul.f32 0.25, %v854_v34  ;;  %v2470_v25 = vmul.f32 0.25, %v2336_v0  ;;  %v856_v59 = vpop.f32.mrb[18].mxu1  ;;  %v2338_v11 = vpop.f32.mrb[50].mxu0  ;;  %v260_v34 = vmul.f32 1e+30, %v3971_v43 }
 0x2f7   :  { %v5471_v33 = vadd.f32 %v987_v36, %v256_v37  ;;  %v989_v49 = vmul.f32 0.25, %v856_v59  ;;  %v858_v56 = vpop.f32.mrb[19].mxu1  ;;  %v2340_v30 = vpop.f32.mrb[51].mxu0  ;;  %v5475_v0 = vadd.f32 %v2469_v63, %v256_v37  ;;  %v2471_v10 = vmul.f32 0.25, %v2338_v11  ;;  %v136_v36 = vld [vmem:[#allocation5 + $0xc0] sm:$0xff] }
 0x2f8   :  { %v5473_v42 = vadd.f32 %v988_v61, %v257_v14  ;;  %v990_v8 = vmul.f32 0.25, %v858_v56  ;;  %2600 = vmax.xlane.f32.xlu0 %v2599_v48  ;;  %1121 = vmax.xlane.f32.xlu1 %v1120_v27  ;;  %v2472_v9 = vmul.f32 0.25, %v2340_v30  ;;  %v5479_v59 = vadd.f32 %v2470_v25, %v257_v14  ;;  %v138_v56 = vld [vmem:[#allocation5 + $0xd0] sm:$0xff]  ;;  %v139_v30 = vld [vmem:[#allocation5 + $0xd8] sm:$0xff] }
 0x2f9   :  { %7409 = vst [vmem:[#allocation48_spill] sm:$0xff] %v5471_v33  ;;  %7411 = vst [vmem:[#allocation50_spill] sm:$0xff] %v5475_v0  ;;  %v5481_v24 = vadd.f32 %v989_v49, %v258_v29  ;;  %v262_v43 = vmul.f32 1e+30, %v3973_v1  ;;  %v263_v37 = vmul.f32 1e+30, %v3974_v54  ;;  %v5487_v14 = vadd.f32 %v2471_v10, %v258_v29 }
 0x2fa   :  { %7410 = vst [vmem:[#allocation49_spill] sm:$0xff] %v5473_v42  ;;  %7412 = vst [vmem:[#allocation51_spill] sm:$0xff] %v5479_v59  ;;  %v5483_v5 = vadd.f32 %v990_v8, %v259_v3  ;;  %v1123_v61 = vmax.f32 %v5471_v33, %v5473_v42  ;;  %v3975_v48 = vadd.f32 -1.0, %v136_v36  ;;  %v3976_v27 = vadd.f32 -1.0, %v137_v53 }
 0x2fb   :  { %7413 = vst [vmem:[#allocation52_spill] sm:$0xff] %v5481_v24  ;;  %7415 = vst [vmem:[#allocation54_spill] sm:$0xff] %v5487_v14  ;;  %v5489_v25 = vadd.f32 %v2472_v9, %v259_v3  ;;  %v3977_v3 = vadd.f32 -1.0, %v138_v56 }
 0x2fc   :  { %7414 = vst [vmem:[#allocation53_spill] sm:$0xff] %v5483_v5  ;;  %v2344_v63 = vpop.f32.mrb[52].mxu0  ;;  %2603 = vmax.xlane.f32.xlu0 %v2602_v23  ;;  %1124 = vmax.xlane.f32.xlu1 %v1123_v61  ;;  %v862_v11 = vpop.f32.mrb[20].mxu1  ;;  %v2605_v23 = vmax.f32 %v5475_v0, %v5479_v59  ;;  %v1126_v53 = vmax.f32 %v5481_v24, %v5483_v5  ;;  %v3978_v61 = vadd.f32 -1.0, %v139_v30  ;;  %v141_v24 = vld [vmem:[#allocation5 + $0xe8] sm:$0xff] }
 0x2fd   :  { %7416 = vst [vmem:[#allocation55_spill] sm:$0xff] %v5489_v25  ;;  %v2473_v49 = vmul.f32 0.25, %v2344_v63  ;;  %v991_v8 = vmul.f32 0.25, %v862_v11  ;;  %v864_v50 = vpop.f32.mrb[21].mxu1  ;;  %v2346_v15 = vpop.f32.mrb[53].mxu0  ;;  %v2608_v5 = vmax.f32 %v5487_v14, %v5489_v25 }
 0x2fe   :  { %v992_v42 = vmul.f32 0.25, %v864_v50  ;;  %v2474_v41 = vmul.f32 0.25, %v2346_v15  ;;  %v866_v1 = vpop.f32.mrb[22].mxu1  ;;  %v2348_v54 = vpop.f32.mrb[54].mxu0  ;;  %v264_v50 = vmul.f32 1e+30, %v3975_v48 }
 0x2ff   :  { %v5495_v36 = vadd.f32 %v991_v8, %v260_v34  ;;  %v993_v10 = vmul.f32 0.25, %v866_v1  ;;  %v868_v29 = vpop.f32.mrb[23].mxu1  ;;  %v2350_v9 = vpop.f32.mrb[55].mxu0  ;;  %v5499_v15 = vadd.f32 %v2473_v49, %v260_v34  ;;  %v2475_v33 = vmul.f32 0.25, %v2348_v54  ;;  %v140_v8 = vld [vmem:[#allocation5 + $0xe0] sm:$0xff] }
 0x300   :  { %v5497_v63 = vadd.f32 %v992_v42, %v261_v62  ;;  %v994_v11 = vmul.f32 0.25, %v868_v29  ;;  %2606 = vmax.xlane.f32.xlu0 %v2605_v23  ;;  %1127 = vmax.xlane.f32.xlu1 %v1126_v53  ;;  %v2476_v59 = vmul.f32 0.25, %v2350_v9  ;;  %v5503_v1 = vadd.f32 %v2474_v41, %v261_v62  ;;  %v142_v29 = vld [vmem:[#allocation5 + $0xf0] sm:$0xff]  ;;  %v143_v9 = vld [vmem:[#allocation5 + $0xf8] sm:$0xff] }
 0x301   :  { %7417 = vst [vmem:[#allocation56_spill] sm:$0xff] %v5495_v36  ;;  %7419 = vst [vmem:[#allocation58_spill] sm:$0xff] %v5499_v15  ;;  %v5505_v0 = vadd.f32 %v993_v10, %v262_v43  ;;  %v265_v30 = vmul.f32 1e+30, %v3976_v27  ;;  %v266_v48 = vmul.f32 1e+30, %v3977_v3  ;;  %v5511_v62 = vadd.f32 %v2475_v33, %v262_v43 }
 0x302   :  { %7418 = vst [vmem:[#allocation57_spill] sm:$0xff] %v5497_v63  ;;  %7420 = vst [vmem:[#allocation59_spill] sm:$0xff] %v5503_v1  ;;  %v5507_v56 = vadd.f32 %v994_v11, %v263_v37  ;;  %v1129_v42 = vmax.f32 %v5495_v36, %v5497_v63  ;;  %v267_v34 = vmul.f32 1e+30, %v3978_v61  ;;  %v3979_v23 = vadd.f32 -1.0, %v140_v8 }
 0x303   :  { %7421 = vst [vmem:[#allocation60_spill] sm:$0xff] %v5505_v0  ;;  %v3980_v53 = vadd.f32 -1.0, %v141_v24  ;;  %7423 = vst [vmem:[#allocation62_spill] sm:$0xff] %v5511_v62  ;;  %v5513_v41 = vadd.f32 %v2476_v59, %v263_v37  ;;  %v3981_v37 = vadd.f32 -1.0, %v142_v29 }
 0x304   :  { %7422 = vst [vmem:[#allocation61_spill] sm:$0xff] %v5507_v56  ;;  %v2354_v49 = vpop.f32.mrb[56].mxu0  ;;  %2609 = vmax.xlane.f32.xlu0 %v2608_v5  ;;  %1130 = vmax.xlane.f32.xlu1 %v1129_v42  ;;  %v872_v54 = vpop.f32.mrb[24].mxu1  ;;  %v2611_v5 = vmax.f32 %v5499_v15, %v5503_v1  ;;  %v1132_v24 = vmax.f32 %v5505_v0, %v5507_v56  ;;  %v3982_v42 = vadd.f32 -1.0, %v143_v9  ;;  %v145_v0 = vld [vmem:[#allocation5 + $0x108] sm:$0xff] }
 0x305   :  { %7424 = vst [vmem:[#allocation63_spill] sm:$0xff] %v5513_v41  ;;  %v2477_v10 = vmul.f32 0.25, %v2354_v49  ;;  %v995_v11 = vmul.f32 0.25, %v872_v54  ;;  %v874_v25 = vpop.f32.mrb[25].mxu1  ;;  %v2356_v14 = vpop.f32.mrb[57].mxu0  ;;  %v2614_v56 = vmax.f32 %v5511_v62, %v5513_v41 }
 0x306   :  { %v996_v63 = vmul.f32 0.25, %v874_v25  ;;  %v2478_v27 = vmul.f32 0.25, %v2356_v14  ;;  %v876_v3 = vpop.f32.mrb[26].mxu1  ;;  %v2358_v61 = vpop.f32.mrb[58].mxu0  ;;  %v268_v14 = vmul.f32 1e+30, %v3979_v23 }
 0x307   :  { %v5519_v8 = vadd.f32 %v995_v11, %v264_v50  ;;  %v997_v33 = vmul.f32 0.25, %v876_v3  ;;  %v878_v43 = vpop.f32.mrb[27].mxu1  ;;  %v2360_v59 = vpop.f32.mrb[59].mxu0  ;;  %v5523_v25 = vadd.f32 %v2477_v10, %v264_v50  ;;  %v2479_v36 = vmul.f32 0.25, %v2358_v61  ;;  %v144_v11 = vld [vmem:[#allocation5 + $0x100] sm:$0xff] }
 0x308   :  { %v5521_v49 = vadd.f32 %v996_v63, %v265_v30  ;;  %v998_v54 = vmul.f32 0.25, %v878_v43  ;;  %2612 = vmax.xlane.f32.xlu0 %v2611_v5  ;;  %1133 = vmax.xlane.f32.xlu1 %v1132_v24  ;;  %v2480_v1 = vmul.f32 0.25, %v2360_v59  ;;  %v5527_v3 = vadd.f32 %v2478_v27, %v265_v30  ;;  %v146_v43 = vld [vmem:[#allocation5 + $0x110] sm:$0xff]  ;;  %v147_v59 = vld [vmem:[#allocation5 + $0x118] sm:$0xff] }
 0x309   :  { %7425 = vst [vmem:[#allocation64_spill] sm:$0xff] %v5519_v8  ;;  %7427 = vst [vmem:[#allocation66_spill] sm:$0xff] %v5523_v25  ;;  %v5529_v15 = vadd.f32 %v997_v33, %v266_v48  ;;  %v269_v9 = vmul.f32 1e+30, %v3980_v53  ;;  %v270_v23 = vmul.f32 1e+30, %v3981_v37  ;;  %v5535_v30 = vadd.f32 %v2479_v36, %v266_v48 }
 0x30a   :  { %7426 = vst [vmem:[#allocation65_spill] sm:$0xff] %v5521_v49  ;;  %7428 = vst [vmem:[#allocation67_spill] sm:$0xff] %v5527_v3  ;;  %v5531_v29 = vadd.f32 %v998_v54, %v267_v34  ;;  %v1135_v63 = vmax.f32 %v5519_v8, %v5521_v49  ;;  %v271_v50 = vmul.f32 1e+30, %v3982_v42  ;;  %v3983_v5 = vadd.f32 -1.0, %v144_v11 }
 0x30b   :  { %7429 = vst [vmem:[#allocation68_spill] sm:$0xff] %v5529_v15  ;;  %v3984_v24 = vadd.f32 -1.0, %v145_v0  ;;  %7431 = vst [vmem:[#allocation70_spill] sm:$0xff] %v5535_v30  ;;  %v5537_v27 = vadd.f32 %v2480_v1, %v267_v34  ;;  %v3985_v34 = vadd.f32 -1.0, %v146_v43 }
 0x30c   :  { %7430 = vst [vmem:[#allocation69_spill] sm:$0xff] %v5531_v29  ;;  %v2364_v10 = vpop.f32.mrb[60].mxu0  ;;  %2615 = vmax.xlane.f32.xlu0 %v2614_v56  ;;  %1136 = vmax.xlane.f32.xlu1 %v1135_v63  ;;  %v882_v61 = vpop.f32.mrb[28].mxu1  ;;  %v2617_v56 = vmax.f32 %v5523_v25, %v5527_v3  ;;  %v1138_v0 = vmax.f32 %v5529_v15, %v5531_v29  ;;  %v3986_v63 = vadd.f32 -1.0, %v147_v59  ;;  %v149_v15 = vld [vmem:[#allocation5 + $0x128] sm:$0xff] }
 0x30d   :  { %7432 = vst [vmem:[#allocation71_spill] sm:$0xff] %v5537_v27  ;;  %v2481_v33 = vmul.f32 0.25, %v2364_v10  ;;  %v999_v54 = vmul.f32 0.25, %v882_v61  ;;  %v884_v41 = vpop.f32.mrb[29].mxu1  ;;  %v2366_v62 = vpop.f32.mrb[61].mxu0  ;;  %v2620_v29 = vmax.f32 %v5535_v30, %v5537_v27 }
 0x30e   :  { %v1000_v49 = vmul.f32 0.25, %v884_v41  ;;  %v2482_v53 = vmul.f32 0.25, %v2366_v62  ;;  %v886_v37 = vpop.f32.mrb[30].mxu1  ;;  %v2368_v42 = vpop.f32.mrb[62].mxu0  ;;  %v272_v62 = vmul.f32 1e+30, %v3983_v5 }
 0x30f   :  { %v5543_v11 = vadd.f32 %v999_v54, %v268_v14  ;;  %v1001_v36 = vmul.f32 0.25, %v886_v37  ;;  %v888_v48 = vpop.f32.mrb[31].mxu1  ;;  %v2370_v1 = vpop.f32.mrb[63].mxu0  ;;  %v5547_v41 = vadd.f32 %v2481_v33, %v268_v14  ;;  %v2483_v8 = vmul.f32 0.25, %v2368_v42  ;;  %v148_v54 = vld [vmem:[#allocation5 + $0x120] sm:$0xff] }
 0x310   :  { %v5545_v10 = vadd.f32 %v1000_v49, %v269_v9  ;;  %v1002_v61 = vmul.f32 0.25, %v888_v48  ;;  %2618 = vmax.xlane.f32.xlu0 %v2617_v56  ;;  %1139 = vmax.xlane.f32.xlu1 %v1138_v0  ;;  %v2484_v3 = vmul.f32 0.25, %v2370_v1  ;;  %v5551_v37 = vadd.f32 %v2482_v53, %v269_v9  ;;  %v150_v48 = vld [vmem:[#allocation5 + $0x130] sm:$0xff]  ;;  %v151_v1 = vld [vmem:[#allocation5 + $0x138] sm:$0xff] }
 0x311   :  { %7433 = vst [vmem:[#allocation72_spill] sm:$0xff] %v5543_v11  ;;  %7435 = vst [vmem:[#allocation74_spill] sm:$0xff] %v5547_v41  ;;  %v5553_v25 = vadd.f32 %v1001_v36, %v270_v23  ;;  %v273_v59 = vmul.f32 1e+30, %v3984_v24  ;;  %v274_v5 = vmul.f32 1e+30, %v3985_v34  ;;  %v5559_v9 = vadd.f32 %v2483_v8, %v270_v23 }
 0x312   :  { %7434 = vst [vmem:[#allocation73_spill] sm:$0xff] %v5545_v10  ;;  %7436 = vst [vmem:[#allocation75_spill] sm:$0xff] %v5551_v37  ;;  %v5555_v43 = vadd.f32 %v1002_v61, %v271_v50  ;;  %v1141_v49 = vmax.f32 %v5543_v11, %v5545_v10  ;;  %v275_v14 = vmul.f32 1e+30, %v3986_v63  ;;  %v3987_v56 = vadd.f32 -1.0, %v148_v54 }
 0x313   :  { %7437 = vst [vmem:[#allocation76_spill] sm:$0xff] %v5553_v25  ;;  %v3988_v0 = vadd.f32 -1.0, %v149_v15  ;;  %7439 = vst [vmem:[#allocation78_spill] sm:$0xff] %v5559_v9  ;;  %v5561_v53 = vadd.f32 %v2484_v3, %v271_v50  ;;  %v3989_v50 = vadd.f32 -1.0, %v150_v48 }
 0x314   :  { %7438 = vst [vmem:[#allocation77_spill] sm:$0xff] %v5555_v43  ;;  %v2374_v33 = vpop.f32.mrb[64].mxu0  ;;  %2621 = vmax.xlane.f32.xlu0 %v2620_v29  ;;  %1142 = vmax.xlane.f32.xlu1 %v1141_v49  ;;  %v892_v42 = vpop.f32.mrb[32].mxu1  ;;  %v2623_v29 = vmax.f32 %v5547_v41, %v5551_v37  ;;  %v1144_v15 = vmax.f32 %v5553_v25, %v5555_v43  ;;  %v3990_v49 = vadd.f32 -1.0, %v151_v1  ;;  %v153_v25 = vld [vmem:[#allocation5 + $0x148] sm:$0xff] }
 0x315   :  { %7440 = vst [vmem:[#allocation79_spill] sm:$0xff] %v5561_v53  ;;  %v2485_v36 = vmul.f32 0.25, %v2374_v33  ;;  %v1003_v61 = vmul.f32 0.25, %v892_v42  ;;  %v894_v27 = vpop.f32.mrb[33].mxu1  ;;  %v2376_v30 = vpop.f32.mrb[65].mxu0  ;;  %v2626_v43 = vmax.f32 %v5559_v9, %v5561_v53 }
 0x316   :  { %v1004_v10 = vmul.f32 0.25, %v894_v27  ;;  %v2486_v24 = vmul.f32 0.25, %v2376_v30  ;;  %v896_v34 = vpop.f32.mrb[34].mxu1  ;;  %v2378_v63 = vpop.f32.mrb[66].mxu0  ;;  %v276_v30 = vmul.f32 1e+30, %v3987_v56 }
 0x317   :  { %v5567_v54 = vadd.f32 %v1003_v61, %v272_v62  ;;  %v1005_v8 = vmul.f32 0.25, %v896_v34  ;;  %v898_v23 = vpop.f32.mrb[35].mxu1  ;;  %v2380_v3 = vpop.f32.mrb[67].mxu0  ;;  %v5571_v27 = vadd.f32 %v2485_v36, %v272_v62  ;;  %v2487_v11 = vmul.f32 0.25, %v2378_v63  ;;  %v152_v61 = vld [vmem:[#allocation5 + $0x140] sm:$0xff] }
 0x318   :  { %v5569_v33 = vadd.f32 %v1004_v10, %v273_v59  ;;  %v1006_v42 = vmul.f32 0.25, %v898_v23  ;;  %2624 = vmax.xlane.f32.xlu0 %v2623_v29  ;;  %1145 = vmax.xlane.f32.xlu1 %v1144_v15  ;;  %v2488_v37 = vmul.f32 0.25, %v2380_v3  ;;  %v5575_v34 = vadd.f32 %v2486_v24, %v273_v59  ;;  %v154_v23 = vld [vmem:[#allocation5 + $0x150] sm:$0xff]  ;;  %v155_v3 = vld [vmem:[#allocation5 + $0x158] sm:$0xff] }
 0x319   :  { %7441 = vst [vmem:[#allocation80_spill] sm:$0xff] %v5567_v54  ;;  %7443 = vst [vmem:[#allocation82_spill] sm:$0xff] %v5571_v27  ;;  %v5577_v41 = vadd.f32 %v1005_v8, %v274_v5  ;;  %v277_v1 = vmul.f32 1e+30, %v3988_v0  ;;  %v278_v56 = vmul.f32 1e+30, %v3989_v50  ;;  %v5583_v59 = vadd.f32 %v2487_v11, %v274_v5 }
 0x31a   :  { %7442 = vst [vmem:[#allocation81_spill] sm:$0xff] %v5569_v33  ;;  %7444 = vst [vmem:[#allocation83_spill] sm:$0xff] %v5575_v34  ;;  %v5579_v48 = vadd.f32 %v1006_v42, %v275_v14  ;;  %v1147_v10 = vmax.f32 %v5567_v54, %v5569_v33  ;;  %v279_v62 = vmul.f32 1e+30, %v3990_v49  ;;  %v3991_v29 = vadd.f32 -1.0, %v152_v61 }
 0x31b   :  { %7445 = vst [vmem:[#allocation84_spill] sm:$0xff] %v5577_v41  ;;  %v3992_v15 = vadd.f32 -1.0, %v153_v25  ;;  %7447 = vst [vmem:[#allocation86_spill] sm:$0xff] %v5583_v59  ;;  %v5585_v24 = vadd.f32 %v2488_v37, %v275_v14  ;;  %v3993_v14 = vadd.f32 -1.0, %v154_v23 }
 0x31c   :  { %7446 = vst [vmem:[#allocation85_spill] sm:$0xff] %v5579_v48  ;;  %v2384_v36 = vpop.f32.mrb[68].mxu0  ;;  %2627 = vmax.xlane.f32.xlu0 %v2626_v43  ;;  %1148 = vmax.xlane.f32.xlu1 %v1147_v10  ;;  %v902_v63 = vpop.f32.mrb[36].mxu1  ;;  %v2629_v43 = vmax.f32 %v5571_v27, %v5575_v34  ;;  %v1150_v25 = vmax.f32 %v5577_v41, %v5579_v48  ;;  %v3994_v10 = vadd.f32 -1.0, %v155_v3  ;;  %v157_v41 = vld [vmem:[#allocation5 + $0x168] sm:$0xff] }
 0x31d   :  { %7448 = vst [vmem:[#allocation87_spill] sm:$0xff] %v5585_v24  ;;  %v2489_v8 = vmul.f32 0.25, %v2384_v36  ;;  %v1007_v42 = vmul.f32 0.25, %v902_v63  ;;  %v904_v53 = vpop.f32.mrb[37].mxu1  ;;  %v2386_v9 = vpop.f32.mrb[69].mxu0  ;;  %v2632_v48 = vmax.f32 %v5583_v59, %v5585_v24 }
 0x31e   :  { %v1008_v33 = vmul.f32 0.25, %v904_v53  ;;  %v2490_v0 = vmul.f32 0.25, %v2386_v9  ;;  %v906_v50 = vpop.f32.mrb[38].mxu1  ;;  %v2388_v49 = vpop.f32.mrb[70].mxu0  ;;  %v280_v9 = vmul.f32 1e+30, %v3991_v29 }
 0x31f   :  { %v5591_v61 = vadd.f32 %v1007_v42, %v276_v30  ;;  %v1009_v11 = vmul.f32 0.25, %v906_v50  ;;  %v908_v5 = vpop.f32.mrb[39].mxu1  ;;  %v2390_v37 = vpop.f32.mrb[71].mxu0  ;;  %v5595_v53 = vadd.f32 %v2489_v8, %v276_v30  ;;  %v2491_v54 = vmul.f32 0.25, %v2388_v49  ;;  %v156_v42 = vld [vmem:[#allocation5 + $0x160] sm:$0xff] }
 0x320   :  { %v5593_v36 = vadd.f32 %v1008_v33, %v277_v1  ;;  %v1010_v63 = vmul.f32 0.25, %v908_v5  ;;  %2630 = vmax.xlane.f32.xlu0 %v2629_v43  ;;  %1151 = vmax.xlane.f32.xlu1 %v1150_v25  ;;  %v2492_v34 = vmul.f32 0.25, %v2390_v37  ;;  %v5599_v50 = vadd.f32 %v2490_v0, %v277_v1  ;;  %v158_v5 = vld [vmem:[#allocation5 + $0x170] sm:$0xff]  ;;  %v159_v37 = vld [vmem:[#allocation5 + $0x178] sm:$0xff] }
 0x321   :  { %7449 = vst [vmem:[#allocation88_spill] sm:$0xff] %v5591_v61  ;;  %7451 = vst [vmem:[#allocation90_spill] sm:$0xff] %v5595_v53  ;;  %v5601_v27 = vadd.f32 %v1009_v11, %v278_v56  ;;  %v281_v3 = vmul.f32 1e+30, %v3992_v15  ;;  %v282_v29 = vmul.f32 1e+30, %v3993_v14  ;;  %v5607_v1 = vadd.f32 %v2491_v54, %v278_v56 }
 0x322   :  { %7450 = vst [vmem:[#allocation89_spill] sm:$0xff] %v5593_v36  ;;  %7452 = vst [vmem:[#allocation91_spill] sm:$0xff] %v5599_v50  ;;  %v5603_v23 = vadd.f32 %v1010_v63, %v279_v62  ;;  %v1153_v33 = vmax.f32 %v5591_v61, %v5593_v36  ;;  %v283_v30 = vmul.f32 1e+30, %v3994_v10  ;;  %v3995_v43 = vadd.f32 -1.0, %v156_v42 }
 0x323   :  { %7453 = vst [vmem:[#allocation92_spill] sm:$0xff] %v5601_v27  ;;  %v3996_v25 = vadd.f32 -1.0, %v157_v41  ;;  %7455 = vst [vmem:[#allocation94_spill] sm:$0xff] %v5607_v1  ;;  %v5609_v0 = vadd.f32 %v2492_v34, %v279_v62  ;;  %v3997_v62 = vadd.f32 -1.0, %v158_v5 }
 0x324   :  { %7454 = vst [vmem:[#allocation93_spill] sm:$0xff] %v5603_v23  ;;  %v2394_v8 = vpop.f32.mrb[72].mxu0  ;;  %2633 = vmax.xlane.f32.xlu0 %v2632_v48  ;;  %1154 = vmax.xlane.f32.xlu1 %v1153_v33  ;;  %v912_v49 = vpop.f32.mrb[40].mxu1  ;;  %v2635_v48 = vmax.f32 %v5595_v53, %v5599_v50  ;;  %v1156_v41 = vmax.f32 %v5601_v27, %v5603_v23  ;;  %v3998_v33 = vadd.f32 -1.0, %v159_v37  ;;  %v161_v27 = vld [vmem:[#allocation5 + $0x188] sm:$0xff] }
 0x325   :  { %7456 = vst [vmem:[#allocation95_spill] sm:$0xff] %v5609_v0  ;;  %v2493_v11 = vmul.f32 0.25, %v2394_v8  ;;  %v1011_v63 = vmul.f32 0.25, %v912_v49  ;;  %v914_v24 = vpop.f32.mrb[41].mxu1  ;;  %v2396_v59 = vpop.f32.mrb[73].mxu0  ;;  %v2638_v23 = vmax.f32 %v5607_v1, %v5609_v0 }
 0x326   :  { %v1012_v36 = vmul.f32 0.25, %v914_v24  ;;  %v2494_v15 = vmul.f32 0.25, %v2396_v59  ;;  %v916_v14 = vpop.f32.mrb[42].mxu1  ;;  %v2398_v10 = vpop.f32.mrb[74].mxu0  ;;  %v284_v59 = vmul.f32 1e+30, %v3995_v43 }
 0x327   :  { %v5615_v42 = vadd.f32 %v1011_v63, %v280_v9  ;;  %v1013_v54 = vmul.f32 0.25, %v916_v14  ;;  %v918_v56 = vpop.f32.mrb[43].mxu1  ;;  %v2400_v34 = vpop.f32.mrb[75].mxu0  ;;  %v5619_v24 = vadd.f32 %v2493_v11, %v280_v9  ;;  %v2495_v61 = vmul.f32 0.25, %v2398_v10  ;;  %v160_v63 = vld [vmem:[#allocation5 + $0x180] sm:$0xff] }
 0x328   :  { %v5617_v8 = vadd.f32 %v1012_v36, %v281_v3  ;;  %v1014_v49 = vmul.f32 0.25, %v918_v56  ;;  %2636 = vmax.xlane.f32.xlu0 %v2635_v48  ;;  %1157 = vmax.xlane.f32.xlu1 %v1156_v41  ;;  %v2496_v50 = vmul.f32 0.25, %v2400_v34  ;;  %v5623_v14 = vadd.f32 %v2494_v15, %v281_v3  ;;  %v162_v56 = vld [vmem:[#allocation5 + $0x190] sm:$0xff]  ;;  %v163_v34 = vld [vmem:[#allocation5 + $0x198] sm:$0xff] }
 0x329   :  { %7457 = vst [vmem:[#allocation96_spill] sm:$0xff] %v5615_v42  ;;  %7459 = vst [vmem:[#allocation98_spill] sm:$0xff] %v5619_v24  ;;  %v5625_v53 = vadd.f32 %v1013_v54, %v282_v29  ;;  %v285_v37 = vmul.f32 1e+30, %v3996_v25  ;;  %v286_v43 = vmul.f32 1e+30, %v3997_v62  ;;  %v5631_v3 = vadd.f32 %v2495_v61, %v282_v29 }
 0x32a   :  { %7458 = vst [vmem:[#allocation97_spill] sm:$0xff] %v5617_v8  ;;  %7460 = vst [vmem:[#allocation99_spill] sm:$0xff] %v5623_v14  ;;  %v5627_v5 = vadd.f32 %v1014_v49, %v283_v30  ;;  %v1159_v36 = vmax.f32 %v5615_v42, %v5617_v8  ;;  %v287_v9 = vmul.f32 1e+30, %v3998_v33  ;;  %v3999_v48 = vadd.f32 -1.0, %v160_v63 }
 0x32b   :  { %7461 = vst [vmem:[#allocation100_spill] sm:$0xff] %v5625_v53  ;;  %v4000_v41 = vadd.f32 -1.0, %v161_v27  ;;  %7463 = vst [vmem:[#allocation102_spill] sm:$0xff] %v5631_v3  ;;  %v5633_v15 = vadd.f32 %v2496_v50, %v283_v30  ;;  %v4001_v30 = vadd.f32 -1.0, %v162_v56 }
 0x32c   :  { %7462 = vst [vmem:[#allocation101_spill] sm:$0xff] %v5627_v5  ;;  %v2404_v11 = vpop.f32.mrb[76].mxu0  ;;  %2639 = vmax.xlane.f32.xlu0 %v2638_v23  ;;  %1160 = vmax.xlane.f32.xlu1 %v1159_v36  ;;  %v922_v10 = vpop.f32.mrb[44].mxu1  ;;  %v2641_v23 = vmax.f32 %v5619_v24, %v5623_v14  ;;  %v1162_v27 = vmax.f32 %v5625_v53, %v5627_v5  ;;  %v4002_v36 = vadd.f32 -1.0, %v163_v34  ;;  %v165_v53 = vld [vmem:[#allocation5 + $0x1a8] sm:$0xff] }
 0x32d   :  { %7464 = vst [vmem:[#allocation103_spill] sm:$0xff] %v5633_v15  ;;  %v2497_v54 = vmul.f32 0.25, %v2404_v11  ;;  %v1015_v49 = vmul.f32 0.25, %v922_v10  ;;  %v924_v0 = vpop.f32.mrb[45].mxu1  ;;  %v2406_v1 = vpop.f32.mrb[77].mxu0  ;;  %v2644_v5 = vmax.f32 %v5631_v3, %v5633_v15 }
 0x32e   :  { %v1016_v8 = vmul.f32 0.25, %v924_v0  ;;  %v2498_v25 = vmul.f32 0.25, %v2406_v1  ;;  %v926_v62 = vpop.f32.mrb[46].mxu1  ;;  %v2408_v33 = vpop.f32.mrb[78].mxu0  ;;  %v288_v1 = vmul.f32 1e+30, %v3999_v48 }
 0x32f   :  { %v5639_v63 = vadd.f32 %v1015_v49, %v284_v59  ;;  %v1017_v61 = vmul.f32 0.25, %v926_v62  ;;  %v928_v29 = vpop.f32.mrb[47].mxu1  ;;  %v2410_v50 = vpop.f32.mrb[79].mxu0  ;;  %v5643_v0 = vadd.f32 %v2497_v54, %v284_v59  ;;  %v2499_v42 = vmul.f32 0.25, %v2408_v33  ;;  %v164_v49 = vld [vmem:[#allocation5 + $0x1a0] sm:$0xff] }
 0x330   :  { %v5641_v11 = vadd.f32 %v1016_v8, %v285_v37  ;;  %v1018_v10 = vmul.f32 0.25, %v928_v29  ;;  %2642 = vmax.xlane.f32.xlu0 %v2641_v23  ;;  %1163 = vmax.xlane.f32.xlu1 %v1162_v27  ;;  %v2500_v14 = vmul.f32 0.25, %v2410_v50  ;;  %v5647_v62 = vadd.f32 %v2498_v25, %v285_v37  ;;  %v166_v29 = vld [vmem:[#allocation5 + $0x1b0] sm:$0xff]  ;;  %v167_v50 = vld [vmem:[#allocation5 + $0x1b8] sm:$0xff] }
 0x331   :  { %7465 = vst [vmem:[#allocation104_spill] sm:$0xff] %v5639_v63  ;;  %7467 = vst [vmem:[#allocation106_spill] sm:$0xff] %v5643_v0  ;;  %v5649_v24 = vadd.f32 %v1017_v61, %v286_v43  ;;  %v289_v34 = vmul.f32 1e+30, %v4000_v41  ;;  %v290_v48 = vmul.f32 1e+30, %v4001_v30  ;;  %v5655_v37 = vadd.f32 %v2499_v42, %v286_v43 }
 0x332   :  { %7466 = vst [vmem:[#allocation105_spill] sm:$0xff] %v5641_v11  ;;  %7468 = vst [vmem:[#allocation107_spill] sm:$0xff] %v5647_v62  ;;  %v5651_v56 = vadd.f32 %v1018_v10, %v287_v9  ;;  %v1165_v8 = vmax.f32 %v5639_v63, %v5641_v11  ;;  %v291_v59 = vmul.f32 1e+30, %v4002_v36  ;;  %v4003_v23 = vadd.f32 -1.0, %v164_v49 }
 0x333   :  { %7469 = vst [vmem:[#allocation108_spill] sm:$0xff] %v5649_v24  ;;  %v4004_v27 = vadd.f32 -1.0, %v165_v53  ;;  %7471 = vst [vmem:[#allocation110_spill] sm:$0xff] %v5655_v37  ;;  %v5657_v25 = vadd.f32 %v2500_v14, %v287_v9  ;;  %v4005_v9 = vadd.f32 -1.0, %v166_v29 }
 0x334   :  { %7470 = vst [vmem:[#allocation109_spill] sm:$0xff] %v5651_v56  ;;  %v2414_v54 = vpop.f32.mrb[80].mxu0  ;;  %2645 = vmax.xlane.f32.xlu0 %v2644_v5  ;;  %1166 = vmax.xlane.f32.xlu1 %v1165_v8  ;;  %v932_v33 = vpop.f32.mrb[48].mxu1  ;;  %v2647_v5 = vmax.f32 %v5643_v0, %v5647_v62  ;;  %v1168_v53 = vmax.f32 %v5649_v24, %v5651_v56  ;;  %v4006_v8 = vadd.f32 -1.0, %v167_v50 }
 0x335   :  { %7472 = vst [vmem:[#allocation111_spill] sm:$0xff] %v5657_v25  ;;  %v2501_v61 = vmul.f32 0.25, %v2414_v54  ;;  %v1019_v10 = vmul.f32 0.25, %v932_v33  ;;  %v934_v15 = vpop.f32.mrb[49].mxu1  ;;  %v2416_v3 = vpop.f32.mrb[81].mxu0  ;;  %v2650_v56 = vmax.f32 %v5655_v37, %v5657_v25  ;;  %v171_v37 = vld [vmem:[#allocation5 + $0x1d8] sm:$0xff] }
 0x336   :  { %v1020_v11 = vmul.f32 0.25, %v934_v15  ;;  %v2502_v41 = vmul.f32 0.25, %v2416_v3  ;;  %v936_v30 = vpop.f32.mrb[50].mxu1  ;;  %v2418_v36 = vpop.f32.mrb[82].mxu0  ;;  %v292_v3 = vmul.f32 1e+30, %v4003_v23 }
 0x337   :  { %v5663_v49 = vadd.f32 %v1019_v10, %v288_v1  ;;  %v1021_v42 = vmul.f32 0.25, %v936_v30  ;;  %v938_v43 = vpop.f32.mrb[51].mxu1  ;;  %v2420_v14 = vpop.f32.mrb[83].mxu0  ;;  %v5667_v15 = vadd.f32 %v2501_v61, %v288_v1  ;;  %v2503_v63 = vmul.f32 0.25, %v2418_v36  ;;  %v168_v10 = vld [vmem:[#allocation5 + $0x1c0] sm:$0xff] }
 0x338   :  { %v5665_v54 = vadd.f32 %v1020_v11, %v289_v34  ;;  %v1022_v33 = vmul.f32 0.25, %v938_v43  ;;  %2648 = vmax.xlane.f32.xlu0 %v2647_v5  ;;  %1169 = vmax.xlane.f32.xlu1 %v1168_v53  ;;  %v2504_v62 = vmul.f32 0.25, %v2420_v14  ;;  %v5671_v24 = vadd.f32 %v2502_v41, %v289_v34  ;;  %v169_v53 = vld [vmem:[#allocation5 + $0x1c8] sm:$0xff]  ;;  %v170_v43 = vld [vmem:[#allocation5 + $0x1d0] sm:$0xff] }
 0x339   :  { %7473 = vst [vmem:[#allocation112_spill] sm:$0xff] %v5663_v49  ;;  %7475 = vst [vmem:[#allocation114_spill] sm:$0xff] %v5667_v15  ;;  %v5673_v30 = vadd.f32 %v1021_v42, %v290_v48  ;;  %v293_v50 = vmul.f32 1e+30, %v4004_v27  ;;  %v294_v5 = vmul.f32 1e+30, %v4005_v9  ;;  %v5679_v14 = vadd.f32 %v2503_v63, %v290_v48 }
 0x33a   :  { %7474 = vst [vmem:[#allocation113_spill] sm:$0xff] %v5665_v54  ;;  %7476 = vst [vmem:[#allocation115_spill] sm:$0xff] %v5671_v24  ;;  %v5675_v29 = vadd.f32 %v1022_v33, %v291_v59  ;;  %v1171_v11 = vmax.f32 %v5663_v49, %v5665_v54  ;;  %v295_v23 = vmul.f32 1e+30, %v4006_v8  ;;  %v4007_v36 = vadd.f32 -1.0, %v168_v10 }
 0x33b   :  { %7477 = vst [vmem:[#allocation116_spill] sm:$0xff] %v5673_v30  ;;  %7479 = vst [vmem:[#allocation118_spill] sm:$0xff] %v5679_v14  ;;  %v5681_v34 = vadd.f32 %v2504_v62, %v291_v59  ;;  %v4008_v59 = vadd.f32 -1.0, %v169_v53 }
 0x33c   :  { %7478 = vst [vmem:[#allocation117_spill] sm:$0xff] %v5675_v29  ;;  %v2424_v1 = vpop.f32.mrb[84].mxu0  ;;  %2651 = vmax.xlane.f32.xlu0 %v2650_v56  ;;  %1172 = vmax.xlane.f32.xlu1 %v1171_v11  ;;  %v942_v61 = vpop.f32.mrb[52].mxu1  ;;  %v2653_v56 = vmax.f32 %v5667_v15, %v5671_v24  ;;  %v1174_v10 = vmax.f32 %v5673_v30, %v5675_v29  ;;  %v296_v53 = vmul.f32 1e+30, %v4007_v36 }
 0x33d   :  { %7480 = vst [vmem:[#allocation119_spill] sm:$0xff] %v5681_v34  ;;  %v2505_v41 = vmul.f32 0.25, %v2424_v1  ;;  %v1023_v42 = vmul.f32 0.25, %v942_v61  ;;  %v944_v33 = vpop.f32.mrb[53].mxu1  ;;  %v2426_v25 = vpop.f32.mrb[85].mxu0  ;;  %v4009_v1 = vadd.f32 -1.0, %v170_v43  ;;  %v2656_v29 = vmax.f32 %v5679_v14, %v5681_v34 }
 0x33e   :  { %v1024_v54 = vmul.f32 0.25, %v944_v33  ;;  %v2506_v27 = vmul.f32 0.25, %v2426_v25  ;;  %v946_v9 = vpop.f32.mrb[54].mxu1  ;;  %v2428_v8 = vpop.f32.mrb[86].mxu0  ;;  %v4010_v25 = vadd.f32 -1.0, %v171_v37  ;;  %v174_v34 = vld [vmem:[#allocation5 + $0x1f0] sm:$0xff] }
 0x33f   :  { %v5687_v11 = vadd.f32 %v1023_v42, %v292_v3  ;;  %v1025_v63 = vmul.f32 0.25, %v946_v9  ;;  %v948_v62 = vpop.f32.mrb[55].mxu1  ;;  %v2430_v48 = vpop.f32.mrb[87].mxu0  ;;  %v5691_v33 = vadd.f32 %v2505_v41, %v292_v3  ;;  %v2507_v0 = vmul.f32 0.25, %v2428_v8  ;;  %v172_v8 = vld [vmem:[#allocation5 + $0x1e0] sm:$0xff] }
 0x340   :  { %v5689_v61 = vadd.f32 %v1024_v54, %v293_v50  ;;  %v1026_v49 = vmul.f32 0.25, %v948_v62  ;;  %2654 = vmax.xlane.f32.xlu0 %v2653_v56  ;;  %1175 = vmax.xlane.f32.xlu1 %v1174_v10  ;;  %v2508_v24 = vmul.f32 0.25, %v2430_v48  ;;  %v5695_v42 = vadd.f32 %v2506_v27, %v293_v50  ;;  %v173_v10 = vld [vmem:[#allocation5 + $0x1e8] sm:$0xff] }
 0x341   :  { %7481 = vst [vmem:[#allocation120_spill] sm:$0xff] %v5687_v11  ;;  %7483 = vst [vmem:[#allocation122_spill] sm:$0xff] %v5691_v33  ;;  %v5697_v9 = vadd.f32 %v1025_v63, %v294_v5  ;;  %v297_v43 = vmul.f32 1e+30, %v4008_v59  ;;  %v298_v56 = vmul.f32 1e+30, %v4009_v1  ;;  %v5703_v62 = vadd.f32 %v2507_v0, %v294_v5 }
 0x342   :  { %7482 = vst [vmem:[#allocation121_spill] sm:$0xff] %v5689_v61  ;;  %7484 = vst [vmem:[#allocation123_spill] sm:$0xff] %v5695_v42  ;;  %v5699_v30 = vadd.f32 %v1026_v49, %v295_v23  ;;  %v1177_v54 = vmax.f32 %v5687_v11, %v5689_v61  ;;  %v299_v41 = vmul.f32 1e+30, %v4010_v25  ;;  %v5705_v50 = vadd.f32 %v2508_v24, %v295_v23  ;;  %v175_v61 = vld [vmem:[#allocation5 + $0x1f8] sm:$0xff] }
 0x344   :  { %7485 = vst [vmem:[#allocation124_spill] sm:$0xff] %v5699_v30  ;;  %v2434_v37 = vpop.f32.mrb[88].mxu0  ;;  %2657 = vmax.xlane.f32.xlu0 %v2656_v29  ;;  %1178 = vmax.xlane.f32.xlu1 %v1177_v54  ;;  %v952_v3 = vpop.f32.mrb[56].mxu1  ;;  %7486 = vst [vmem:[#allocation125_spill] sm:$0xff] %v5705_v50  ;;  %v2659_v29 = vmax.f32 %v5691_v33, %v5695_v42  ;;  %v1180_v25 = vmax.f32 %v5697_v9, %v5699_v30  ;;  %v4011_v54 = vadd.f32 -1.0, %v172_v8 }
 0x345   :  { %v2509_v27 = vmul.f32 0.25, %v2434_v37  ;;  %v1027_v49 = vmul.f32 0.25, %v952_v3  ;;  %v954_v63 = vpop.f32.mrb[57].mxu1  ;;  %v2436_v48 = vpop.f32.mrb[89].mxu0  ;;  %v4012_v37 = vadd.f32 -1.0, %v173_v10 }
 0x346   :  { %v1028_v36 = vmul.f32 0.25, %v954_v63  ;;  %v2510_v59 = vmul.f32 0.25, %v2436_v48  ;;  %v956_v1 = vpop.f32.mrb[58].mxu1  ;;  %v2438_v11 = vpop.f32.mrb[90].mxu0  ;;  %v4013_v63 = vadd.f32 -1.0, %v174_v34  ;;  %v4014_v48 = vadd.f32 -1.0, %v175_v61 }
 0x347   :  { %v5711_v0 = vadd.f32 %v1027_v49, %v296_v53  ;;  %v1029_v24 = vmul.f32 0.25, %v956_v1  ;;  %v958_v5 = vpop.f32.mrb[59].mxu1  ;;  %v2440_v23 = vpop.f32.mrb[91].mxu0  ;;  %v5715_v15 = vadd.f32 %v2509_v27, %v296_v53  ;;  %v2511_v42 = vmul.f32 0.25, %v2438_v11 }
 0x348   :  { %v5713_v3 = vadd.f32 %v1028_v36, %v297_v43  ;;  %v1030_v14 = vmul.f32 0.25, %v958_v5  ;;  %2660 = vmax.xlane.f32.xlu0 %v2659_v29  ;;  %1181 = vmax.xlane.f32.xlu1 %v1180_v25  ;;  %v2512_v33 = vmul.f32 0.25, %v2440_v23  ;;  %v2662_v49 = vmax.f32 %v5703_v62, %v5705_v50 }
 0x349   :  { %v5719_v30 = vadd.f32 %v2510_v59, %v297_v43  ;;  %v5721_v1 = vadd.f32 %v1029_v24, %v298_v56  ;;  %v300_v36 = vmul.f32 1e+30, %v4011_v54  ;;  %v301_v29 = vmul.f32 1e+30, %v4012_v37 }
 0x34a   :  { %7487 = vst [vmem:[#allocation126_spill] sm:$0xff] %v5713_v3  ;;  %v5723_v8 = vadd.f32 %v1030_v14, %v299_v41  ;;  %v1183_v10 = vmax.f32 %v5711_v0, %v5713_v3  ;;  %v302_v11 = vmul.f32 1e+30, %v4013_v63  ;;  %v303_v53 = vmul.f32 1e+30, %v4014_v48 }
 0x34b   :  { %v5727_v27 = vadd.f32 %v2511_v42, %v298_v56  ;;  %v5729_v25 = vadd.f32 %v2512_v33, %v299_v41  ;;  %v2665_v54 = vmax.f32 %v5715_v15, %v5719_v30 }
 0x34c   :  { %v2444_v34 = vpop.f32.mrb[92].mxu0  ;;  %2663 = vmax.xlane.f32.xlu0 %v2662_v49  ;;  %1184 = vmax.xlane.f32.xlu1 %v1183_v10  ;;  %v962_v61 = vpop.f32.mrb[60].mxu1  ;;  %v1186_v37 = vmax.f32 %v5721_v1, %v5723_v8 }
 0x34d   :  { %v2513_v43 = vmul.f32 0.25, %v2444_v34  ;;  %v1031_v59 = vmul.f32 0.25, %v962_v61  ;;  %v964_v24 = vpop.f32.mrb[61].mxu1  ;;  %v2446_v14 = vpop.f32.mrb[93].mxu0  ;;  %v2668_v61 = vmax.f32 %v5727_v27, %v5729_v25 }
 0x34e   :  { %v1032_v5 = vmul.f32 0.25, %v964_v24  ;;  %v2514_v23 = vmul.f32 0.25, %v2446_v14  ;;  %v966_v50 = vpop.f32.mrb[62].mxu1  ;;  %v2448_v3 = vpop.f32.mrb[94].mxu0 }
 0x34f   :  { %v5735_v63 = vadd.f32 %v1031_v59, %v300_v36  ;;  %v1033_v42 = vmul.f32 0.25, %v966_v50  ;;  %v968_v56 = vpop.f32.mrb[63].mxu1  ;;  %v2450_v33 = vpop.f32.mrb[95].mxu0  ;;  %v5739_v49 = vadd.f32 %v2513_v43, %v300_v36  ;;  %v2515_v34 = vmul.f32 0.25, %v2448_v3 }
 0x350   :  { %v5737_v41 = vadd.f32 %v1032_v5, %v301_v29  ;;  %v1034_v48 = vmul.f32 0.25, %v968_v56  ;;  %2666 = vmax.xlane.f32.xlu0 %v2665_v54  ;;  %1187 = vmax.xlane.f32.xlu1 %v1186_v37  ;;  %v5741_v10 = vadd.f32 %v2514_v23, %v301_v29  ;;  %v2516_v50 = vmul.f32 0.25, %v2450_v33 }
 0x351   :  { %v5745_v24 = vadd.f32 %v1033_v42, %v302_v11  ;;  %v5751_v5 = vadd.f32 %v2515_v34, %v302_v11 }
 0x352   :  { %v5747_v59 = vadd.f32 %v1034_v48, %v303_v53  ;;  %v1189_v14 = vmax.f32 %v5735_v63, %v5737_v41  ;;  %v5753_v36 = vadd.f32 %v2516_v50, %v303_v53  ;;  %v2671_v3 = vmax.f32 %v5739_v49, %v5741_v10 }
 0x354   :  { %2669 = vmax.xlane.f32.xlu0 %v2668_v61  ;;  %1190 = vmax.xlane.f32.xlu1 %v1189_v14  ;;  %v1192_v29 = vmax.f32 %v5745_v24, %v5747_v59  ;;  %v2674_v43 = vmax.f32 %v5751_v5, %v5753_v36 }
 0x358   :  { %2672 = vmax.xlane.f32.xlu0 %v2671_v3  ;;  %1193 = vmax.xlane.f32.xlu1 %v1192_v29 }
 0x35c   :  { %2675 = vmax.xlane.f32.xlu0 %v2674_v43 }
 0x369   :  { %v1101_v23 = vpop.xlane.xlu0 %1100 }
 0x36a   :  { %v1195_v54 = vsub.f32 %v5377_v52, %v1101_v23  ;;  %v1196_v11 = vsub.f32 %v5379_v55, %v1101_v23 }
 0x36b   :  { %v1104_v37 = vpop.xlane.xlu1 %1103 }
 0x36c   :  { %v1259_v53 = vmul.f32 1.442695, %v1195_v54  ;;  %v1261_v42 = vmul.f32 1.442695, %v1196_v11  ;;  %v1197_v56 = vsub.f32 %v5381_v60, %v1104_v37  ;;  %v1198_v33 = vsub.f32 %v5387_v46, %v1104_v37 }
 0x36d   :  { %v2583_v48 = vpop.xlane.xlu0 %2582 }
 0x36e   :  { %4300 = vpow2.f32 %v1259_v53  ;;  %v1263_v34 = vmul.f32 1.442695, %v1197_v56  ;;  %v1265_v61 = vmul.f32 1.442695, %v1198_v33  ;;  %v2677_v50 = vsub.f32 %v5383_v20, %v2583_v48 }
 0x36f   :  { %4302 = vpow2.f32 %v1261_v42  ;;  %v2678_v14 = vsub.f32 %v5385_v22, %v2583_v48 }
 0x370   :  { %4304 = vpow2.f32 %v1263_v34  ;;  %v2741_v52 = vmul.f32 1.442695, %v2677_v50 }
 0x371   :  { %4306 = vpow2.f32 %v1265_v61  ;;  %v2743_v55 = vmul.f32 1.442695, %v2678_v14  ;;  %v2586_v3 = vpop.xlane.xlu0 %2585  ;;  %v1107_v29 = vpop.xlane.xlu1 %1106 }
 0x372   :  { %4308 = vpow2.f32 %v2741_v52  ;;  %v2679_v60 = vsub.f32 %v5393_v16, %v2586_v3  ;;  %v2680_v46 = vsub.f32 %v5395_v13, %v2586_v3  ;;  %v1199_v43 = vsub.f32 %v5399_v6, %v1107_v29  ;;  %v4684_v52 = vld [vmem:[#allocation5] sm:$0xff] }
 0x373   :  { %v1200_v23 = vsub.f32 %v5401_v35, %v1107_v29  ;;  %4310 = vpow2.f32 %v2743_v55 }
 0x374   :  { %v2745_v20 = vmul.f32 1.442695, %v2679_v60  ;;  %v2747_v54 = vmul.f32 1.442695, %v2680_v46  ;;  %v1267_v11 = vmul.f32 1.442695, %v1199_v43 }
 0x375   :  { %v1269_v22 = vmul.f32 1.442695, %v1200_v23  ;;  %v2589_v37 = vpop.xlane.xlu0 %2588  ;;  %v1110_v53 = vpop.xlane.xlu1 %1109  ;;  %v4685_v60 = vld [vmem:[#allocation5 + $0x8] sm:$0xff]  ;;  %v4686_v43 = vld [vmem:[#allocation5 + $0x10] sm:$0xff] }
 0x376   :  { %4312 = vpow2.f32 %v2745_v20  ;;  %v2681_v42 = vsub.f32 %v5403_v17, %v2589_v37  ;;  %v2682_v56 = vsub.f32 %v5407_v28, %v2589_v37  ;;  %v1201_v16 = vsub.f32 %v5409_v45, %v1110_v53 }
 0x377   :  { %4314 = vpow2.f32 %v2747_v54  ;;  %v1202_v13 = vsub.f32 %v5411_v40, %v1110_v53  ;;  %v4687_v53 = vld [vmem:[#allocation5 + $0x18] sm:$0xff] }
 0x378   :  { %v4301_v6 = vpop.eup %4300  ;;  %4316 = vpow2.f32 %v1267_v11  ;;  %v2749_v35 = vmul.f32 1.442695, %v2681_v42  ;;  %v2751_v33 = vmul.f32 1.442695, %v2682_v56  ;;  %v1271_v48 = vmul.f32 1.442695, %v1201_v16 }
 0x379   :  { %v4303_v34 = vpop.eup %4302  ;;  %4318 = vpow2.f32 %v1269_v22  ;;  %v1273_v61 = vmul.f32 1.442695, %v1202_v13  ;;  %v2592_v50 = vpop.xlane.xlu0 %2591  ;;  %v5775_v55 = vmul.f32 %v4684_v52, %v4301_v6 }
 0x37a   :  { %v1113_v14 = vpop.xlane.xlu1 %1112  ;;  %v4305_v17 = vpop.eup %4304  ;;  %4320 = vpow2.f32 %v2749_v35  ;;  %v2683_v28 = vsub.f32 %v5415_v4, %v2592_v50  ;;  %v2684_v45 = vsub.f32 %v5417_v18, %v2592_v50  ;;  %v5781_v46 = vmul.f32 %v4685_v60, %v4303_v34 }
 0x37b   :  { %v1203_v40 = vsub.f32 %v5423_v58, %v1113_v14  ;;  %v4307_v3 = vpop.eup %4306  ;;  %4322 = vpow2.f32 %v2751_v33  ;;  %v1204_v29 = vsub.f32 %v5425_v19, %v1113_v14  ;;  %v5783_v23 = vmul.f32 %v4686_v43, %v4305_v17 }
 0x37c   :  { %v4309_v20 = vpop.eup %4308  ;;  %4324 = vpow2.f32 %v1271_v48  ;;  %v2753_v54 = vmul.f32 1.442695, %v2683_v28  ;;  %v2755_v11 = vmul.f32 1.442695, %v2684_v45  ;;  %v1451_v58 = vadd.f32 %v5781_v46, %v5775_v55 }
 0x37d   :  { %v1275_v22 = vmul.f32 1.442695, %v1203_v40  ;;  %4326 = vpow2.f32 %v1273_v61  ;;  %v1277_v4 = vmul.f32 1.442695, %v1204_v29  ;;  %v2595_v18 = vpop.xlane.xlu0 %2594  ;;  %v5787_v19 = vmul.f32 %v4687_v53, %v4307_v3  ;;  %v4311_v42 = vpop.eup %4310 }
 0x37e   :  { %v1116_v37 = vpop.xlane.xlu1 %1115  ;;  %4328 = vpow2.f32 %v2753_v54  ;;  %v2685_v56 = vsub.f32 %v5427_v12, %v2595_v18  ;;  %v2686_v16 = vsub.f32 %v5431_v57, %v2595_v18  ;;  %1452 = vadd.xlane.f32.xlu1 %v1451_v58  ;;  %v5795_v33 = vmul.f32 %v4684_v52, %v4309_v20 }
 0x37f   :  { %v1205_v13 = vsub.f32 %v5433_v39, %v1116_v37  ;;  %4330 = vpow2.f32 %v2755_v11  ;;  %v1206_v6 = vsub.f32 %v5435_v7, %v1116_v37  ;;  %v1454_v35 = vadd.f32 %v5787_v19, %v5783_v23 }
 0x380   :  { %v4313_v48 = vpop.eup %4312  ;;  %4332 = vpow2.f32 %v1275_v22  ;;  %v2757_v34 = vmul.f32 1.442695, %v2685_v56  ;;  %v2759_v61 = vmul.f32 1.442695, %v2686_v16  ;;  %v5797_v17 = vmul.f32 %v4685_v60, %v4311_v42 }
 0x381   :  { %v1279_v50 = vmul.f32 1.442695, %v1205_v13  ;;  %v4315_v14 = vpop.eup %4314  ;;  %4334 = vpow2.f32 %v1277_v4  ;;  %v1281_v12 = vmul.f32 1.442695, %v1206_v6  ;;  %1455 = vadd.xlane.f32.xlu0 %v1454_v35  ;;  %v2598_v57 = vpop.xlane.xlu0 %2597  ;;  %v5799_v7 = vmul.f32 %v4686_v43, %v4313_v48  ;;  %v4689_v6 = vld [vmem:[#allocation5 + $0x28] sm:$0xff] }
 0x382   :  { %v1119_v39 = vpop.xlane.xlu1 %1118  ;;  %v4317_v28 = vpop.eup %4316  ;;  %4336 = vpow2.f32 %v2757_v34  ;;  %v2687_v52 = vsub.f32 %v5439_v26, %v2598_v57  ;;  %v2688_v45 = vsub.f32 %v5441_v21, %v2598_v57  ;;  %v2933_v20 = vadd.f32 %v5797_v17, %v5795_v33 }
 0x383   :  { %v1207_v40 = vsub.f32 %v5447_v44, %v1119_v39  ;;  %v4319_v3 = vpop.eup %4318  ;;  %4338 = vpow2.f32 %v2759_v61  ;;  %v1208_v29 = vsub.f32 %v5449_v32, %v1119_v39  ;;  %v5807_v54 = vmul.f32 %v4687_v53, %v4315_v14  ;;  %v4688_v32 = vld [vmem:[#allocation5 + $0x20] sm:$0xff] }
 0x384   :  { %v4321_v60 = vpop.eup %4320  ;;  %4340 = vpow2.f32 %v1279_v50  ;;  %v2761_v43 = vmul.f32 1.442695, %v2687_v52  ;;  %v2763_v11 = vmul.f32 1.442695, %v2688_v45  ;;  %2934 = vadd.xlane.f32.xlu1 %v2933_v20  ;;  %v5811_v37 = vmul.f32 %v4688_v32, %v4317_v28  ;;  %v7488_v52 = vld [vmem:[#allocation47_spill] sm:$0xff] }
 0x385   :  { %v1283_v22 = vmul.f32 1.442695, %v1207_v40  ;;  %v4323_v4 = vpop.eup %4322  ;;  %4342 = vpow2.f32 %v1281_v12  ;;  %v1285_v26 = vmul.f32 1.442695, %v1208_v29  ;;  %v2601_v21 = vpop.xlane.xlu0 %2600  ;;  %v2936_v44 = vadd.f32 %v5807_v54, %v5799_v7  ;;  %v7489_v40 = vld [vmem:[#allocation48_spill] sm:$0xff] }
 0x386   :  { %v1122_v18 = vpop.xlane.xlu1 %1121  ;;  %v4325_v58 = vpop.eup %4324  ;;  %4344 = vpow2.f32 %v2761_v43  ;;  %v2689_v53 = vsub.f32 %v5451_v51, %v2601_v21  ;;  %v2690_v42 = vsub.f32 %v5455_v47, %v2601_v21  ;;  %v5817_v35 = vmul.f32 %v4689_v6, %v4319_v3 }
 0x387   :  { %v1209_v56 = vsub.f32 %v5457_v31, %v1122_v18  ;;  %v4327_v16 = vpop.eup %4326  ;;  %4346 = vpow2.f32 %v2763_v11  ;;  %2937 = vadd.xlane.f32.xlu0 %v2936_v44  ;;  %v1210_v13 = vsub.f32 %v5459_v38, %v1122_v18  ;;  %v5819_v48 = vmul.f32 %v4688_v32, %v4321_v60  ;;  %v7490_v60 = vld [vmem:[#allocation49_spill] sm:$0xff]  ;;  %v4690_v11 = vld [vmem:[#allocation5 + $0x30] sm:$0xff]  ;;  %v4691_v32 = vld [vmem:[#allocation5 + $0x38] sm:$0xff] }
 0x388   :  { %v4329_v34 = vpop.eup %4328  ;;  %4348 = vpow2.f32 %v1283_v22  ;;  %v2765_v61 = vmul.f32 1.442695, %v2689_v53  ;;  %v2767_v50 = vmul.f32 1.442695, %v2690_v42  ;;  %v1457_v31 = vadd.f32 %v5817_v35, %v5811_v37 }
 0x389   :  { %v1287_v14 = vmul.f32 1.442695, %v1209_v56  ;;  %v4331_v51 = vpop.eup %4330  ;;  %4350 = vpow2.f32 %v1285_v26  ;;  %v1289_v47 = vmul.f32 1.442695, %v1210_v13  ;;  %v2604_v12 = vpop.xlane.xlu0 %2603  ;;  %v5823_v57 = vmul.f32 %v4689_v6, %v4323_v4 }
 0x38a   :  { %v1125_v38 = vpop.xlane.xlu1 %1124  ;;  %v4333_v39 = vpop.eup %4332  ;;  %4352 = vpow2.f32 %v2765_v61  ;;  %v2691_v28 = vsub.f32 %v5463_v2, %v2604_v12  ;;  %v2692_v45 = vsub.f32 %v7488_v52, %v2604_v12  ;;  %1458 = vadd.xlane.f32.xlu1 %v1457_v31  ;;  %v5831_v22 = vmul.f32 %v4690_v11, %v4325_v58  ;;  %v7493_v58 = vld [vmem:[#allocation50_spill] sm:$0xff] }
 0x38b   :  { %v1211_v3 = vsub.f32 %v7489_v40, %v1125_v38  ;;  %v4335_v29 = vpop.eup %4334  ;;  %4354 = vpow2.f32 %v2767_v50  ;;  %v2939_v20 = vadd.f32 %v5823_v57, %v5819_v48  ;;  %v1212_v43 = vsub.f32 %v7490_v60, %v1125_v38  ;;  %v7494_v50 = vld [vmem:[#allocation51_spill] sm:$0xff]  ;;  %v7496_v38 = vld [vmem:[#allocation52_spill] sm:$0xff] }
 0x38c   :  { %v4337_v4 = vpop.eup %4336  ;;  %4356 = vpow2.f32 %v1287_v14  ;;  %v2769_v26 = vmul.f32 1.442695, %v2691_v28  ;;  %v2771_v21 = vmul.f32 1.442695, %v2692_v45  ;;  %v5833_v53 = vmul.f32 %v4691_v32, %v4327_v16  ;;  %v7497_v28 = vld [vmem:[#allocation53_spill] sm:$0xff] }
 0x38d   :  { %v1291_v2 = vmul.f32 1.442695, %v1211_v3  ;;  %v4339_v44 = vpop.eup %4338  ;;  %4358 = vpow2.f32 %v1289_v47  ;;  %2940 = vadd.xlane.f32.xlu0 %v2939_v20  ;;  %v1293_v18 = vmul.f32 1.442695, %v1212_v43  ;;  %v2607_v42 = vpop.xlane.xlu0 %2606  ;;  %v5835_v56 = vmul.f32 %v4690_v11, %v4329_v34  ;;  %v4692_v43 = vld [vmem:[#allocation5 + $0x40] sm:$0xff] }
 0x38e   :  { %7491 = vst [vmem:[#allocation47_spill] sm:$0xff] %v5833_v53  ;;  %v1128_v13 = vpop.xlane.xlu1 %1127  ;;  %v4341_v6 = vpop.eup %4340  ;;  %4360 = vpow2.f32 %v2769_v26  ;;  %v2693_v61 = vsub.f32 %v7493_v58, %v2607_v42  ;;  %v2694_v14 = vsub.f32 %v7494_v50, %v2607_v42  ;;  %v5839_v31 = vmul.f32 %v4691_v32, %v4331_v51  ;;  %v4693_v42 = vld [vmem:[#allocation5 + $0x48] sm:$0xff] }
 0x38f   :  { %7492 = vst [vmem:[#allocation48_spill] sm:$0xff] %v5835_v56  ;;  %v4343_v12 = vpop.eup %4342  ;;  %4362 = vpow2.f32 %v2771_v21  ;;  %v1460_v47 = vadd.f32 %v5833_v53, %v5831_v22  ;;  %v1213_v16 = vsub.f32 %v7496_v38, %v1128_v13  ;;  %v1214_v52 = vsub.f32 %v7497_v28, %v1128_v13  ;;  %v7500_v13 = vld [vmem:[#allocation54_spill] sm:$0xff]  ;;  %v7568_v53 = vld [vmem:[#allocation88_spill] sm:$0xff] }
 0x390   :  { %7495 = vst [vmem:[#allocation49_spill] sm:$0xff] %v5839_v31  ;;  %v4345_v34 = vpop.eup %4344  ;;  %4364 = vpow2.f32 %v1291_v2  ;;  %v2773_v45 = vmul.f32 1.442695, %v2693_v61  ;;  %v2775_v40 = vmul.f32 1.442695, %v2694_v14  ;;  %v2942_v3 = vadd.f32 %v5839_v31, %v5835_v56  ;;  %v7501_v61 = vld [vmem:[#allocation55_spill] sm:$0xff] }
 0x391   :  { %v4347_v20 = vpop.eup %4346  ;;  %4366 = vpow2.f32 %v1293_v18  ;;  %1461 = vadd.xlane.f32.xlu1 %v1460_v47  ;;  %v1295_v51 = vmul.f32 1.442695, %v1213_v16  ;;  %v1297_v60 = vmul.f32 1.442695, %v1214_v52  ;;  %v5847_v11 = vmul.f32 %v4692_v43, %v4333_v39  ;;  %v2610_v26 = vpop.xlane.xlu0 %2609  ;;  %v7504_v39 = vld [vmem:[#allocation56_spill] sm:$0xff] }
 0x392   :  { %v1131_v21 = vpop.xlane.xlu1 %1130  ;;  %v4349_v32 = vpop.eup %4348  ;;  %4368 = vpow2.f32 %v2773_v45  ;;  %2943 = vadd.xlane.f32.xlu0 %v2942_v3  ;;  %v5849_v2 = vmul.f32 %v4693_v42, %v4335_v29  ;;  %v2695_v58 = vsub.f32 %v7500_v13, %v2610_v26  ;;  %v2696_v50 = vsub.f32 %v7501_v61, %v2610_v26  ;;  %v7505_v26 = vld [vmem:[#allocation57_spill] sm:$0xff]  ;;  %v4694_v13 = vld [vmem:[#allocation5 + $0x50] sm:$0xff]  ;;  %v4695_v61 = vld [vmem:[#allocation5 + $0x58] sm:$0xff] }
 0x393   :  { %7498 = vst [vmem:[#allocation50_spill] sm:$0xff] %v5847_v11  ;;  %v4351_v14 = vpop.eup %4350  ;;  %4370 = vpow2.f32 %v2775_v40  ;;  %v5853_v18 = vmul.f32 %v4692_v43, %v4337_v4  ;;  %v5855_v47 = vmul.f32 %v4693_v42, %v4339_v44  ;;  %v1215_v38 = vsub.f32 %v7504_v39, %v1131_v21 }
 0x394   :  { %7499 = vst [vmem:[#allocation51_spill] sm:$0xff] %v5849_v2  ;;  %v4353_v16 = vpop.eup %4352  ;;  %4372 = vpow2.f32 %v1295_v51  ;;  %v1463_v28 = vadd.f32 %v5849_v2, %v5847_v11  ;;  %v2777_v52 = vmul.f32 1.442695, %v2695_v58  ;;  %v2779_v29 = vmul.f32 1.442695, %v2696_v50  ;;  %v7508_v58 = vld [vmem:[#allocation58_spill] sm:$0xff] }
 0x395   :  { %7502 = vst [vmem:[#allocation52_spill] sm:$0xff] %v5853_v18  ;;  %7503 = vst [vmem:[#allocation53_spill] sm:$0xff] %v5855_v47  ;;  %v4355_v45 = vpop.eup %4354  ;;  %4374 = vpow2.f32 %v1297_v60  ;;  %v2945_v3 = vadd.f32 %v5855_v47, %v5853_v18  ;;  %v1216_v40 = vsub.f32 %v7505_v26, %v1131_v21  ;;  %v1299_v4 = vmul.f32 1.442695, %v1215_v38  ;;  %v2613_v43 = vpop.xlane.xlu0 %2612  ;;  %v7509_v18 = vld [vmem:[#allocation59_spill] sm:$0xff] }
 0x396   :  { %v1134_v44 = vpop.xlane.xlu1 %1133  ;;  %v4357_v42 = vpop.eup %4356  ;;  %1464 = vadd.xlane.f32.xlu1 %v1463_v28  ;;  %4376 = vpow2.f32 %v2777_v52  ;;  %v5863_v51 = vmul.f32 %v4694_v13, %v4341_v6  ;;  %v5865_v39 = vmul.f32 %v4695_v61, %v4343_v12  ;;  %v2697_v50 = vsub.f32 %v7508_v58, %v2613_v43  ;;  %v7512_v58 = vld [vmem:[#allocation60_spill] sm:$0xff] }
 0x397   :  { %v4359_v60 = vpop.eup %4358  ;;  %4378 = vpow2.f32 %v2779_v29  ;;  %2946 = vadd.xlane.f32.xlu0 %v2945_v3  ;;  %v1301_v47 = vmul.f32 1.442695, %v1216_v40  ;;  %v2698_v21 = vsub.f32 %v7509_v18, %v2613_v43  ;;  %v5869_v38 = vmul.f32 %v4694_v13, %v4345_v34  ;;  %v7513_v29 = vld [vmem:[#allocation61_spill] sm:$0xff] }
 0x398   :  { %7506 = vst [vmem:[#allocation54_spill] sm:$0xff] %v5863_v51  ;;  %7507 = vst [vmem:[#allocation55_spill] sm:$0xff] %v5865_v39  ;;  %v4361_v26 = vpop.eup %4360  ;;  %4380 = vpow2.f32 %v1299_v4  ;;  %v1466_v28 = vadd.f32 %v5865_v39, %v5863_v51  ;;  %v2781_v6 = vmul.f32 1.442695, %v2697_v50  ;;  %v5873_v52 = vmul.f32 %v4695_v61, %v4347_v20  ;;  %v4696_v4 = vld [vmem:[#allocation5 + $0x60] sm:$0xff]  ;;  %v4697_v20 = vld [vmem:[#allocation5 + $0x68] sm:$0xff] }
 0x399   :  { %7510 = vst [vmem:[#allocation56_spill] sm:$0xff] %v5869_v38  ;;  %v4363_v12 = vpop.eup %4362  ;;  %4382 = vpow2.f32 %v1301_v47  ;;  %v2783_v2 = vmul.f32 1.442695, %v2698_v21  ;;  %v1217_v11 = vsub.f32 %v7512_v58, %v1134_v44  ;;  %v1218_v3 = vsub.f32 %v7513_v29, %v1134_v44  ;;  %v2616_v40 = vpop.xlane.xlu0 %2615  ;;  %v7516_v21 = vld [vmem:[#allocation62_spill] sm:$0xff]  ;;  %v7520_v39 = vld [vmem:[#allocation64_spill] sm:$0xff] }
 0x39a   :  { %7511 = vst [vmem:[#allocation57_spill] sm:$0xff] %v5873_v52  ;;  %v1137_v31 = vpop.xlane.xlu1 %1136  ;;  %v4365_v18 = vpop.eup %4364  ;;  %1467 = vadd.xlane.f32.xlu1 %v1466_v28  ;;  %4384 = vpow2.f32 %v2781_v6  ;;  %v2948_v34 = vadd.f32 %v5873_v52, %v5869_v38  ;;  %v5879_v43 = vmul.f32 %v4696_v4, %v4349_v32  ;;  %v5881_v13 = vmul.f32 %v4697_v20, %v4351_v14  ;;  %v7517_v6 = vld [vmem:[#allocation63_spill] sm:$0xff] }
 0x39b   :  { %v4367_v47 = vpop.eup %4366  ;;  %4386 = vpow2.f32 %v2783_v2  ;;  %v1303_v61 = vmul.f32 1.442695, %v1217_v11  ;;  %v1305_v50 = vmul.f32 1.442695, %v1218_v3  ;;  %v2699_v44 = vsub.f32 %v7516_v21, %v2616_v40  ;;  %v7521_v11 = vld [vmem:[#allocation65_spill] sm:$0xff] }
 0x39c   :  { %7514 = vst [vmem:[#allocation58_spill] sm:$0xff] %v5879_v43  ;;  %7515 = vst [vmem:[#allocation59_spill] sm:$0xff] %v5881_v13  ;;  %v4369_v58 = vpop.eup %4368  ;;  %2949 = vadd.xlane.f32.xlu0 %v2948_v34  ;;  %v1469_v28 = vadd.f32 %v5881_v13, %v5879_v43  ;;  %v2700_v29 = vsub.f32 %v7517_v6, %v2616_v40  ;;  %v5887_v52 = vmul.f32 %v4696_v4, %v4353_v16  ;;  %v4698_v16 = vld [vmem:[#allocation5 + $0x70] sm:$0xff]  ;;  %v7524_v6 = vld [vmem:[#allocation66_spill] sm:$0xff] }
 0x39d   :  { %v5889_v32 = vmul.f32 %v4697_v20, %v4355_v45  ;;  %v4371_v38 = vpop.eup %4370  ;;  %4388 = vpow2.f32 %v1303_v61  ;;  %v2785_v14 = vmul.f32 1.442695, %v2699_v44  ;;  %v1219_v2 = vsub.f32 %v7520_v39, %v1137_v31  ;;  %v2619_v51 = vpop.xlane.xlu0 %2618  ;;  %v4699_v44 = vld [vmem:[#allocation5 + $0x78] sm:$0xff] }
 0x39e   :  { %7518 = vst [vmem:[#allocation60_spill] sm:$0xff] %v5887_v52  ;;  %v1220_v3 = vsub.f32 %v7521_v11, %v1137_v31  ;;  %v1140_v21 = vpop.xlane.xlu1 %1139  ;;  %v4373_v56 = vpop.eup %4372  ;;  %4390 = vpow2.f32 %v1305_v50  ;;  %1470 = vadd.xlane.f32.xlu1 %v1469_v28  ;;  %v2787_v34 = vmul.f32 1.442695, %v2700_v29  ;;  %v5895_v4 = vmul.f32 %v4698_v16, %v4357_v42  ;;  %v7525_v28 = vld [vmem:[#allocation67_spill] sm:$0xff] }
 0x39f   :  { %7519 = vst [vmem:[#allocation61_spill] sm:$0xff] %v5889_v32  ;;  %v2951_v40 = vadd.f32 %v5889_v32, %v5887_v52  ;;  %v4375_v45 = vpop.eup %4374  ;;  %4392 = vpow2.f32 %v2785_v14  ;;  %v1307_v20 = vmul.f32 1.442695, %v1219_v2  ;;  %v5897_v39 = vmul.f32 %v4699_v44, %v4359_v60  ;;  %v7528_v2 = vld [vmem:[#allocation68_spill] sm:$0xff] }
 0x3a0   :  { %7522 = vst [vmem:[#allocation62_spill] sm:$0xff] %v5895_v4  ;;  %v1309_v61 = vmul.f32 1.442695, %v1220_v3  ;;  %v4377_v31 = vpop.eup %4376  ;;  %4394 = vpow2.f32 %v2787_v34  ;;  %v2701_v50 = vsub.f32 %v7524_v6, %v2619_v51  ;;  %v2702_v29 = vsub.f32 %v7525_v28, %v2619_v51  ;;  %v7529_v6 = vld [vmem:[#allocation69_spill] sm:$0xff]  ;;  %v4701_v28 = vld [vmem:[#allocation5 + $0x88] sm:$0xff] }
 0x3a1   :  { %7523 = vst [vmem:[#allocation63_spill] sm:$0xff] %v5897_v39  ;;  %2952 = vadd.xlane.f32.xlu0 %v2951_v40  ;;  %v5901_v11 = vmul.f32 %v4698_v16, %v4361_v26  ;;  %v4379_v32 = vpop.eup %4378  ;;  %4396 = vpow2.f32 %v1307_v20  ;;  %v1472_v42 = vadd.f32 %v5897_v39, %v5895_v4  ;;  %v5905_v14 = vmul.f32 %v4699_v44, %v4363_v12  ;;  %v2622_v60 = vpop.xlane.xlu0 %2621  ;;  %v4700_v12 = vld [vmem:[#allocation5 + $0x80] sm:$0xff] }
 0x3a2   :  { %v1221_v3 = vsub.f32 %v7528_v2, %v1140_v21  ;;  %v1143_v52 = vpop.xlane.xlu1 %1142  ;;  %v5908_v13 = vpop.eup %4380  ;;  %4398 = vpow2.f32 %v1309_v61  ;;  %v2789_v34 = vmul.f32 1.442695, %v2701_v50  ;;  %v2791_v40 = vmul.f32 1.442695, %v2702_v29  ;;  %v7532_v50 = vld [vmem:[#allocation70_spill] sm:$0xff] }
 0x3a3   :  { %7526 = vst [vmem:[#allocation64_spill] sm:$0xff] %v5901_v11  ;;  %7527 = vst [vmem:[#allocation65_spill] sm:$0xff] %v5905_v14  ;;  %v1222_v51 = vsub.f32 %v7529_v6, %v1140_v21  ;;  %v5911_v26 = vpop.eup %4382  ;;  %1473 = vadd.xlane.f32.xlu1 %v1472_v42  ;;  %v2954_v16 = vadd.f32 %v5905_v14, %v5901_v11  ;;  %v5915_v44 = vmul.f32 %v4700_v12, %v4365_v18  ;;  %v7533_v21 = vld [vmem:[#allocation71_spill] sm:$0xff] }
 0x3a4   :  { %v1311_v20 = vmul.f32 1.442695, %v1221_v3  ;;  %v5917_v2 = vmul.f32 %v4701_v28, %v4367_v47  ;;  %v5919_v39 = vpop.eup %4384  ;;  %4400 = vpow2.f32 %v2789_v34  ;;  %v2703_v29 = vsub.f32 %v7532_v50, %v2622_v60 }
 0x3a5   :  { %7530 = vst [vmem:[#allocation66_spill] sm:$0xff] %v5915_v44  ;;  %v1313_v61 = vmul.f32 1.442695, %v1222_v51  ;;  %v2704_v6 = vsub.f32 %v7533_v21, %v2622_v60  ;;  %v4387_v4 = vpop.eup %4386  ;;  %4402 = vpow2.f32 %v2791_v40  ;;  %2955 = vadd.xlane.f32.xlu0 %v2954_v16  ;;  %v5925_v3 = vmul.f32 %v4700_v12, %v4369_v58  ;;  %v2625_v47 = vpop.xlane.xlu0 %2624  ;;  %v7536_v51 = vld [vmem:[#allocation72_spill] sm:$0xff]  ;;  %v7537_v40 = vld [vmem:[#allocation73_spill] sm:$0xff]  ;;  %v4702_v21 = vld [vmem:[#allocation5 + $0x90] sm:$0xff] }
 0x3a6   :  { %7531 = vst [vmem:[#allocation67_spill] sm:$0xff] %v5917_v2  ;;  %v1475_v42 = vadd.f32 %v5917_v2, %v5915_v44  ;;  %v5927_v18 = vmul.f32 %v4701_v28, %v4371_v38  ;;  %v1146_v14 = vpop.xlane.xlu1 %1145  ;;  %4404 = vpow2.f32 %v1311_v20  ;;  %v2793_v11 = vmul.f32 1.442695, %v2703_v29  ;;  %v4703_v28 = vld [vmem:[#allocation5 + $0x98] sm:$0xff]  ;;  %v7540_v29 = vld [vmem:[#allocation74_spill] sm:$0xff]  ;;  %v7545_v2 = vld [vmem:[#allocation77_spill] sm:$0xff] }
 0x3a7   :  { %7534 = vst [vmem:[#allocation68_spill] sm:$0xff] %v5925_v3  ;;  %v2795_v34 = vmul.f32 1.442695, %v2704_v6  ;;  %v1223_v43 = vsub.f32 %v7536_v51, %v1143_v52  ;;  %v4389_v50 = vpop.eup %4388  ;;  %4406 = vpow2.f32 %v1313_v61  ;;  %v1224_v16 = vsub.f32 %v7537_v40, %v1143_v52 }
 0x3a8   :  { %7535 = vst [vmem:[#allocation69_spill] sm:$0xff] %v5927_v18  ;;  %1476 = vadd.xlane.f32.xlu1 %v1475_v42  ;;  %v2957_v60 = vadd.f32 %v5927_v18, %v5925_v3  ;;  %v5933_v58 = vmul.f32 %v4702_v21, %v4373_v56  ;;  %v4391_v38 = vpop.eup %4390  ;;  %4408 = vpow2.f32 %v2793_v11  ;;  %v5935_v20 = vmul.f32 %v4703_v28, %v4375_v45  ;;  %v7541_v42 = vld [vmem:[#allocation75_spill] sm:$0xff] }
 0x3a9   :  { %v1315_v12 = vmul.f32 1.442695, %v1223_v43  ;;  %v2705_v6 = vsub.f32 %v7540_v29, %v2625_v47  ;;  %v5938_v51 = vpop.eup %4392  ;;  %4410 = vpow2.f32 %v2795_v34  ;;  %v1317_v61 = vmul.f32 1.442695, %v1224_v16  ;;  %v2628_v52 = vpop.xlane.xlu0 %2627 }
 0x3aa   :  { %7538 = vst [vmem:[#allocation70_spill] sm:$0xff] %v5933_v58  ;;  %7539 = vst [vmem:[#allocation71_spill] sm:$0xff] %v5935_v20  ;;  %2958 = vadd.xlane.f32.xlu0 %v2957_v60  ;;  %v2706_v18 = vsub.f32 %v7541_v42, %v2625_v47  ;;  %v5941_v3 = vmul.f32 %v4702_v21, %v4377_v31  ;;  %v1149_v56 = vpop.xlane.xlu1 %1148  ;;  %v4395_v40 = vpop.eup %4394  ;;  %v1478_v43 = vadd.f32 %v5935_v20, %v5933_v58  ;;  %v7544_v60 = vld [vmem:[#allocation76_spill] sm:$0xff]  ;;  %v7548_v42 = vld [vmem:[#allocation78_spill] sm:$0xff] }
 0x3ab   :  { %4412 = vpow2.f32 %v1315_v12  ;;  %v2797_v45 = vmul.f32 1.442695, %v2705_v6  ;;  %v5945_v11 = vmul.f32 %v4703_v28, %v4379_v32  ;;  %v5947_v29 = vpop.eup %4396  ;;  %v1225_v16 = vsub.f32 %v7544_v60, %v1146_v14  ;;  %v4704_v12 = vld [vmem:[#allocation5 + $0xa0] sm:$0xff]  ;;  %v4705_v32 = vld [vmem:[#allocation5 + $0xa8] sm:$0xff] }
 0x3ac   :  { %7542 = vst [vmem:[#allocation72_spill] sm:$0xff] %v5941_v3  ;;  %4414 = vpow2.f32 %v1317_v61  ;;  %v2799_v34 = vmul.f32 1.442695, %v2706_v18  ;;  %v1226_v47 = vsub.f32 %v7545_v2, %v1146_v14  ;;  %v5951_v31 = vpop.eup %4398  ;;  %1479 = vadd.xlane.f32.xlu1 %v1478_v43  ;;  %v5956_v6 = vmul.f32 %v4704_v12, %v5908_v13 }
 0x3ad   :  { %7543 = vst [vmem:[#allocation73_spill] sm:$0xff] %v5945_v11  ;;  %4416 = vpow2.f32 %v2797_v45  ;;  %v2960_v21 = vadd.f32 %v5945_v11, %v5941_v3  ;;  %v5959_v28 = vmul.f32 %v4705_v32, %v5911_v26  ;;  %v1319_v18 = vmul.f32 1.442695, %v1225_v16  ;;  %v2631_v2 = vpop.xlane.xlu0 %2630  ;;  %v7549_v11 = vld [vmem:[#allocation79_spill] sm:$0xff]  ;;  %v7552_v16 = vld [vmem:[#allocation80_spill] sm:$0xff] }
 0x3ae   :  { %7546 = vst [vmem:[#allocation74_spill] sm:$0xff] %v5956_v6  ;;  %4418 = vpow2.f32 %v2799_v34  ;;  %v1321_v61 = vmul.f32 1.442695, %v1226_v47  ;;  %v2707_v14 = vsub.f32 %v7548_v42, %v2628_v52  ;;  %v1152_v60 = vpop.xlane.xlu1 %1151  ;;  %v4401_v43 = vpop.eup %4400  ;;  %v2708_v3 = vsub.f32 %v7549_v11, %v2628_v52  ;;  %v7553_v42 = vld [vmem:[#allocation81_spill] sm:$0xff]  ;;  %v4706_v52 = vld [vmem:[#allocation5 + $0xb0] sm:$0xff] }
 0x3af   :  { %7547 = vst [vmem:[#allocation75_spill] sm:$0xff] %v5959_v28  ;;  %2961 = vadd.xlane.f32.xlu0 %v2960_v21  ;;  %v1481_v45 = vadd.f32 %v5959_v28, %v5956_v6  ;;  %v5966_v13 = vmul.f32 %v4704_v12, %v5919_v39  ;;  %v5968_v20 = vmul.f32 %v4705_v32, %v4387_v4  ;;  %v4403_v26 = vpop.eup %4402  ;;  %4420 = vpow2.f32 %v1319_v18  ;;  %v4707_v32 = vld [vmem:[#allocation5 + $0xb8] sm:$0xff] }
 0x3b0   :  { %v2801_v34 = vmul.f32 1.442695, %v2707_v14  ;;  %v1227_v47 = vsub.f32 %v7552_v16, %v1149_v56  ;;  %v1228_v58 = vsub.f32 %v7553_v42, %v1149_v56  ;;  %v4405_v44 = vpop.eup %4404  ;;  %4422 = vpow2.f32 %v1321_v61  ;;  %v7556_v61 = vld [vmem:[#allocation82_spill] sm:$0xff] }
 0x3b1   :  { %7550 = vst [vmem:[#allocation76_spill] sm:$0xff] %v5966_v13  ;;  %7551 = vst [vmem:[#allocation77_spill] sm:$0xff] %v5968_v20  ;;  %1482 = vadd.xlane.f32.xlu1 %v1481_v45  ;;  %v2803_v21 = vmul.f32 1.442695, %v2708_v3  ;;  %v2963_v28 = vadd.f32 %v5968_v20, %v5966_v13  ;;  %v5974_v11 = vmul.f32 %v4706_v52, %v4389_v50  ;;  %v4407_v39 = vpop.eup %4406  ;;  %v2634_v14 = vpop.xlane.xlu0 %2633  ;;  %v7557_v45 = vld [vmem:[#allocation83_spill] sm:$0xff] }
 0x3b2   :  { %4424 = vpow2.f32 %v2801_v34  ;;  %v1323_v4 = vmul.f32 1.442695, %v1227_v47  ;;  %v1325_v12 = vmul.f32 1.442695, %v1228_v58  ;;  %v5976_v18 = vmul.f32 %v4707_v32, %v4391_v38  ;;  %v1155_v16 = vpop.xlane.xlu1 %1154  ;;  %v4409_v56 = vpop.eup %4408  ;;  %v7560_v38 = vld [vmem:[#allocation84_spill] sm:$0xff] }
 0x3b3   :  { %7554 = vst [vmem:[#allocation78_spill] sm:$0xff] %v5974_v11  ;;  %4426 = vpow2.f32 %v2803_v21  ;;  %2964 = vadd.xlane.f32.xlu0 %v2963_v28  ;;  %v2709_v3 = vsub.f32 %v7556_v61, %v2631_v2  ;;  %v2710_v42 = vsub.f32 %v7557_v45, %v2631_v2  ;;  %v5981_v20 = vmul.f32 %v4706_v52, %v5938_v51  ;;  %v4411_v50 = vpop.eup %4410  ;;  %v7561_v61 = vld [vmem:[#allocation85_spill] sm:$0xff] }
 0x3b4   :  { %7555 = vst [vmem:[#allocation79_spill] sm:$0xff] %v5976_v18  ;;  %4428 = vpow2.f32 %v1323_v4  ;;  %v1484_v58 = vadd.f32 %v5976_v18, %v5974_v11  ;;  %v5985_v34 = vmul.f32 %v4707_v32, %v4395_v40  ;;  %v1229_v47 = vsub.f32 %v7560_v38, %v1152_v60  ;;  %v4708_v4 = vld [vmem:[#allocation5 + $0xc0] sm:$0xff]  ;;  %v4709_v32 = vld [vmem:[#allocation5 + $0xc8] sm:$0xff] }
 0x3b5   :  { %7558 = vst [vmem:[#allocation80_spill] sm:$0xff] %v5981_v20  ;;  %v5988_v13 = vpop.eup %4412  ;;  %4430 = vpow2.f32 %v1325_v12  ;;  %v2805_v28 = vmul.f32 1.442695, %v2709_v3  ;;  %v2807_v21 = vmul.f32 1.442695, %v2710_v42  ;;  %v1230_v6 = vsub.f32 %v7561_v61, %v1152_v60  ;;  %v2637_v12 = vpop.xlane.xlu0 %2636  ;;  %v7564_v38 = vld [vmem:[#allocation86_spill] sm:$0xff] }
 0x3b6   :  { %7559 = vst [vmem:[#allocation81_spill] sm:$0xff] %v5985_v34  ;;  %v5991_v2 = vpop.eup %4414  ;;  %1485 = vadd.xlane.f32.xlu1 %v1484_v58  ;;  %v2966_v51 = vadd.f32 %v5985_v34, %v5981_v20  ;;  %v1327_v52 = vmul.f32 1.442695, %v1229_v47  ;;  %v5996_v40 = vmul.f32 %v4708_v4, %v5947_v29  ;;  %v5999_v45 = vmul.f32 %v4709_v32, %v5951_v31  ;;  %v1158_v3 = vpop.xlane.xlu1 %1157  ;;  %v7565_v61 = vld [vmem:[#allocation87_spill] sm:$0xff] }
 0x3b7   :  { %v6001_v42 = vpop.eup %4416  ;;  %4432 = vpow2.f32 %v2805_v28  ;;  %v1329_v60 = vmul.f32 1.442695, %v1230_v6  ;;  %v2711_v58 = vsub.f32 %v7564_v38, %v2634_v14  ;;  %v2712_v18 = vsub.f32 %v7565_v61, %v2634_v14  ;;  %v4710_v38 = vld [vmem:[#allocation5 + $0xd0] sm:$0xff] }
 0x3b8   :  { %7562 = vst [vmem:[#allocation82_spill] sm:$0xff] %v5996_v40  ;;  %7563 = vst [vmem:[#allocation83_spill] sm:$0xff] %v5999_v45  ;;  %v4419_v34 = vpop.eup %4418  ;;  %4434 = vpow2.f32 %v2807_v21  ;;  %2967 = vadd.xlane.f32.xlu0 %v2966_v51  ;;  %v1487_v29 = vadd.f32 %v5999_v45, %v5996_v40  ;;  %v6007_v47 = vmul.f32 %v4708_v4, %v4401_v43  ;;  %v7569_v21 = vld [vmem:[#allocation89_spill] sm:$0xff]  ;;  %v7576_v45 = vld [vmem:[#allocation92_spill] sm:$0xff] }
 0x3b9   :  { %v6009_v31 = vmul.f32 %v4709_v32, %v4403_v26  ;;  %4436 = vpow2.f32 %v1327_v52  ;;  %v2809_v20 = vmul.f32 1.442695, %v2711_v58  ;;  %v2811_v11 = vmul.f32 1.442695, %v2712_v18  ;;  %v6012_v6 = vpop.eup %4420  ;;  %v2640_v43 = vpop.xlane.xlu0 %2639  ;;  %v4711_v18 = vld [vmem:[#allocation5 + $0xd8] sm:$0xff] }
 0x3ba   :  { %7566 = vst [vmem:[#allocation84_spill] sm:$0xff] %v6007_v47  ;;  %v1231_v28 = vsub.f32 %v7568_v53, %v1155_v16  ;;  %4438 = vpow2.f32 %v1329_v60  ;;  %1488 = vadd.xlane.f32.xlu1 %v1487_v29  ;;  %v1232_v51 = vsub.f32 %v7569_v21, %v1155_v16  ;;  %v6017_v61 = vmul.f32 %v4710_v38, %v4405_v44  ;;  %v1161_v26 = vpop.xlane.xlu1 %1160  ;;  %v4423_v4 = vpop.eup %4422  ;;  %v7572_v53 = vld [vmem:[#allocation90_spill] sm:$0xff] }
 0x3bb   :  { %7567 = vst [vmem:[#allocation85_spill] sm:$0xff] %v6009_v31  ;;  %v2969_v14 = vadd.f32 %v6009_v31, %v6007_v47  ;;  %4440 = vpow2.f32 %v2809_v20  ;;  %v6019_v32 = vmul.f32 %v4711_v18, %v4407_v39  ;;  %v2713_v58 = vsub.f32 %v7572_v53, %v2637_v12  ;;  %v7573_v31 = vld [vmem:[#allocation91_spill] sm:$0xff] }
 0x3bc   :  { %7570 = vst [vmem:[#allocation86_spill] sm:$0xff] %v6017_v61  ;;  %v1331_v52 = vmul.f32 1.442695, %v1231_v28  ;;  %v4425_v60 = vpop.eup %4424  ;;  %4442 = vpow2.f32 %v2811_v11  ;;  %v1333_v29 = vmul.f32 1.442695, %v1232_v51  ;;  %v2714_v47 = vsub.f32 %v7573_v31, %v2637_v12 }
 0x3bd   :  { %7571 = vst [vmem:[#allocation87_spill] sm:$0xff] %v6019_v32  ;;  %2970 = vadd.xlane.f32.xlu0 %v2969_v14  ;;  %v6023_v16 = vmul.f32 %v4710_v38, %v4409_v56  ;;  %v4427_v44 = vpop.eup %4426  ;;  %v1490_v21 = vadd.f32 %v6019_v32, %v6017_v61  ;;  %v2813_v20 = vmul.f32 1.442695, %v2713_v58  ;;  %v6027_v28 = vmul.f32 %v4711_v18, %v4411_v50  ;;  %v7577_v14 = vld [vmem:[#allocation93_spill] sm:$0xff]  ;;  %v2643_v40 = vpop.xlane.xlu0 %2642  ;;  %v7580_v18 = vld [vmem:[#allocation94_spill] sm:$0xff] }
 0x3be   :  { %4444 = vpow2.f32 %v1331_v52  ;;  %v6029_v39 = vpop.eup %4428  ;;  %v2815_v53 = vmul.f32 1.442695, %v2714_v47  ;;  %v1233_v11 = vsub.f32 %v7576_v45, %v1158_v3  ;;  %v1234_v51 = vsub.f32 %v7577_v14, %v1158_v3  ;;  %v6033_v12 = vpop.xlane.xlu1 %1163  ;;  %v4712_v50 = vld [vmem:[#allocation5 + $0xe0] sm:$0xff]  ;;  %v4713_v52 = vld [vmem:[#allocation5 + $0xe8] sm:$0xff] }
 0x3bf   :  { %7574 = vst [vmem:[#allocation88_spill] sm:$0xff] %v6023_v16  ;;  %7575 = vst [vmem:[#allocation89_spill] sm:$0xff] %v6027_v28  ;;  %4446 = vpow2.f32 %v1333_v29  ;;  %v6035_v56 = vpop.eup %4430  ;;  %1491 = vadd.xlane.f32.xlu1 %v1490_v21  ;;  %v2972_v31 = vadd.f32 %v6027_v28, %v6023_v16  ;;  %v6040_v38 = vmul.f32 %v4712_v50, %v5988_v13 }
 0x3c0   :  { %4448 = vpow2.f32 %v2813_v20  ;;  %v6043_v47 = vmul.f32 %v4713_v52, %v5991_v2  ;;  %v1335_v45 = vmul.f32 1.442695, %v1233_v11  ;;  %v1337_v3 = vmul.f32 1.442695, %v1234_v51  ;;  %v7581_v20 = vld [vmem:[#allocation95_spill] sm:$0xff]  ;;  %v7585_v51 = vld [vmem:[#allocation97_spill] sm:$0xff] }
 0x3c1   :  { %7578 = vst [vmem:[#allocation90_spill] sm:$0xff] %v6040_v38  ;;  %4450 = vpow2.f32 %v2815_v53  ;;  %v2715_v58 = vsub.f32 %v7580_v18, %v2640_v43  ;;  %v4433_v29 = vpop.eup %4432  ;;  %2973 = vadd.xlane.f32.xlu0 %v2972_v31  ;;  %v2716_v14 = vsub.f32 %v7581_v20, %v2640_v43  ;;  %v6050_v28 = vmul.f32 %v4712_v50, %v6001_v42  ;;  %v7584_v53 = vld [vmem:[#allocation96_spill] sm:$0xff]  ;;  %v2646_v18 = vpop.xlane.xlu0 %2645  ;;  %v4714_v43 = vld [vmem:[#allocation5 + $0xf0] sm:$0xff] }
 0x3c2   :  { %7579 = vst [vmem:[#allocation91_spill] sm:$0xff] %v6043_v47  ;;  %v1493_v21 = vadd.f32 %v6043_v47, %v6040_v38  ;;  %v6052_v13 = vmul.f32 %v4713_v52, %v4419_v34  ;;  %v4435_v16 = vpop.eup %4434  ;;  %4452 = vpow2.f32 %v1335_v45  ;;  %v1235_v11 = vsub.f32 %v7584_v53, %v1161_v26  ;;  %v6056_v61 = vpop.xlane.xlu1 %1166 }
 0x3c3   :  { %7582 = vst [vmem:[#allocation92_spill] sm:$0xff] %v6050_v28  ;;  %v2817_v2 = vmul.f32 1.442695, %v2715_v58  ;;  %v1236_v32 = vsub.f32 %v7585_v51, %v1161_v26  ;;  %v4437_v31 = vpop.eup %4436  ;;  %4454 = vpow2.f32 %v1337_v3  ;;  %v2819_v47 = vmul.f32 1.442695, %v2716_v14  ;;  %v4715_v58 = vld [vmem:[#allocation5 + $0xf8] sm:$0xff] }
 0x3c4   :  { %7583 = vst [vmem:[#allocation93_spill] sm:$0xff] %v6052_v13  ;;  %1494 = vadd.xlane.f32.xlu1 %v1493_v21  ;;  %v2975_v42 = vadd.f32 %v6052_v13, %v6050_v28  ;;  %v6061_v34 = vmul.f32 %v4714_v43, %v6012_v6  ;;  %v4439_v50 = vpop.eup %4438  ;;  %v1339_v52 = vmul.f32 1.442695, %v1235_v11  ;;  %v6063_v26 = vmul.f32 %v4715_v58, %v4423_v4  ;;  %v7588_v3 = vld [vmem:[#allocation98_spill] sm:$0xff]  ;;  %v7589_v14 = vld [vmem:[#allocation99_spill] sm:$0xff] }
 0x3c5   :  { %4456 = vpow2.f32 %v2817_v2  ;;  %v1341_v45 = vmul.f32 1.442695, %v1236_v32  ;;  %v4441_v20 = vpop.eup %4440  ;;  %v2717_v21 = vsub.f32 %v7588_v3, %v2643_v40  ;;  %v2718_v53 = vsub.f32 %v7589_v14, %v2643_v40  ;;  %v7592_v32 = vld [vmem:[#allocation100_spill] sm:$0xff]  ;;  %v2649_v11 = vpop.xlane.xlu0 %2648  ;;  %v4716_v3 = vld [vmem:[#allocation5 + $0x100] sm:$0xff] }
 0x3c6   :  { %7586 = vst [vmem:[#allocation94_spill] sm:$0xff] %v6061_v34  ;;  %7587 = vst [vmem:[#allocation95_spill] sm:$0xff] %v6063_v26  ;;  %4458 = vpow2.f32 %v2819_v47  ;;  %2976 = vadd.xlane.f32.xlu0 %v2975_v42  ;;  %v6067_v51 = vmul.f32 %v4714_v43, %v4425_v60  ;;  %v4443_v13 = vpop.eup %4442  ;;  %v1496_v6 = vadd.f32 %v6063_v26, %v6061_v34  ;;  %v6075_v28 = vpop.xlane.xlu1 %1169  ;;  %v7593_v60 = vld [vmem:[#allocation101_spill] sm:$0xff] }
 0x3c7   :  { %4460 = vpow2.f32 %v1339_v52  ;;  %v6071_v2 = vmul.f32 %v4715_v58, %v4427_v44  ;;  %v1237_v4 = vsub.f32 %v7592_v32, %v6033_v12  ;;  %v2821_v42 = vmul.f32 1.442695, %v2717_v21  ;;  %v4717_v32 = vld [vmem:[#allocation5 + $0x108] sm:$0xff] }
 0x3c8   :  { %7590 = vst [vmem:[#allocation96_spill] sm:$0xff] %v6067_v51  ;;  %v6077_v47 = vpop.eup %4444  ;;  %4462 = vpow2.f32 %v1341_v45  ;;  %v2823_v40 = vmul.f32 1.442695, %v2718_v53  ;;  %v1238_v43 = vsub.f32 %v7593_v60, %v6033_v12  ;;  %1497 = vadd.xlane.f32.xlu1 %v1496_v6  ;;  %v6086_v14 = vmul.f32 %v4716_v3, %v6029_v39  ;;  %v7596_v12 = vld [vmem:[#allocation102_spill] sm:$0xff]  ;;  %v7597_v60 = vld [vmem:[#allocation103_spill] sm:$0xff] }
 0x3c9   :  { %7591 = vst [vmem:[#allocation97_spill] sm:$0xff] %v6071_v2  ;;  %v6081_v52 = vpop.eup %4446  ;;  %v2978_v44 = vadd.f32 %v6071_v2, %v6067_v51  ;;  %v1343_v58 = vmul.f32 1.442695, %v1237_v4  ;;  %v6089_v26 = vmul.f32 %v4717_v32, %v6035_v56  ;;  %4464 = vpow2.f32 %v2821_v42  ;;  %v6101_v56 = vpop.xlane.xlu0 %2651 }
 0x3ca   :  { %7594 = vst [vmem:[#allocation98_spill] sm:$0xff] %v6086_v14  ;;  %v6091_v45 = vpop.eup %4448  ;;  %v1345_v21 = vmul.f32 1.442695, %v1238_v43  ;;  %v2719_v53 = vsub.f32 %v7596_v12, %v2646_v18  ;;  %v2720_v6 = vsub.f32 %v7597_v60, %v2646_v18  ;;  %4466 = vpow2.f32 %v2823_v40  ;;  %v6103_v51 = vpop.xlane.xlu1 %1172  ;;  %v7600_v12 = vld [vmem:[#allocation104_spill] sm:$0xff] }
 0x3cb   :  { %7595 = vst [vmem:[#allocation99_spill] sm:$0xff] %v6089_v26  ;;  %v4451_v34 = vpop.eup %4450  ;;  %2979 = vadd.xlane.f32.xlu0 %v2978_v44  ;;  %v1499_v4 = vadd.f32 %v6089_v26, %v6086_v14  ;;  %v6097_v39 = vmul.f32 %v4716_v3, %v4433_v29  ;;  %v6099_v2 = vmul.f32 %v4717_v32, %v4435_v16  ;;  %4468 = vpow2.f32 %v1343_v58  ;;  %v7601_v29 = vld [vmem:[#allocation105_spill] sm:$0xff]  ;;  %v4718_v44 = vld [vmem:[#allocation5 + $0x110] sm:$0xff]  ;;  %v7604_v26 = vld [vmem:[#allocation106_spill] sm:$0xff] }
 0x3cc   :  { %v2825_v42 = vmul.f32 1.442695, %v2719_v53  ;;  %v2827_v43 = vmul.f32 1.442695, %v2720_v6  ;;  %v1239_v18 = vsub.f32 %v7600_v12, %v6056_v61  ;;  %v4453_v60 = vpop.eup %4452  ;;  %4470 = vpow2.f32 %v1345_v21  ;;  %v4719_v53 = vld [vmem:[#allocation5 + $0x118] sm:$0xff] }
 0x3cd   :  { %7598 = vst [vmem:[#allocation100_spill] sm:$0xff] %v6097_v39  ;;  %7599 = vst [vmem:[#allocation101_spill] sm:$0xff] %v6099_v2  ;;  %1500 = vadd.xlane.f32.xlu1 %v1499_v4  ;;  %v2981_v40 = vadd.f32 %v6099_v2, %v6097_v39  ;;  %v1240_v16 = vsub.f32 %v7601_v29, %v6056_v61  ;;  %v6111_v3 = vmul.f32 %v4718_v44, %v4437_v31  ;;  %v4455_v32 = vpop.eup %4454  ;;  %v7605_v4 = vld [vmem:[#allocation107_spill] sm:$0xff]  ;;  %v6119_v61 = vpop.xlane.xlu0 %2654 }
 0x3ce   :  { %4472 = vpow2.f32 %v2825_v42  ;;  %v1347_v58 = vmul.f32 1.442695, %v1239_v18  ;;  %v6113_v6 = vmul.f32 %v4719_v53, %v4439_v50  ;;  %v2721_v12 = vsub.f32 %v7604_v26, %v2649_v11  ;;  %v6121_v31 = vpop.xlane.xlu1 %1175 }
 0x3cf   :  { %7602 = vst [vmem:[#allocation102_spill] sm:$0xff] %v6111_v3  ;;  %v4457_v14 = vpop.eup %4456  ;;  %4474 = vpow2.f32 %v2827_v43  ;;  %2982 = vadd.xlane.f32.xlu0 %v2981_v40  ;;  %v1349_v21 = vmul.f32 1.442695, %v1240_v16  ;;  %v2722_v2 = vsub.f32 %v7605_v4, %v2649_v11  ;;  %v6117_v39 = vmul.f32 %v4718_v44, %v4441_v20  ;;  %v7608_v11 = vld [vmem:[#allocation108_spill] sm:$0xff]  ;;  %v7609_v40 = vld [vmem:[#allocation109_spill] sm:$0xff] }
 0x3d0   :  { %7603 = vst [vmem:[#allocation103_spill] sm:$0xff] %v6113_v6  ;;  %v4459_v29 = vpop.eup %4458  ;;  %4476 = vpow2.f32 %v1347_v58  ;;  %v1502_v50 = vadd.f32 %v6113_v6, %v6111_v3  ;;  %v2829_v42 = vmul.f32 1.442695, %v2721_v12  ;;  %v6125_v18 = vmul.f32 %v4719_v53, %v4443_v13  ;;  %v4720_v4 = vld [vmem:[#allocation5 + $0x120] sm:$0xff]  ;;  %v4721_v53 = vld [vmem:[#allocation5 + $0x128] sm:$0xff] }
 0x3d1   :  { %7606 = vst [vmem:[#allocation104_spill] sm:$0xff] %v6117_v39  ;;  %v6127_v26 = vpop.eup %4460  ;;  %4478 = vpow2.f32 %v1349_v21  ;;  %v2831_v43 = vmul.f32 1.442695, %v2722_v2  ;;  %v1241_v20 = vsub.f32 %v7608_v11, %v6075_v28  ;;  %v1242_v16 = vsub.f32 %v7609_v40, %v6075_v28  ;;  %v7612_v11 = vld [vmem:[#allocation110_spill] sm:$0xff]  ;;  %v6143_v40 = vpop.xlane.xlu0 %2657  ;;  %v7617_v6 = vld [vmem:[#allocation113_spill] sm:$0xff] }
 0x3d2   :  { %7607 = vst [vmem:[#allocation105_spill] sm:$0xff] %v6125_v18  ;;  %v4463_v44 = vpop.eup %4462  ;;  %1503 = vadd.xlane.f32.xlu1 %v1502_v50  ;;  %4480 = vpow2.f32 %v2829_v42  ;;  %v2984_v58 = vadd.f32 %v6125_v18, %v6117_v39  ;;  %v6136_v13 = vmul.f32 %v4720_v4, %v6077_v47  ;;  %v6139_v12 = vmul.f32 %v4721_v53, %v6081_v52  ;;  %v7613_v47 = vld [vmem:[#allocation111_spill] sm:$0xff]  ;;  %v6158_v3 = vpop.xlane.xlu1 %1178 }
 0x3d3   :  { %4482 = vpow2.f32 %v2831_v43  ;;  %v1351_v2 = vmul.f32 1.442695, %v1241_v20  ;;  %v1353_v21 = vmul.f32 1.442695, %v1242_v16  ;;  %v2723_v28 = vsub.f32 %v7612_v11, %v6101_v56  ;;  %v4465_v50 = vpop.eup %4464  ;;  %v7616_v16 = vld [vmem:[#allocation112_spill] sm:$0xff] }
 0x3d4   :  { %7610 = vst [vmem:[#allocation106_spill] sm:$0xff] %v6136_v13  ;;  %7611 = vst [vmem:[#allocation107_spill] sm:$0xff] %v6139_v12  ;;  %2985 = vadd.xlane.f32.xlu0 %v2984_v58  ;;  %v1505_v42 = vadd.f32 %v6139_v12, %v6136_v13  ;;  %v2724_v18 = vsub.f32 %v7613_v47, %v6101_v56  ;;  %v6150_v39 = vmul.f32 %v4720_v4, %v6091_v45  ;;  %v4467_v43 = vpop.eup %4466  ;;  %v4723_v47 = vld [vmem:[#allocation5 + $0x138] sm:$0xff]  ;;  %v7625_v13 = vld [vmem:[#allocation117_spill] sm:$0xff] }
 0x3d5   :  { %v6152_v52 = vmul.f32 %v4721_v53, %v4451_v34  ;;  %4484 = vpow2.f32 %v1351_v2  ;;  %v2833_v20 = vmul.f32 1.442695, %v2723_v28  ;;  %v1243_v11 = vsub.f32 %v7616_v16, %v6103_v51  ;;  %v4469_v12 = vpop.eup %4468  ;;  %v4722_v34 = vld [vmem:[#allocation5 + $0x130] sm:$0xff] }
 0x3d6   :  { %7614 = vst [vmem:[#allocation108_spill] sm:$0xff] %v6150_v39  ;;  %v1244_v58 = vsub.f32 %v7617_v6, %v6103_v51  ;;  %4486 = vpow2.f32 %v1353_v21  ;;  %1506 = vadd.xlane.f32.xlu1 %v1505_v42  ;;  %v2835_v56 = vmul.f32 1.442695, %v2724_v18  ;;  %v6162_v4 = vmul.f32 %v4722_v34, %v4453_v60  ;;  %v4471_v53 = vpop.eup %4470  ;;  %v6166_v51 = vpop.xlane.xlu0 %2660  ;;  %v7620_v18 = vld [vmem:[#allocation114_spill] sm:$0xff]  ;;  %v7621_v42 = vld [vmem:[#allocation115_spill] sm:$0xff] }
 0x3d7   :  { %7615 = vst [vmem:[#allocation109_spill] sm:$0xff] %v6152_v52  ;;  %v2987_v45 = vadd.f32 %v6152_v52, %v6150_v39  ;;  %4488 = vpow2.f32 %v2833_v20  ;;  %v1355_v2 = vmul.f32 1.442695, %v1243_v11  ;;  %v6164_v16 = vmul.f32 %v4723_v47, %v4455_v32  ;;  %v7624_v11 = vld [vmem:[#allocation116_spill] sm:$0xff] }
 0x3d8   :  { %7618 = vst [vmem:[#allocation110_spill] sm:$0xff] %v6162_v4  ;;  %v1357_v28 = vmul.f32 1.442695, %v1244_v58  ;;  %v4473_v6 = vpop.eup %4472  ;;  %4490 = vpow2.f32 %v2835_v56  ;;  %v2725_v21 = vsub.f32 %v7620_v18, %v6119_v61  ;;  %v2726_v52 = vsub.f32 %v7621_v42, %v6119_v61  ;;  %v4725_v42 = vld [vmem:[#allocation5 + $0x148] sm:$0xff] }
 0x3d9   :  { %7619 = vst [vmem:[#allocation111_spill] sm:$0xff] %v6164_v16  ;;  %2988 = vadd.xlane.f32.xlu0 %v2987_v45  ;;  %v6172_v60 = vmul.f32 %v4722_v34, %v4457_v14  ;;  %v4475_v39 = vpop.eup %4474  ;;  %4492 = vpow2.f32 %v1355_v2  ;;  %v1508_v20 = vadd.f32 %v6164_v16, %v6162_v4  ;;  %v6176_v32 = vmul.f32 %v4723_v47, %v4459_v29  ;;  %v4724_v29 = vld [vmem:[#allocation5 + $0x140] sm:$0xff] }
 0x3da   :  { %v1245_v58 = vsub.f32 %v7624_v11, %v6121_v31  ;;  %v6180_v56 = vpop.eup %4476  ;;  %4494 = vpow2.f32 %v1357_v28  ;;  %v2837_v45 = vmul.f32 1.442695, %v2725_v21  ;;  %v2839_v18 = vmul.f32 1.442695, %v2726_v52  ;;  %v1182_v28 = vpop.xlane.xlu1 %1181 }
 0x3db   :  { %7622 = vst [vmem:[#allocation112_spill] sm:$0xff] %v6172_v60  ;;  %7623 = vst [vmem:[#allocation113_spill] sm:$0xff] %v6176_v32  ;;  %v1246_v61 = vsub.f32 %v7625_v13, %v6121_v31  ;;  %v6184_v14 = vpop.eup %4478  ;;  %1509 = vadd.xlane.f32.xlu1 %v1508_v20  ;;  %v2990_v34 = vadd.f32 %v6176_v32, %v6172_v60  ;;  %v6189_v47 = vmul.f32 %v4724_v29, %v6127_v26  ;;  %v7626_v31 = vld [vmem:[#allocation118_spill] sm:$0xff]  ;;  %v7627_v20 = vld [vmem:[#allocation119_spill] sm:$0xff]  ;;  %v6199_v32 = vpop.xlane.xlu0 %2663 }
 0x3dc   :  { %v1359_v2 = vmul.f32 1.442695, %v1245_v58  ;;  %v6191_v11 = vmul.f32 %v4725_v42, %v4463_v44  ;;  %v6193_v21 = vpop.eup %4480  ;;  %4496 = vpow2.f32 %v2837_v45  ;;  %v2727_v13 = vsub.f32 %v7626_v31, %v6143_v40  ;;  %v7630_v31 = vld [vmem:[#allocation120_spill] sm:$0xff] }
 0x3dd   :  { %v1361_v52 = vmul.f32 1.442695, %v1246_v61  ;;  %v2728_v16 = vsub.f32 %v7627_v20, %v6143_v40  ;;  %v4483_v58 = vpop.eup %4482  ;;  %4498 = vpow2.f32 %v2839_v18  ;;  %2991 = vadd.xlane.f32.xlu0 %v2990_v34  ;;  %v6203_v44 = vmul.f32 %v4724_v29, %v4465_v50  ;;  %v7631_v18 = vld [vmem:[#allocation121_spill] sm:$0xff]  ;;  %v4726_v20 = vld [vmem:[#allocation5 + $0x150] sm:$0xff]  ;;  %v4727_v29 = vld [vmem:[#allocation5 + $0x158] sm:$0xff] }
 0x3de   :  { %v1511_v26 = vadd.f32 %v6191_v11, %v6189_v47  ;;  %v6205_v60 = vmul.f32 %v4725_v42, %v4467_v43  ;;  %4500 = vpow2.f32 %v1359_v2  ;;  %v2841_v45 = vmul.f32 1.442695, %v2727_v13  ;;  %v7632_v42 = vld [vmem:[#allocation122_spill] sm:$0xff] }
 0x3df   :  { %7628 = vst [vmem:[#allocation114_spill] sm:$0xff] %v6203_v44  ;;  %v2843_v61 = vmul.f32 1.442695, %v2728_v16  ;;  %v1247_v4 = vsub.f32 %v7630_v31, %v6158_v3  ;;  %v4485_v38 = vpop.eup %4484  ;;  %4502 = vpow2.f32 %v1361_v52  ;;  %v1248_v34 = vsub.f32 %v7631_v18, %v6158_v3  ;;  %v7633_v31 = vld [vmem:[#allocation123_spill] sm:$0xff] }
 0x3e0   :  { %7629 = vst [vmem:[#allocation115_spill] sm:$0xff] %v6205_v60  ;;  %1512 = vadd.xlane.f32.xlu1 %v1511_v26  ;;  %v2993_v40 = vadd.f32 %v6205_v60, %v6203_v44  ;;  %v6213_v50 = vmul.f32 %v4726_v20, %v4469_v12  ;;  %v4487_v43 = vpop.eup %4486  ;;  %4504 = vpow2.f32 %v2841_v45  ;;  %v6215_v16 = vmul.f32 %v4727_v29, %v4471_v53  ;;  %v1185_v12 = vpop.xlane.xlu1 %1184 }
 0x3e1   :  { %v1363_v2 = vmul.f32 1.442695, %v1247_v4  ;;  %v2729_v13 = vsub.f32 %v7632_v42, %v6166_v51  ;;  %v4489_v52 = vpop.eup %4488  ;;  %4506 = vpow2.f32 %v2843_v61  ;;  %v1365_v26 = vmul.f32 1.442695, %v1248_v34  ;;  %v2667_v44 = vpop.xlane.xlu0 %2666  ;;  %v7635_v34 = vld [vmem:[#allocation124_spill] sm:$0xff] }
 0x3e2   :  { %2994 = vadd.xlane.f32.xlu0 %v2993_v40  ;;  %v2730_v60 = vsub.f32 %v7633_v31, %v6166_v51  ;;  %v6221_v3 = vmul.f32 %v4726_v20, %v4473_v6  ;;  %v4491_v18 = vpop.eup %4490  ;;  %v1514_v4 = vadd.f32 %v6215_v16, %v6213_v50  ;;  %v6225_v45 = vmul.f32 %v4727_v29, %v4475_v39  ;;  %v4729_v39 = vld [vmem:[#allocation5 + $0x168] sm:$0xff] }
 0x3e3   :  { %4508 = vpow2.f32 %v1363_v2  ;;  %v2845_v53 = vmul.f32 1.442695, %v2729_v13  ;;  %v6227_v42 = vpop.eup %4492  ;;  %v1249_v40 = vsub.f32 %v5697_v9, %v1182_v28  ;;  %v1250_v51 = vsub.f32 %v7635_v34, %v1182_v28  ;;  %v4728_v2 = vld [vmem:[#allocation5 + $0x160] sm:$0xff] }
 0x3e4   :  { %7634 = vst [vmem:[#allocation116_spill] sm:$0xff] %v6225_v45  ;;  %4510 = vpow2.f32 %v1365_v26  ;;  %v2847_v61 = vmul.f32 1.442695, %v2730_v60  ;;  %v4495_v6 = vpop.eup %4494  ;;  %1515 = vadd.xlane.f32.xlu1 %v1514_v4  ;;  %v2996_v20 = vadd.f32 %v6225_v45, %v6221_v3  ;;  %v6234_v13 = vmul.f32 %v4728_v2, %v6180_v56  ;;  %v7637_v4 = vld [vmem:[#allocation125_spill] sm:$0xff]  ;;  %v1188_v45 = vpop.xlane.xlu1 %1187 }
 0x3e5   :  { %4512 = vpow2.f32 %v2845_v53  ;;  %v6237_v29 = vmul.f32 %v4729_v39, %v6184_v14  ;;  %v1367_v60 = vmul.f32 1.442695, %v1249_v40  ;;  %v1369_v26 = vmul.f32 1.442695, %v1250_v51  ;;  %v7638_v51 = vld [vmem:[#allocation126_spill] sm:$0xff] }
 0x3e6   :  { %4514 = vpow2.f32 %v2847_v61  ;;  %v2731_v9 = vsub.f32 %v5703_v62, %v6199_v32  ;;  %v4497_v28 = vpop.eup %4496  ;;  %2997 = vadd.xlane.f32.xlu0 %v2996_v20  ;;  %v2732_v53 = vsub.f32 %v7637_v4, %v6199_v32  ;;  %v6246_v56 = vmul.f32 %v4728_v2, %v6193_v21  ;;  %v4730_v4 = vld [vmem:[#allocation5 + $0x170] sm:$0xff] }
 0x3e7   :  { %7636 = vst [vmem:[#allocation117_spill] sm:$0xff] %v6237_v29  ;;  %v1517_v31 = vadd.f32 %v6237_v29, %v6234_v13  ;;  %v6248_v34 = vmul.f32 %v4729_v39, %v4483_v58  ;;  %v4499_v14 = vpop.eup %4498  ;;  %4516 = vpow2.f32 %v1367_v60  ;;  %v1251_v40 = vsub.f32 %v5711_v0, %v1185_v12  ;;  %v2670_v58 = vpop.xlane.xlu0 %2669 }
 0x3e8   :  { %v2849_v61 = vmul.f32 1.442695, %v2731_v9  ;;  %v1252_v62 = vsub.f32 %v7638_v51, %v1185_v12  ;;  %v4501_v20 = vpop.eup %4500  ;;  %4518 = vpow2.f32 %v1369_v26  ;;  %v2851_v29 = vmul.f32 1.442695, %v2732_v53  ;;  %v4731_v9 = vld [vmem:[#allocation5 + $0x178] sm:$0xff] }
 0x3e9   :  { %1518 = vadd.xlane.f32.xlu1 %v1517_v31  ;;  %v2999_v32 = vadd.f32 %v6248_v34, %v6246_v56  ;;  %v6254_v21 = vmul.f32 %v4730_v4, %v4485_v38  ;;  %v4503_v2 = vpop.eup %4502  ;;  %v1371_v39 = vmul.f32 1.442695, %v1251_v40  ;;  %v6256_v0 = vmul.f32 %v4731_v9, %v4487_v43 }
 0x3ea   :  { %4520 = vpow2.f32 %v2849_v61  ;;  %v1373_v60 = vmul.f32 1.442695, %v1252_v62  ;;  %v4505_v12 = vpop.eup %4504  ;;  %v2733_v26 = vsub.f32 %v5715_v15, %v2667_v44  ;;  %v2734_v31 = vsub.f32 %v5719_v30, %v2667_v44 }
 0x3eb   :  { %4522 = vpow2.f32 %v2851_v29  ;;  %3000 = vadd.xlane.f32.xlu0 %v2999_v32  ;;  %v6260_v53 = vmul.f32 %v4730_v4, %v4489_v52  ;;  %v4507_v51 = vpop.eup %4506  ;;  %v1520_v38 = vadd.f32 %v6256_v0, %v6254_v21  ;;  %v6264_v61 = vmul.f32 %v4731_v9, %v4491_v18  ;;  %v4732_v52 = vld [vmem:[#allocation5 + $0x180] sm:$0xff]  ;;  %v4733_v18 = vld [vmem:[#allocation5 + $0x188] sm:$0xff] }
 0x3ec   :  { %4524 = vpow2.f32 %v1371_v39  ;;  %v1253_v40 = vsub.f32 %v5721_v1, %v1188_v45  ;;  %v2853_v62 = vmul.f32 1.442695, %v2733_v26  ;;  %v2855_v29 = vmul.f32 1.442695, %v2734_v31  ;;  %v1191_v1 = vpop.xlane.xlu1 %1190  ;;  %v2673_v26 = vpop.xlane.xlu0 %2672 }
 0x3ed   :  { %7639 = vst [vmem:[#allocation118_spill] sm:$0xff] %v6264_v61  ;;  %v4509_v43 = vpop.eup %4508  ;;  %4526 = vpow2.f32 %v1373_v60  ;;  %v1254_v32 = vsub.f32 %v5723_v8, %v1188_v45  ;;  %1521 = vadd.xlane.f32.xlu1 %v1520_v38  ;;  %v3002_v30 = vadd.f32 %v6264_v61, %v6260_v53  ;;  %v6271_v4 = vmul.f32 %v4732_v52, %v6227_v42 }
 0x3ee   :  { %v4511_v15 = vpop.eup %4510  ;;  %v1375_v44 = vmul.f32 1.442695, %v1253_v40  ;;  %v6273_v39 = vmul.f32 %v4733_v18, %v4495_v6  ;;  %4528 = vpow2.f32 %v2853_v62  ;;  %v2735_v8 = vsub.f32 %v5727_v27, %v2670_v58 }
 0x3ef   :  { %v6275_v9 = vpop.eup %4512  ;;  %v1377_v60 = vmul.f32 1.442695, %v1254_v32  ;;  %v2736_v45 = vsub.f32 %v5729_v25, %v2670_v58  ;;  %4530 = vpow2.f32 %v2855_v29  ;;  %3003 = vadd.xlane.f32.xlu0 %v3002_v30  ;;  %v6281_v38 = vmul.f32 %v4732_v52, %v4497_v28  ;;  %v4734_v58 = vld [vmem:[#allocation5 + $0x190] sm:$0xff]  ;;  %v4735_v30 = vld [vmem:[#allocation5 + $0x198] sm:$0xff] }
 0x3f0   :  { %v4515_v31 = vpop.eup %4514  ;;  %v1523_v42 = vadd.f32 %v6273_v39, %v6271_v4  ;;  %v6283_v6 = vmul.f32 %v4733_v18, %v4499_v14  ;;  %4532 = vpow2.f32 %v1375_v44  ;;  %v2857_v40 = vmul.f32 1.442695, %v2735_v8 }
 0x3f1   :  { %v2859_v61 = vmul.f32 1.442695, %v2736_v45  ;;  %v1255_v62 = vsub.f32 %v5735_v63, %v1191_v1  ;;  %v4517_v32 = vpop.eup %4516  ;;  %4534 = vpow2.f32 %v1377_v60  ;;  %v1256_v25 = vsub.f32 %v5737_v41, %v1191_v1  ;;  %v1194_v41 = vpop.xlane.xlu1 %1193 }
 0x3f2   :  { %7640 = vst [vmem:[#allocation119_spill] sm:$0xff] %v6283_v6  ;;  %1524 = vadd.xlane.f32.xlu1 %v1523_v42  ;;  %v3005_v27 = vadd.f32 %v6283_v6, %v6281_v38  ;;  %v6289_v29 = vmul.f32 %v4734_v58, %v4501_v20  ;;  %v4519_v28 = vpop.eup %4518  ;;  %4536 = vpow2.f32 %v2857_v40  ;;  %v6291_v44 = vmul.f32 %v4735_v30, %v4503_v2  ;;  %v2676_v2 = vpop.xlane.xlu0 %2675 }
 0x3f3   :  { %v1379_v14 = vmul.f32 1.442695, %v1255_v62  ;;  %v2737_v52 = vsub.f32 %v5739_v49, %v2673_v26  ;;  %4538 = vpow2.f32 %v2859_v61  ;;  %v1381_v18 = vmul.f32 1.442695, %v1256_v25  ;;  %v4736_v61 = vld [vmem:[#allocation5 + $0x1a0] sm:$0xff] }
 0x3f4   :  { %v4521_v63 = vpop.eup %4520  ;;  %3006 = vadd.xlane.f32.xlu0 %v3005_v27  ;;  %v2738_v60 = vsub.f32 %v5741_v10, %v2673_v26  ;;  %v6295_v8 = vmul.f32 %v4734_v58, %v4505_v12  ;;  %v1526_v20 = vadd.f32 %v6291_v44, %v6289_v29  ;;  %v6299_v42 = vmul.f32 %v4735_v30, %v4507_v51  ;;  %v4737_v27 = vld [vmem:[#allocation5 + $0x1a8] sm:$0xff] }
 0x3f5   :  { %v4523_v1 = vpop.eup %4522  ;;  %4540 = vpow2.f32 %v1379_v14  ;;  %v2861_v45 = vmul.f32 1.442695, %v2737_v52  ;;  %v6301_v62 = vmul.f32 %v4736_v61, %v4509_v43  ;;  %v6303_v10 = vmul.f32 %v4737_v27, %v4511_v15 }
 0x3f6   :  { %7641 = vst [vmem:[#allocation120_spill] sm:$0xff] %v6299_v42  ;;  %v4525_v40 = vpop.eup %4524  ;;  %4542 = vpow2.f32 %v1381_v18  ;;  %v2863_v49 = vmul.f32 1.442695, %v2738_v60  ;;  %1527 = vadd.xlane.f32.xlu1 %v1526_v20  ;;  %v3008_v26 = vadd.f32 %v6299_v42, %v6295_v8  ;;  %v1257_v25 = vsub.f32 %v5745_v24, %v1194_v41 }
 0x3f7   :  { %v4527_v12 = vpop.eup %4526  ;;  %4544 = vpow2.f32 %v2861_v45  ;;  %v1258_v51 = vsub.f32 %v5747_v59, %v1194_v41  ;;  %v1529_v58 = vadd.f32 %v6303_v10, %v6301_v62  ;;  %v2739_v43 = vsub.f32 %v5751_v5, %v2676_v2  ;;  %v4738_v41 = vld [vmem:[#allocation5 + $0x1b0] sm:$0xff] }
 0x3f8   :  { %4546 = vpow2.f32 %v2863_v49  ;;  %v2740_v14 = vsub.f32 %v5753_v36, %v2676_v2  ;;  %v4529_v15 = vpop.eup %4528  ;;  %3009 = vadd.xlane.f32.xlu0 %v3008_v26  ;;  %v1383_v30 = vmul.f32 1.442695, %v1257_v25  ;;  %v6314_v18 = vmul.f32 %v4736_v61, %v6275_v9  ;;  %v4739_v49 = vld [vmem:[#allocation5 + $0x1b8] sm:$0xff] }
 0x3f9   :  { %v1385_v52 = vmul.f32 1.442695, %v1258_v51  ;;  %v6316_v60 = vmul.f32 %v4737_v27, %v4515_v31  ;;  %v4531_v24 = vpop.eup %4530  ;;  %v2865_v20 = vmul.f32 1.442695, %v2739_v43  ;;  %v6318_v45 = vmul.f32 %v4738_v41, %v4517_v32  ;;  %v4740_v32 = vld [vmem:[#allocation5 + $0x1c0] sm:$0xff] }
 0x3fa   :  { %v2867_v59 = vmul.f32 1.442695, %v2740_v14  ;;  %v6320_v42 = vmul.f32 %v4739_v49, %v4519_v28  ;;  %v4533_v5 = vpop.eup %4532  ;;  %1530 = vadd.xlane.f32.xlu1 %v1529_v58  ;;  %4548 = vpow2.f32 %v1383_v30  ;;  %v6324_v2 = vmul.f32 %v4738_v41, %v4521_v63  ;;  %v4741_v28 = vld [vmem:[#allocation5 + $0x1c8] sm:$0xff]  ;;  %v4742_v14 = vld [vmem:[#allocation5 + $0x1d0] sm:$0xff]  ;;  %v4743_v30 = vld [vmem:[#allocation5 + $0x1d8] sm:$0xff] }
 0x3fb   :  { %7642 = vst [vmem:[#allocation121_spill] sm:$0xff] %v6316_v60  ;;  %v3011_v36 = vadd.f32 %v6316_v60, %v6314_v18  ;;  %v6326_v9 = vmul.f32 %v4739_v49, %v4523_v1  ;;  %v4535_v31 = vpop.eup %4534  ;;  %4550 = vpow2.f32 %v1385_v52  ;;  %v6330_v27 = vmul.f32 %v4740_v32, %v4525_v40 }
 0x3fc   :  { %7643 = vst [vmem:[#allocation122_spill] sm:$0xff] %v6320_v42  ;;  %7644 = vst [vmem:[#allocation123_spill] sm:$0xff] %v6324_v2  ;;  %v1532_v61 = vadd.f32 %v6320_v42, %v6318_v45  ;;  %v6332_v26 = vmul.f32 %v4741_v28, %v4527_v12  ;;  %v4537_v25 = vpop.eup %4536  ;;  %4552 = vpow2.f32 %v2865_v20  ;;  %v6336_v51 = vmul.f32 %v4740_v32, %v4529_v15 }
 0x3fd   :  { %7645 = vst [vmem:[#allocation124_spill] sm:$0xff] %v6326_v9  ;;  %7646 = vst [vmem:[#allocation125_spill] sm:$0xff] %v6330_v27  ;;  %3012 = vadd.xlane.f32.xlu0 %v3011_v36  ;;  %v3014_v63 = vadd.f32 %v6326_v9, %v6324_v2  ;;  %v6338_v1 = vmul.f32 %v4741_v28, %v4531_v24  ;;  %v4539_v58 = vpop.eup %4538  ;;  %4554 = vpow2.f32 %v2867_v59 }
 0x3fe   :  { %7647 = vst [vmem:[#allocation126_spill] sm:$0xff] %v6332_v26  ;;  %7648 = vst [vmem:[#allocation127_spill] sm:$0xff] %v6336_v51  ;;  %1533 = vadd.xlane.f32.xlu1 %v1532_v61  ;;  %v1535_v40 = vadd.f32 %v6332_v26, %v6330_v27  ;;  %v6342_v12 = vmul.f32 %v4742_v14, %v4533_v5  ;;  %v6344_v52 = vmul.f32 %v4743_v30, %v4535_v31  ;;  %v4744_v5 = vld [vmem:[#allocation5 + $0x1e0] sm:$0xff]  ;;  %v4745_v31 = vld [vmem:[#allocation5 + $0x1e8] sm:$0xff] }
 0x3ff   :  { %7649 = vst [vmem:[#allocation128_spill] sm:$0xff] %v6338_v1  ;;  %v4541_v43 = vpop.eup %4540  ;;  %v3017_v15 = vadd.f32 %v6338_v1, %v6336_v51  ;;  %v6348_v24 = vmul.f32 %v4742_v14, %v4537_v25  ;;  %v6350_v59 = vmul.f32 %v4743_v30, %v4539_v58 }
 0x400   :  { %7650 = vst [vmem:[#allocation129_spill] sm:$0xff] %v6342_v12  ;;  %7651 = vst [vmem:[#allocation130_spill] sm:$0xff] %v6344_v52  ;;  %v4543_v20 = vpop.eup %4542  ;;  %v1538_v36 = vadd.f32 %v6344_v52, %v6342_v12  ;;  %v6354_v61 = vmul.f32 %v4744_v5, %v4541_v43  ;;  %v4746_v43 = vld [vmem:[#allocation5 + $0x1f0] sm:$0xff] }
 0x401   :  { %v4545_v41 = vpop.eup %4544  ;;  %3015 = vadd.xlane.f32.xlu0 %v3014_v63  ;;  %7652 = vst [vmem:[#allocation131_spill] sm:$0xff] %v6348_v24  ;;  %7653 = vst [vmem:[#allocation132_spill] sm:$0xff] %v6350_v59  ;;  %v6356_v32 = vmul.f32 %v4745_v31, %v4543_v20  ;;  %v3020_v63 = vadd.f32 %v6350_v59, %v6348_v24  ;;  %v4747_v20 = vld [vmem:[#allocation5 + $0x1f8] sm:$0xff] }
 0x402   :  { %v4547_v49 = vpop.eup %4546  ;;  %1536 = vadd.xlane.f32.xlu1 %v1535_v40  ;;  %7654 = vst [vmem:[#allocation133_spill] sm:$0xff] %v6354_v61  ;;  %v6360_v25 = vmul.f32 %v4744_v5, %v4545_v41 }
 0x403   :  { %7655 = vst [vmem:[#allocation134_spill] sm:$0xff] %v6356_v32  ;;  %v6362_v58 = vmul.f32 %v4745_v31, %v4547_v49  ;;  %v1541_v30 = vadd.f32 %v6356_v32, %v6354_v61 }
 0x404   :  { %v4549_v28 = vpop.eup %4548  ;;  %7656 = vst [vmem:[#allocation135_spill] sm:$0xff] %v6360_v25 }
 0x405   :  { %3018 = vadd.xlane.f32.xlu0 %v3017_v15  ;;  %7657 = vst [vmem:[#allocation136_spill] sm:$0xff] %v6362_v58  ;;  %v4551_v14 = vpop.eup %4550  ;;  %v6366_v1 = vmul.f32 %v4746_v43, %v4549_v28  ;;  %v3023_v41 = vadd.f32 %v6362_v58, %v6360_v25 }
 0x406   :  { %v4553_v40 = vpop.eup %4552  ;;  %1539 = vadd.xlane.f32.xlu1 %v1538_v36  ;;  %v6368_v9 = vmul.f32 %v4747_v20, %v4551_v14 }
 0x407   :  { %7658 = vst [vmem:[#allocation137_spill] sm:$0xff] %v6366_v1  ;;  %v4555_v15 = vpop.eup %4554  ;;  %v6372_v5 = vmul.f32 %v4746_v43, %v4553_v40 }
 0x408   :  { %7659 = vst [vmem:[#allocation138_spill] sm:$0xff] %v6368_v9  ;;  %v6374_v49 = vmul.f32 %v4747_v20, %v4555_v15  ;;  %v1544_v36 = vadd.f32 %v6368_v9, %v6366_v1 }
 0x409   :  { %3021 = vadd.xlane.f32.xlu0 %v3020_v63  ;;  %7660 = vst [vmem:[#allocation139_spill] sm:$0xff] %v6372_v5 }
 0x40a   :  { %7661 = vst [vmem:[#allocation140_spill] sm:$0xff] %v6374_v49  ;;  %1542 = vadd.xlane.f32.xlu1 %v1541_v30  ;;  %v3026_v31 = vadd.f32 %v6374_v49, %v6372_v5 }
 0x40b   :  { %v1453_v28 = vpop.xlane.xlu1 %1452 }
 0x40c   :  { %vm1547_vm3 = vcmp.gt.f32.partialorder %v1453_v28, 0.0 }
 0x40d   :  { %3024 = vadd.xlane.f32.xlu0 %v3023_v41  ;;  %v1579_v5 = vsel %vm1547_vm3, %v1453_v28, 1.0 }
 0x40e   :  { %1545 = vadd.xlane.f32.xlu1 %v1544_v36  ;;  %v1456_v14 = vpop.xlane.xlu0 %1455 }
 0x40f   :  { %vm1548_vm2 = vcmp.gt.f32.partialorder %v1456_v14, 0.0 }
 0x410   :  { %v1580_v36 = vsel %vm1548_vm2, %v1456_v14, 1.0 }
 0x411   :  { %3027 = vadd.xlane.f32.xlu0 %v3026_v31  ;;  %v2935_v63 = vpop.xlane.xlu1 %2934  ;;  %4556 = vrcp.f32 %v1580_v36 }
 0x412   :  { %vm3029_vm5 = vcmp.gt.f32.partialorder %v2935_v63, 0.0  ;;  %4558 = vrcp.f32 %v1579_v5 }
 0x413   :  { %v3061_v60 = vsel %vm3029_vm5, %v2935_v63, 1.0 }
 0x414   :  { %v2938_v59 = vpop.xlane.xlu0 %2937 }
 0x415   :  { %vm3030_vm4 = vcmp.gt.f32.partialorder %v2938_v59, 0.0 }
 0x416   :  { %v3062_v24 = vsel %vm3030_vm4, %v2938_v59, 1.0 }
 0x417   :  { %v1459_v32 = vpop.xlane.xlu1 %1458  ;;  %4560 = vrcp.f32 %v3062_v24 }
 0x418   :  { %vm1549_vm6 = vcmp.gt.f32.partialorder %v1459_v32, 0.0  ;;  %4562 = vrcp.f32 %v3061_v60 }
 0x419   :  { %v1581_v52 = vsel %vm1549_vm6, %v1459_v32, 1.0 }
 0x41a   :  { %v2941_v58 = vpop.xlane.xlu0 %2940  ;;  %4564 = vrcp.f32 %v1581_v52 }
 0x41b   :  { %vm3031_vm7 = vcmp.gt.f32.partialorder %v2941_v58, 0.0  ;;  %v4557_v63 = vpop.eup %4556 }
 0x41c   :  { %v3063_v14 = vsel %vm3031_vm7, %v2941_v58, 1.0  ;;  %v4559_v52 = vpop.eup %4558  ;;  %v1645_v36 = vmul.f32 %v4557_v63, %v5783_v23 }
 0x41d   :  { %4566 = vrcp.f32 %v3063_v14 }
 0x41e   :  { %v1462_v40 = vpop.xlane.xlu1 %1461 }
 0x41f   :  { %v2944_v43 = vpop.xlane.xlu0 %2943  ;;  %vm1550_vm8 = vcmp.gt.f32.partialorder %v1462_v40, 0.0 }
 0x420   :  { %vm3032_vm9 = vcmp.gt.f32.partialorder %v2944_v43, 0.0  ;;  %v1582_v28 = vsel %vm1550_vm8, %v1462_v40, 1.0 }
 0x421   :  { %v3064_v59 = vsel %vm3032_vm9, %v2944_v43, 1.0  ;;  %4568 = vrcp.f32 %v1582_v28  ;;  %v4561_v40 = vpop.eup %4560 }
 0x422   :  { %4570 = vrcp.f32 %v3064_v59  ;;  %v4563_v14 = vpop.eup %4562  ;;  %v1643_v59 = vmul.f32 %v4559_v52, %v5775_v55  ;;  %v3127_v2 = vmul.f32 %v4561_v40, %v5799_v7  ;;  %v3128_v42 = vmul.f32 %v4561_v40, %v5807_v54 }
 0x423   :  { %v1465_v20 = vpop.xlane.xlu1 %1464  ;;  %v3125_v6 = vmul.f32 %v4563_v14, %v5795_v33  ;;  %v3126_v7 = vmul.f32 %v4563_v14, %v5797_v17 }
 0x424   :  { %v2947_v15 = vpop.xlane.xlu0 %2946  ;;  %vm1551_vm10 = vcmp.gt.f32.partialorder %v1465_v20, 0.0  ;;  %v4565_v28 = vpop.eup %4564 }
 0x425   :  { %vm3033_vm11 = vcmp.gt.f32.partialorder %v2947_v15, 0.0  ;;  %v1583_v5 = vsel %vm1551_vm10, %v1465_v20, 1.0  ;;  %v3189_v54 = vadd.f32 %v3127_v2, %v3125_v6 }
 0x426   :  { %v3065_v60 = vsel %vm3033_vm11, %v2947_v15, 1.0  ;;  %4572 = vrcp.f32 %v1583_v5  ;;  %v1646_v15 = vmul.f32 %v4557_v63, %v5787_v19  ;;  %v1648_v63 = vmul.f32 %v4565_v28, %v5817_v35 }
 0x427   :  { %v1468_v30 = vpop.xlane.xlu1 %1467  ;;  %4574 = vrcp.f32 %v3065_v60  ;;  %v1707_v60 = vadd.f32 %v1645_v36, %v1643_v59  ;;  %v7663_v59 = vld [vmem:[#allocation48_spill] sm:$0xff] }
 0x428   :  { %vm1552_vm12 = vcmp.gt.f32.partialorder %v1468_v30, 0.0 }
 0x429   :  { %v2950_v25 = vpop.xlane.xlu0 %2949  ;;  %v1584_v58 = vsel %vm1552_vm12, %v1468_v30, 1.0  ;;  %v1644_v30 = vmul.f32 %v4559_v52, %v5781_v46 }
 0x42a   :  { %vm3034_vm13 = vcmp.gt.f32.partialorder %v2950_v25, 0.0  ;;  %4576 = vrcp.f32 %v1584_v58  ;;  %v3226_v58 = vadd.f32 %v3128_v42, %v3126_v7 }
 0x42b   :  { %v1471_v61 = vpop.xlane.xlu1 %1470  ;;  %v3066_v43 = vsel %vm3034_vm13, %v2950_v25, 1.0  ;;  %v4567_v25 = vpop.eup %4566  ;;  %v1744_v46 = vadd.f32 %v1646_v15, %v1644_v30 }
 0x42c   :  { %vm1553_vm14 = vcmp.gt.f32.partialorder %v1471_v61, 0.0  ;;  %4578 = vrcp.f32 %v3066_v43  ;;  %v4569_v19 = vpop.eup %4568  ;;  %v3130_v40 = vmul.f32 %v4567_v25, %v5823_v57 }
 0x42d   :  { %v1585_v5 = vsel %vm1553_vm14, %v1471_v61, 1.0  ;;  %v1647_v61 = vmul.f32 %v4565_v28, %v5811_v37  ;;  %v4571_v33 = vpop.eup %4570  ;;  %v1649_v36 = vmul.f32 %v4569_v19, %v5831_v22  ;;  %v1745_v14 = vadd.f32 %v1744_v46, %v1648_v63  ;;  %v7662_v28 = vld [vmem:[#allocation47_spill] sm:$0xff]  ;;  %v7664_v22 = vld [vmem:[#allocation49_spill] sm:$0xff]  ;;  %v7667_v46 = vld [vmem:[#allocation52_spill] sm:$0xff] }
 0x42e   :  { %v2953_v9 = vpop.xlane.xlu0 %2952  ;;  %4580 = vrcp.f32 %v1585_v5  ;;  %v1650_v6 = vmul.f32 %v4569_v19, %v7662_v28  ;;  %v3131_v15 = vmul.f32 %v4571_v33, %v7663_v59  ;;  %v3132_v5 = vmul.f32 %v4571_v33, %v7664_v22  ;;  %v7666_v19 = vld [vmem:[#allocation51_spill] sm:$0xff] }
 0x42f   :  { %vm3035_vm15 = vcmp.gt.f32.partialorder %v2953_v9, 0.0  ;;  %v1708_v43 = vadd.f32 %v1707_v60, %v1647_v61  ;;  %v7670_v28 = vld [vmem:[#allocation55_spill] sm:$0xff] }
 0x430   :  { %v6380_v41 = vpop.xlane.xlu1 %1473  ;;  %v3067_v23 = vsel %vm3035_vm15, %v2953_v9, 1.0  ;;  %v3129_v9 = vmul.f32 %v4567_v25, %v5819_v48  ;;  %v4573_v35 = vpop.eup %4572 }
 0x431   :  { %vm1554_vm2 = vcmp.gt.f32.partialorder %v6380_v41, 0.0  ;;  %4582 = vrcp.f32 %v3067_v23  ;;  %v1709_v60 = vadd.f32 %v1708_v43, %v1649_v36  ;;  %v1652_v61 = vmul.f32 %v4573_v35, %v7666_v19  ;;  %v7669_v36 = vld [vmem:[#allocation54_spill] sm:$0xff] }
 0x432   :  { %v6382_v49 = vpop.xlane.xlu0 %2955  ;;  %v1586_v52 = vsel %vm1554_vm2, %v6380_v41, 1.0  ;;  %v4575_v41 = vpop.eup %4574  ;;  %v3190_v57 = vadd.f32 %v3189_v54, %v3129_v9  ;;  %v1746_v54 = vadd.f32 %v1745_v14, %v1650_v6 }
 0x433   :  { %vm3036_vm3 = vcmp.gt.f32.partialorder %v6382_v49, 0.0  ;;  %4584 = vrcp.f32 %v1586_v52  ;;  %v3133_v7 = vmul.f32 %v4575_v41, %v7667_v46  ;;  %v7668_v52 = vld [vmem:[#allocation53_spill] sm:$0xff] }
 0x434   :  { %v3068_v17 = vsel %vm3036_vm3, %v6382_v49, 1.0  ;;  %v7665_v49 = vld [vmem:[#allocation50_spill] sm:$0xff]  ;;  %v4577_v25 = vpop.eup %4576  ;;  %v3191_v9 = vadd.f32 %v3190_v57, %v3131_v15  ;;  %v1747_v6 = vadd.f32 %v1746_v54, %v1652_v61  ;;  %v7672_v15 = vld [vmem:[#allocation57_spill] sm:$0xff] }
 0x435   :  { %v6384_v31 = vpop.xlane.xlu1 %1476  ;;  %v1651_v30 = vmul.f32 %v4573_v35, %v7665_v49  ;;  %4586 = vrcp.f32 %v3068_v17  ;;  %v3134_v17 = vmul.f32 %v4575_v41, %v7668_v52  ;;  %v1653_v43 = vmul.f32 %v4577_v25, %v7669_v36 }
 0x436   :  { %vm1555_vm4 = vcmp.gt.f32.partialorder %v6384_v31, 0.0  ;;  %v4579_v63 = vpop.eup %4578  ;;  %v3192_v41 = vadd.f32 %v3191_v9, %v3133_v7 }
 0x437   :  { %v6386_v1 = vpop.xlane.xlu0 %2958  ;;  %v1587_v48 = vsel %vm1555_vm4, %v6384_v31, 1.0  ;;  %v3227_v31 = vadd.f32 %v3226_v58, %v3130_v40  ;;  %v1710_v35 = vadd.f32 %v1709_v60, %v1651_v30  ;;  %v3136_v57 = vmul.f32 %v4579_v63, %v7672_v15  ;;  %v7673_v30 = vld [vmem:[#allocation58_spill] sm:$0xff] }
 0x438   :  { %vm3037_vm5 = vcmp.gt.f32.partialorder %v6386_v1, 0.0  ;;  %4588 = vrcp.f32 %v1587_v48  ;;  %v4581_v58 = vpop.eup %4580  ;;  %v1654_v48 = vmul.f32 %v4577_v25, %v7670_v28  ;;  %v7674_v25 = vld [vmem:[#allocation59_spill] sm:$0xff] }
 0x439   :  { %v6388_v12 = vpop.xlane.xlu1 %1479  ;;  %v3069_v42 = vsel %vm3037_vm5, %v6386_v1, 1.0  ;;  %v3228_v40 = vadd.f32 %v3227_v31, %v3132_v5  ;;  %v1655_v31 = vmul.f32 %v4581_v58, %v7673_v30  ;;  %v1656_v60 = vmul.f32 %v4581_v58, %v7674_v25 }
 0x43a   :  { %vm1556_vm6 = vcmp.gt.f32.partialorder %v6388_v12, 0.0  ;;  %4590 = vrcp.f32 %v3069_v42  ;;  %v7671_v42 = vld [vmem:[#allocation56_spill] sm:$0xff]  ;;  %v1748_v7 = vadd.f32 %v1747_v6, %v1654_v48  ;;  %v7678_v6 = vld [vmem:[#allocation63_spill] sm:$0xff] }
 0x43b   :  { %v1588_v1 = vsel %vm1556_vm6, %v6388_v12, 1.0  ;;  %v4583_v59 = vpop.eup %4582  ;;  %v3135_v12 = vmul.f32 %v4579_v63, %v7671_v42  ;;  %v3229_v49 = vadd.f32 %v3228_v40, %v3134_v17  ;;  %v1711_v63 = vadd.f32 %v1710_v35, %v1653_v43  ;;  %v7676_v17 = vld [vmem:[#allocation61_spill] sm:$0xff] }
 0x43c   :  { %v6390_v51 = vpop.xlane.xlu0 %2961  ;;  %4592 = vrcp.f32 %v1588_v1  ;;  %v3138_v58 = vmul.f32 %v4583_v59, %v7676_v17 }
 0x43d   :  { %vm3038_vm7 = vcmp.gt.f32.partialorder %v6390_v51, 0.0  ;;  %v4585_v61 = vpop.eup %4584  ;;  %v3230_v52 = vadd.f32 %v3229_v49, %v3136_v57  ;;  %v1712_v28 = vadd.f32 %v1711_v63, %v1655_v31  ;;  %v7681_v49 = vld [vmem:[#allocation66_spill] sm:$0xff] }
 0x43e   :  { %v6392_v26 = vpop.xlane.xlu1 %1482  ;;  %v3070_v22 = vsel %vm3038_vm7, %v6390_v51, 1.0  ;;  %v7675_v51 = vld [vmem:[#allocation60_spill] sm:$0xff] }
 0x43f   :  { %vm1557_vm8 = vcmp.gt.f32.partialorder %v6392_v26, 0.0  ;;  %v3137_v46 = vmul.f32 %v4583_v59, %v7675_v51  ;;  %4594 = vrcp.f32 %v3070_v22  ;;  %v4587_v9 = vpop.eup %4586  ;;  %v1658_v59 = vmul.f32 %v4585_v61, %v7678_v6  ;;  %v7686_v6 = vld [vmem:[#allocation71_spill] sm:$0xff] }
 0x440   :  { %v6394_v32 = vpop.xlane.xlu0 %2964  ;;  %v1589_v5 = vsel %vm1557_vm8, %v6392_v26, 1.0  ;;  %v3193_v26 = vadd.f32 %v3192_v41, %v3135_v12  ;;  %v7677_v12 = vld [vmem:[#allocation62_spill] sm:$0xff]  ;;  %v3231_v57 = vadd.f32 %v3230_v52, %v3138_v58 }
 0x441   :  { %vm3039_vm9 = vcmp.gt.f32.partialorder %v6394_v32, 0.0  ;;  %4596 = vrcp.f32 %v1589_v5  ;;  %v1657_v22 = vmul.f32 %v4585_v61, %v7677_v12  ;;  %v7680_v5 = vld [vmem:[#allocation65_spill] sm:$0xff] }
 0x442   :  { %v3071_v1 = vsel %vm3039_vm9, %v6394_v32, 1.0  ;;  %v4589_v36 = vpop.eup %4588  ;;  %v1749_v32 = vadd.f32 %v1748_v7, %v1656_v60  ;;  %v3194_v42 = vadd.f32 %v3193_v26, %v3137_v46  ;;  %v7682_v60 = vld [vmem:[#allocation67_spill] sm:$0xff]  ;;  %v7683_v46 = vld [vmem:[#allocation68_spill] sm:$0xff] }
 0x443   :  { %v6396_v24 = vpop.xlane.xlu1 %1485  ;;  %4598 = vrcp.f32 %v3071_v1  ;;  %v1659_v30 = vmul.f32 %v4589_v36, %v7681_v49  ;;  %v1660_v51 = vmul.f32 %v4589_v36, %v7682_v60  ;;  %v7685_v36 = vld [vmem:[#allocation70_spill] sm:$0xff] }
 0x444   :  { %vm1558_vm10 = vcmp.gt.f32.partialorder %v6396_v24, 0.0  ;;  %v4591_v48 = vpop.eup %4590  ;;  %v1750_v52 = vadd.f32 %v1749_v32, %v1658_v59 }
 0x445   :  { %v6399_v20 = vpop.xlane.xlu0 %2967  ;;  %v1590_v40 = vsel %vm1558_vm10, %v6396_v24, 1.0  ;;  %v7679_v24 = vld [vmem:[#allocation64_spill] sm:$0xff]  ;;  %v3141_v1 = vmul.f32 %v4591_v48, %v7683_v46 }
 0x446   :  { %vm3040_vm11 = vcmp.gt.f32.partialorder %v6399_v20, 0.0  ;;  %v3139_v41 = vmul.f32 %v4587_v9, %v7679_v24  ;;  %4600 = vrcp.f32 %v1590_v40  ;;  %v4593_v25 = vpop.eup %4592  ;;  %v1751_v32 = vadd.f32 %v1750_v52, %v1660_v51  ;;  %v7690_v51 = vld [vmem:[#allocation75_spill] sm:$0xff] }
 0x447   :  { %v6403_v27 = vpop.xlane.xlu1 %1488  ;;  %v3072_v35 = vsel %vm3040_vm11, %v6399_v20, 1.0  ;;  %v3140_v20 = vmul.f32 %v4587_v9, %v7680_v5  ;;  %v1713_v9 = vadd.f32 %v1712_v28, %v1657_v22  ;;  %v1662_v24 = vmul.f32 %v4593_v25, %v7686_v6  ;;  %v7694_v6 = vld [vmem:[#allocation79_spill] sm:$0xff] }
 0x448   :  { %vm1559_vm12 = vcmp.gt.f32.partialorder %v6403_v27, 0.0  ;;  %4602 = vrcp.f32 %v3072_v35  ;;  %v3195_v17 = vadd.f32 %v3194_v42, %v3139_v41  ;;  %v1661_v35 = vmul.f32 %v4593_v25, %v7685_v36 }
 0x449   :  { %v1591_v15 = vsel %vm1559_vm12, %v6403_v27, 1.0  ;;  %v7684_v27 = vld [vmem:[#allocation69_spill] sm:$0xff]  ;;  %v4595_v58 = vpop.eup %4594  ;;  %v3232_v40 = vadd.f32 %v3231_v57, %v3140_v20  ;;  %v1714_v28 = vadd.f32 %v1713_v9, %v1659_v30  ;;  %v7689_v20 = vld [vmem:[#allocation74_spill] sm:$0xff]  ;;  %v1752_v60 = vadd.f32 %v1751_v32, %v1662_v24 }
 0x44a   :  { %v6410_v55 = vpop.xlane.xlu0 %2970  ;;  %v3142_v63 = vmul.f32 %v4591_v48, %v7684_v27  ;;  %4604 = vrcp.f32 %v1591_v15  ;;  %v3196_v42 = vadd.f32 %v3195_v17, %v3141_v1  ;;  %v7687_v15 = vld [vmem:[#allocation72_spill] sm:$0xff] }
 0x44b   :  { %vm3041_vm13 = vcmp.gt.f32.partialorder %v6410_v55, 0.0  ;;  %v4597_v48 = vpop.eup %4596  ;;  %v3143_v57 = vmul.f32 %v4595_v58, %v7687_v15  ;;  %v1715_v25 = vadd.f32 %v1714_v28, %v1661_v35  ;;  %v7691_v27 = vld [vmem:[#allocation76_spill] sm:$0xff] }
 0x44c   :  { %v6420_v37 = vpop.xlane.xlu1 %1491  ;;  %v3073_v61 = vsel %vm3041_vm13, %v6410_v55, 1.0  ;;  %v3233_v22 = vadd.f32 %v3232_v40, %v3142_v63  ;;  %v1663_v49 = vmul.f32 %v4597_v48, %v7689_v20  ;;  %v1664_v46 = vmul.f32 %v4597_v48, %v7690_v51  ;;  %v7697_v20 = vld [vmem:[#allocation82_spill] sm:$0xff] }
 0x44d   :  { %vm1560_vm14 = vcmp.gt.f32.partialorder %v6420_v37, 0.0  ;;  %4606 = vrcp.f32 %v3073_v61  ;;  %v4599_v41 = vpop.eup %4598 }
 0x44e   :  { %v6427_v2 = vpop.xlane.xlu0 %2973  ;;  %v1592_v7 = vsel %vm1560_vm14, %v6420_v37, 1.0  ;;  %v3145_v63 = vmul.f32 %v4599_v41, %v7691_v27  ;;  %v1716_v35 = vadd.f32 %v1715_v25, %v1663_v49  ;;  %v7699_v27 = vld [vmem:[#allocation84_spill] sm:$0xff] }
 0x44f   :  { %vm3042_vm15 = vcmp.gt.f32.partialorder %v6427_v2, 0.0  ;;  %4608 = vrcp.f32 %v1592_v7  ;;  %v7692_v7 = vld [vmem:[#allocation77_spill] sm:$0xff] }
 0x450   :  { %v3074_v55 = vsel %vm3042_vm15, %v6427_v2, 1.0  ;;  %v7688_v2 = vld [vmem:[#allocation73_spill] sm:$0xff]  ;;  %v4601_v30 = vpop.eup %4600  ;;  %v3146_v9 = vmul.f32 %v4599_v41, %v7692_v7 }
 0x451   :  { %v6434_v23 = vpop.xlane.xlu1 %1494  ;;  %v3144_v5 = vmul.f32 %v4595_v58, %v7688_v2  ;;  %4610 = vrcp.f32 %v3074_v55  ;;  %v7693_v55 = vld [vmem:[#allocation78_spill] sm:$0xff]  ;;  %v1666_v24 = vmul.f32 %v4601_v30, %v7694_v6  ;;  %v7696_v2 = vld [vmem:[#allocation81_spill] sm:$0xff] }
 0x452   :  { %vm1561_vm2 = vcmp.gt.f32.partialorder %v6434_v23, 0.0  ;;  %v4603_v61 = vpop.eup %4602  ;;  %v1665_v48 = vmul.f32 %v4601_v30, %v7693_v55  ;;  %v7700_v7 = vld [vmem:[#allocation85_spill] sm:$0xff] }
 0x453   :  { %v6440_v33 = vpop.xlane.xlu0 %2976  ;;  %v1593_v37 = vsel %vm1561_vm2, %v6434_v23, 1.0  ;;  %v3234_v17 = vadd.f32 %v3233_v22, %v3144_v5  ;;  %v1753_v22 = vadd.f32 %v1752_v60, %v1664_v46  ;;  %v3148_v5 = vmul.f32 %v4603_v61, %v7696_v2 }
 0x454   :  { %vm3043_vm3 = vcmp.gt.f32.partialorder %v6440_v33, 0.0  ;;  %4612 = vrcp.f32 %v1593_v37  ;;  %v4605_v36 = vpop.eup %4604  ;;  %v1717_v60 = vadd.f32 %v1716_v35, %v1665_v48  ;;  %v7702_v48 = vld [vmem:[#allocation87_spill] sm:$0xff] }
 0x455   :  { %v6449_v14 = vpop.xlane.xlu1 %1497  ;;  %v3075_v23 = vsel %vm3043_vm3, %v6440_v33, 1.0  ;;  %v3197_v33 = vadd.f32 %v3196_v42, %v3143_v57  ;;  %v3235_v15 = vadd.f32 %v3234_v17, %v3146_v9  ;;  %v1667_v49 = vmul.f32 %v4605_v36, %v7697_v20 }
 0x456   :  { %vm1562_vm4 = vcmp.gt.f32.partialorder %v6449_v14, 0.0  ;;  %4614 = vrcp.f32 %v3075_v23  ;;  %v1754_v51 = vadd.f32 %v1753_v22, %v1666_v24  ;;  %v7705_v22 = vld [vmem:[#allocation90_spill] sm:$0xff] }
 0x457   :  { %v1594_v52 = vsel %vm1562_vm4, %v6449_v14, 1.0  ;;  %v7695_v14 = vld [vmem:[#allocation80_spill] sm:$0xff]  ;;  %v4607_v42 = vpop.eup %4606  ;;  %v3198_v41 = vadd.f32 %v3197_v33, %v3145_v63 }
 0x458   :  { %v6456_v19 = vpop.xlane.xlu0 %2979  ;;  %v3147_v28 = vmul.f32 %v4603_v61, %v7695_v14  ;;  %4616 = vrcp.f32 %v1594_v52  ;;  %v3149_v63 = vmul.f32 %v4607_v42, %v7699_v27  ;;  %v3150_v9 = vmul.f32 %v4607_v42, %v7700_v7  ;;  %v7701_v52 = vld [vmem:[#allocation86_spill] sm:$0xff]  ;;  %v7708_v7 = vld [vmem:[#allocation93_spill] sm:$0xff] }
 0x459   :  { %vm3044_vm5 = vcmp.gt.f32.partialorder %v6456_v19, 0.0  ;;  %v4609_v57 = vpop.eup %4608 }
 0x45a   :  { %v6461_v54 = vpop.xlane.xlu1 %1500  ;;  %v3076_v58 = vsel %vm3044_vm5, %v6456_v19, 1.0  ;;  %v3199_v46 = vadd.f32 %v3198_v41, %v3147_v28  ;;  %v1669_v33 = vmul.f32 %v4609_v57, %v7701_v52  ;;  %v1670_v6 = vmul.f32 %v4609_v57, %v7702_v48  ;;  %v7703_v28 = vld [vmem:[#allocation88_spill] sm:$0xff]  ;;  %v7709_v52 = vld [vmem:[#allocation94_spill] sm:$0xff] }
 0x45b   :  { %vm1563_vm6 = vcmp.gt.f32.partialorder %v6461_v54, 0.0  ;;  %4618 = vrcp.f32 %v3076_v58  ;;  %v4611_v25 = vpop.eup %4610 }
 0x45c   :  { %v6469_v43 = vpop.xlane.xlu0 %2982  ;;  %v1595_v37 = vsel %vm1563_vm6, %v6461_v54, 1.0 }
 0x45d   :  { %vm3045_vm7 = vcmp.gt.f32.partialorder %v6469_v43, 0.0  ;;  %4620 = vrcp.f32 %v1595_v37 }
 0x45e   :  { %v3077_v32 = vsel %vm3045_vm7, %v6469_v43, 1.0  ;;  %v7698_v43 = vld [vmem:[#allocation83_spill] sm:$0xff]  ;;  %v4613_v61 = vpop.eup %4612 }
 0x45f   :  { %v6479_v31 = vpop.xlane.xlu1 %1503  ;;  %v1668_v23 = vmul.f32 %v4605_v36, %v7698_v43  ;;  %4622 = vrcp.f32 %v3077_v32  ;;  %v1718_v36 = vadd.f32 %v1717_v60, %v1667_v49  ;;  %v3151_v32 = vmul.f32 %v4611_v25, %v7703_v28  ;;  %v7712_v28 = vld [vmem:[#allocation97_spill] sm:$0xff] }
 0x460   :  { %vm1564_vm8 = vcmp.gt.f32.partialorder %v6479_v31, 0.0  ;;  %v4615_v14 = vpop.eup %4614  ;;  %v1671_v41 = vmul.f32 %v4613_v61, %v7705_v22 }
 0x461   :  { %v6488_v26 = vpop.xlane.xlu0 %2985  ;;  %v1596_v30 = vsel %vm1564_vm8, %v6479_v31, 1.0  ;;  %v3236_v31 = vadd.f32 %v3235_v15, %v3148_v5  ;;  %v1755_v55 = vadd.f32 %v1754_v51, %v1668_v23  ;;  %v3200_v15 = vadd.f32 %v3199_v46, %v3149_v63 }
 0x462   :  { %vm3046_vm9 = vcmp.gt.f32.partialorder %v6488_v26, 0.0  ;;  %4624 = vrcp.f32 %v1596_v30  ;;  %v4617_v57 = vpop.eup %4616  ;;  %v7707_v30 = vld [vmem:[#allocation92_spill] sm:$0xff] }
 0x463   :  { %v6492_v12 = vpop.xlane.xlu1 %1506  ;;  %v3078_v17 = vsel %vm3046_vm9, %v6488_v26, 1.0  ;;  %v7704_v26 = vld [vmem:[#allocation89_spill] sm:$0xff]  ;;  %v3237_v2 = vadd.f32 %v3236_v31, %v3150_v9  ;;  %v1756_v23 = vadd.f32 %v1755_v55, %v1670_v6  ;;  %v3201_v46 = vadd.f32 %v3200_v15, %v3151_v32  ;;  %v7710_v31 = vld [vmem:[#allocation95_spill] sm:$0xff]  ;;  %v7713_v32 = vld [vmem:[#allocation98_spill] sm:$0xff] }
 0x464   :  { %vm1565_vm10 = vcmp.gt.f32.partialorder %v6492_v12, 0.0  ;;  %v3152_v42 = vmul.f32 %v4611_v25, %v7704_v26  ;;  %4626 = vrcp.f32 %v3078_v17  ;;  %v3153_v25 = vmul.f32 %v4615_v14, %v7707_v30 }
 0x465   :  { %v1597_v35 = vsel %vm1565_vm10, %v6492_v12, 1.0  ;;  %v1719_v12 = vadd.f32 %v1718_v36, %v1669_v33  ;;  %v4619_v43 = vpop.eup %4618  ;;  %v3154_v9 = vmul.f32 %v4615_v14, %v7708_v7  ;;  %v1673_v33 = vmul.f32 %v4617_v57, %v7709_v52  ;;  %v7718_v7 = vld [vmem:[#allocation103_spill] sm:$0xff] }
 0x466   :  { %v6497_v59 = vpop.xlane.xlu0 %2988  ;;  %4628 = vrcp.f32 %v1597_v35  ;;  %v3238_v27 = vadd.f32 %v3237_v2, %v3152_v42  ;;  %v1674_v36 = vmul.f32 %v4617_v57, %v7710_v31  ;;  %v7711_v35 = vld [vmem:[#allocation96_spill] sm:$0xff]  ;;  %v3156_v14 = vmul.f32 %v4619_v43, %v7712_v28  ;;  %v7714_v42 = vld [vmem:[#allocation99_spill] sm:$0xff] }
 0x467   :  { %vm3047_vm11 = vcmp.gt.f32.partialorder %v6497_v59, 0.0  ;;  %v4621_v51 = vpop.eup %4620  ;;  %v1720_v63 = vadd.f32 %v1719_v12, %v1671_v41  ;;  %v3155_v55 = vmul.f32 %v4619_v43, %v7711_v35  ;;  %v7716_v43 = vld [vmem:[#allocation101_spill] sm:$0xff]  ;;  %v7719_v31 = vld [vmem:[#allocation104_spill] sm:$0xff] }
 0x468   :  { %v6507_v1 = vpop.xlane.xlu1 %1509  ;;  %v3079_v24 = vsel %vm3047_vm11, %v6497_v59, 1.0  ;;  %v7706_v59 = vld [vmem:[#allocation91_spill] sm:$0xff]  ;;  %v1675_v26 = vmul.f32 %v4621_v51, %v7713_v32  ;;  %v1676_v22 = vmul.f32 %v4621_v51, %v7714_v42  ;;  %v3239_v57 = vadd.f32 %v3238_v27, %v3154_v9  ;;  %v7717_v51 = vld [vmem:[#allocation102_spill] sm:$0xff] }
 0x469   :  { %vm1566_vm12 = vcmp.gt.f32.partialorder %v6507_v1, 0.0  ;;  %v1672_v20 = vmul.f32 %v4613_v61, %v7706_v59  ;;  %4630 = vrcp.f32 %v3079_v24  ;;  %v4623_v61 = vpop.eup %4622  ;;  %v3202_v24 = vadd.f32 %v3201_v46, %v3153_v25 }
 0x46a   :  { %v6514_v40 = vpop.xlane.xlu0 %2991  ;;  %v1598_v49 = vsel %vm1566_vm12, %v6507_v1, 1.0  ;;  %v3240_v27 = vadd.f32 %v3239_v57, %v3156_v14 }
 0x46b   :  { %vm3048_vm13 = vcmp.gt.f32.partialorder %v6514_v40, 0.0  ;;  %4632 = vrcp.f32 %v1598_v49  ;;  %v1757_v17 = vadd.f32 %v1756_v23, %v1672_v20  ;;  %v3203_v49 = vadd.f32 %v3202_v24, %v3155_v55  ;;  %v7721_v24 = vld [vmem:[#allocation106_spill] sm:$0xff] }
 0x46c   :  { %v3080_v1 = vsel %vm3048_vm13, %v6514_v40, 1.0  ;;  %v4625_v41 = vpop.eup %4624  ;;  %v7715_v40 = vld [vmem:[#allocation100_spill] sm:$0xff]  ;;  %v3158_v23 = vmul.f32 %v4623_v61, %v7716_v43 }
 0x46d   :  { %v6524_v19 = vpop.xlane.xlu1 %1512  ;;  %v3157_v15 = vmul.f32 %v4623_v61, %v7715_v40  ;;  %4634 = vrcp.f32 %v3080_v1  ;;  %v1758_v20 = vadd.f32 %v1757_v17, %v1674_v36  ;;  %v1677_v46 = vmul.f32 %v4625_v41, %v7717_v51  ;;  %v7720_v61 = vld [vmem:[#allocation105_spill] sm:$0xff]  ;;  %v7726_v51 = vld [vmem:[#allocation111_spill] sm:$0xff] }
 0x46e   :  { %vm1567_vm14 = vcmp.gt.f32.partialorder %v6524_v19, 0.0  ;;  %v4627_v59 = vpop.eup %4626  ;;  %v1678_v52 = vmul.f32 %v4625_v41, %v7718_v7 }
 0x46f   :  { %v6529_v54 = vpop.xlane.xlu0 %2994  ;;  %v1599_v48 = vsel %vm1567_vm14, %v6524_v19, 1.0  ;;  %v1721_v19 = vadd.f32 %v1720_v63, %v1673_v33  ;;  %v1759_v9 = vadd.f32 %v1758_v20, %v1676_v22  ;;  %v3204_v33 = vadd.f32 %v3203_v49, %v3157_v15  ;;  %v7723_v22 = vld [vmem:[#allocation108_spill] sm:$0xff]  ;;  %v7724_v15 = vld [vmem:[#allocation109_spill] sm:$0xff] }
 0x470   :  { %vm3049_vm15 = vcmp.gt.f32.partialorder %v6529_v54, 0.0  ;;  %4636 = vrcp.f32 %v1599_v48  ;;  %v4629_v25 = vpop.eup %4628  ;;  %v3159_v36 = vmul.f32 %v4627_v59, %v7719_v31  ;;  %v3160_v35 = vmul.f32 %v4627_v59, %v7720_v61  ;;  %v7728_v31 = vld [vmem:[#allocation113_spill] sm:$0xff] }
 0x471   :  { %v6539_v58 = vpop.xlane.xlu1 %1515  ;;  %v3081_v2 = vsel %vm3049_vm15, %v6529_v54, 1.0  ;;  %v1722_v63 = vadd.f32 %v1721_v19, %v1675_v26  ;;  %v3241_v48 = vadd.f32 %v3240_v27, %v3158_v23  ;;  %v1679_v28 = vmul.f32 %v4629_v25, %v7721_v24  ;;  %v7722_v26 = vld [vmem:[#allocation107_spill] sm:$0xff]  ;;  %v7725_v23 = vld [vmem:[#allocation110_spill] sm:$0xff] }
 0x472   :  { %vm1568_vm2 = vcmp.gt.f32.partialorder %v6539_v58, 0.0  ;;  %4638 = vrcp.f32 %v3081_v2  ;;  %v1760_v32 = vadd.f32 %v1759_v9, %v1678_v52  ;;  %v1680_v42 = vmul.f32 %v4629_v25, %v7722_v26  ;;  %v7727_v9 = vld [vmem:[#allocation112_spill] sm:$0xff] }
 0x473   :  { %v6545_v37 = vpop.xlane.xlu0 %2997  ;;  %v1600_v54 = vsel %vm1568_vm2, %v6539_v58, 1.0  ;;  %v4631_v1 = vpop.eup %4630  ;;  %v1723_v14 = vadd.f32 %v1722_v63, %v1677_v46  ;;  %v3205_v57 = vadd.f32 %v3204_v33, %v3159_v36  ;;  %v3242_v19 = vadd.f32 %v3241_v48, %v3160_v35 }
 0x474   :  { %vm3050_vm3 = vcmp.gt.f32.partialorder %v6545_v37, 0.0  ;;  %4640 = vrcp.f32 %v1600_v54  ;;  %v3161_v41 = vmul.f32 %v4631_v1, %v7723_v22  ;;  %v3162_v2 = vmul.f32 %v4631_v1, %v7724_v15  ;;  %v7730_v22 = vld [vmem:[#allocation115_spill] sm:$0xff] }
 0x475   :  { %v3082_v55 = vsel %vm3050_vm3, %v6545_v37, 1.0  ;;  %v4633_v58 = vpop.eup %4632  ;;  %v1724_v43 = vadd.f32 %v1723_v14, %v1679_v28  ;;  %v1761_v52 = vadd.f32 %v1760_v32, %v1680_v42  ;;  %v7729_v14 = vld [vmem:[#allocation114_spill] sm:$0xff] }
 0x476   :  { %v6550_v5 = vpop.xlane.xlu1 %1518  ;;  %4642 = vrcp.f32 %v3082_v55  ;;  %v1681_v25 = vmul.f32 %v4633_v58, %v7725_v23  ;;  %v1682_v46 = vmul.f32 %v4633_v58, %v7726_v51  ;;  %v3206_v54 = vadd.f32 %v3205_v57, %v3161_v41 }
 0x477   :  { %vm1569_vm4 = vcmp.gt.f32.partialorder %v6550_v5, 0.0  ;;  %v4635_v49 = vpop.eup %4634  ;;  %v3243_v27 = vadd.f32 %v3242_v19, %v3162_v2 }
 0x478   :  { %v6557_v60 = vpop.xlane.xlu0 %3000  ;;  %v1601_v37 = vsel %vm1569_vm4, %v6550_v5, 1.0  ;;  %v3163_v33 = vmul.f32 %v4635_v49, %v7727_v9  ;;  %v3164_v36 = vmul.f32 %v4635_v49, %v7728_v31  ;;  %v1725_v55 = vadd.f32 %v1724_v43, %v1681_v25 }
 0x479   :  { %vm3051_vm5 = vcmp.gt.f32.partialorder %v6557_v60, 0.0  ;;  %4644 = vrcp.f32 %v1601_v37  ;;  %v1762_v48 = vadd.f32 %v1761_v52, %v1682_v46  ;;  %v7731_v46 = vld [vmem:[#allocation116_spill] sm:$0xff] }
 0x47a   :  { %v6566_v6 = vpop.xlane.xlu1 %1521  ;;  %v3083_v59 = vsel %vm3051_vm5, %v6557_v60, 1.0  ;;  %v4637_v7 = vpop.eup %4636  ;;  %v3244_v42 = vadd.f32 %v3243_v27, %v3164_v36 }
 0x47b   :  { %vm1570_vm6 = vcmp.gt.f32.partialorder %v6566_v6, 0.0  ;;  %4646 = vrcp.f32 %v3083_v59  ;;  %v1683_v24 = vmul.f32 %v4637_v7, %v6189_v47 }
 0x47c   :  { %v3004_v12 = vpop.xlane.xlu0 %3003  ;;  %v1602_v5 = vsel %vm1570_vm6, %v6566_v6, 1.0  ;;  %v4639_v60 = vpop.eup %4638  ;;  %v1684_v6 = vmul.f32 %v4637_v7, %v6191_v11 }
 0x47d   :  { %vm3052_vm7 = vcmp.gt.f32.partialorder %v3004_v12, 0.0  ;;  %4648 = vrcp.f32 %v1602_v5  ;;  %v3165_v32 = vmul.f32 %v4639_v60, %v7729_v14  ;;  %v3166_v41 = vmul.f32 %v4639_v60, %v7730_v22 }
 0x47e   :  { %v3084_v63 = vsel %vm3052_vm7, %v3004_v12, 1.0  ;;  %v4641_v58 = vpop.eup %4640  ;;  %v1726_v2 = vadd.f32 %v1725_v55, %v1683_v24  ;;  %v1763_v19 = vadd.f32 %v1762_v48, %v1684_v6 }
 0x47f   :  { %v1525_v30 = vpop.xlane.xlu1 %1524  ;;  %4650 = vrcp.f32 %v3084_v63  ;;  %v1686_v43 = vmul.f32 %v4641_v58, %v6215_v16  ;;  %v3245_v52 = vadd.f32 %v3244_v42, %v3166_v41 }
 0x480   :  { %vm1571_vm8 = vcmp.gt.f32.partialorder %v1525_v30, 0.0  ;;  %v4643_v47 = vpop.eup %4642 }
 0x481   :  { %v3007_v17 = vpop.xlane.xlu0 %3006  ;;  %v1603_v61 = vsel %vm1571_vm8, %v1525_v30, 1.0  ;;  %v3207_v30 = vadd.f32 %v3206_v54, %v3163_v33  ;;  %v3167_v23 = vmul.f32 %v4643_v47, %v6221_v3  ;;  %v3168_v7 = vmul.f32 %v4643_v47, %v7731_v46  ;;  %v7732_v33 = vld [vmem:[#allocation117_spill] sm:$0xff] }
 0x482   :  { %vm3053_vm9 = vcmp.gt.f32.partialorder %v3007_v17, 0.0  ;;  %4652 = vrcp.f32 %v1603_v61  ;;  %v1764_v60 = vadd.f32 %v1763_v19, %v1686_v43 }
 0x483   :  { %v1528_v40 = vpop.xlane.xlu1 %1527  ;;  %v3085_v28 = vsel %vm3053_vm9, %v3007_v17, 1.0  ;;  %v1685_v17 = vmul.f32 %v4641_v58, %v6213_v50  ;;  %v4645_v49 = vpop.eup %4644 }
 0x484   :  { %vm1572_vm10 = vcmp.gt.f32.partialorder %v1528_v40, 0.0  ;;  %4654 = vrcp.f32 %v3085_v28  ;;  %v1687_v63 = vmul.f32 %v4645_v49, %v6234_v13  ;;  %v1688_v31 = vmul.f32 %v4645_v49, %v7732_v33 }
 0x485   :  { %v3010_v20 = vpop.xlane.xlu0 %3009  ;;  %v1604_v26 = vsel %vm1572_vm10, %v1528_v40, 1.0  ;;  %v3208_v40 = vadd.f32 %v3207_v30, %v3165_v32  ;;  %v1727_v54 = vadd.f32 %v1726_v2, %v1685_v17  ;;  %vm3582_vm10 = vcmask 1048320  }
 0x486   :  { %vm3054_vm11 = vcmp.gt.f32.partialorder %v3010_v20, 0.0  ;;  %4656 = vrcp.f32 %v1604_v26 }
 0x487   :  { %v1531_v1 = vpop.xlane.xlu1 %1530  ;;  %v3086_v11 = vsel %vm3054_vm11, %v3010_v20, 1.0  ;;  %v4647_v20 = vpop.eup %4646  ;;  %v3209_v9 = vadd.f32 %v3208_v40, %v3167_v23  ;;  %vm1939_vm11 = vcmask 654848  }
 0x488   :  { %vm1573_vm12 = vcmp.gt.f32.partialorder %v1531_v1, 0.0  ;;  %4658 = vrcp.f32 %v3086_v11  ;;  %v4649_v27 = vpop.eup %4648  ;;  %v3169_v48 = vmul.f32 %v4647_v20, %v6246_v56  ;;  %v1765_v56 = vadd.f32 %v1764_v60, %v1688_v31  ;;  %v7736_v60 = vld [vmem:[#allocation123_spill] sm:$0xff] }
 0x489   :  { %v1605_v37 = vsel %vm1573_vm12, %v1531_v1, 1.0  ;;  %v4651_v3 = vpop.eup %4650  ;;  %v1689_v24 = vmul.f32 %v4649_v27, %v6254_v21  ;;  %v1690_v58 = vmul.f32 %v4649_v27, %v6256_v0  ;;  %v3170_v21 = vmul.f32 %v4647_v20, %v6248_v34 }
 0x48a   :  { %v3013_v35 = vpop.xlane.xlu0 %3012  ;;  %4660 = vrcp.f32 %v1605_v37  ;;  %v3171_v32 = vmul.f32 %v4651_v3, %v6260_v53  ;;  %v3210_v41 = vadd.f32 %v3209_v9, %v3169_v48  ;;  %vm3759_vm12 = vcmask 1041409  }
 0x48b   :  { %v1534_v12 = vpop.xlane.xlu1 %1533  ;;  %vm3055_vm13 = vcmp.gt.f32.partialorder %v3013_v35, 0.0  ;;  %v1766_v53 = vadd.f32 %v1765_v56, %v1690_v58  ;;  %v7743_v56 = vld [vmem:[#allocation121_spill] sm:$0xff] }
 0x48c   :  { %vm1574_vm14 = vcmp.gt.f32.partialorder %v1534_v12, 0.0  ;;  %v3087_v59 = vsel %vm3055_vm13, %v3013_v35, 1.0  ;;  %v4653_v61 = vpop.eup %4652  ;;  %v3246_v35 = vadd.f32 %v3245_v52, %v3168_v7  ;;  %v3211_v34 = vadd.f32 %v3210_v41, %v3171_v32 }
 0x48d   :  { %v1606_v25 = vsel %vm1574_vm14, %v1534_v12, 1.0  ;;  %4662 = vrcp.f32 %v3087_v59  ;;  %v1728_v12 = vadd.f32 %v1727_v54, %v1687_v63  ;;  %v1691_v26 = vmul.f32 %v4653_v61, %v6271_v4 }
 0x48e   :  { %v3016_v15 = vpop.xlane.xlu0 %3015  ;;  %4664 = vrcp.f32 %v1606_v25  ;;  %v4655_v28 = vpop.eup %4654  ;;  %v1692_v0 = vmul.f32 %v4653_v61, %v6273_v39  ;;  %v3247_v63 = vadd.f32 %v3246_v35, %v3170_v21  ;;  %v7738_v61 = vld [vmem:[#allocation126_spill] sm:$0xff]  ;;  %vm3421_vm13 = vcmask 786048  }
 0x48f   :  { %vm3056_vm15 = vcmp.gt.f32.partialorder %v3016_v15, 0.0  ;;  %v1537_v57 = vpop.xlane.xlu1 %1536  ;;  %v3173_v47 = vmul.f32 %v4655_v28, %v6281_v38  ;;  %vm3761_vm14 = vcmask 1042434  }
 0x490   :  { %vm1575_vm2 = vcmp.gt.f32.partialorder %v1537_v57, 0.0  ;;  %v3088_v50 = vsel %vm3056_vm15, %v3016_v15, 1.0  ;;  %v4657_v14 = vpop.eup %4656  ;;  %v1729_v15 = vadd.f32 %v1728_v12, %v1689_v24  ;;  %v1767_v25 = vadd.f32 %v1766_v53, %v1692_v0  ;;  %v7740_v12 = vld [vmem:[#allocation127_spill] sm:$0xff] }
 0x491   :  { %v1607_v5 = vsel %vm1575_vm2, %v1537_v57, 1.0  ;;  %4666 = vrcp.f32 %v3088_v50  ;;  %v1693_v4 = vmul.f32 %v4657_v14, %v6289_v29  ;;  %v7733_v57 = vld [vmem:[#allocation118_spill] sm:$0xff]  ;;  %v1694_v59 = vmul.f32 %v4657_v14, %v6291_v44 }
 0x492   :  { %v3019_v51 = vpop.xlane.xlu0 %3018  ;;  %4668 = vrcp.f32 %v1607_v5  ;;  %v4659_v22 = vpop.eup %4658  ;;  %v3172_v19 = vmul.f32 %v4651_v3, %v7733_v57  ;;  %v1730_v40 = vadd.f32 %v1729_v15, %v1691_v26  ;;  %v7734_v5 = vld [vmem:[#allocation122_spill] sm:$0xff]  ;;  %v7744_v15 = vld [vmem:[#allocation131_spill] sm:$0xff]  ;;  %vm3763_vm15 = vcmask 1043459  }
 0x493   :  { %vm3057_vm3 = vcmp.gt.f32.partialorder %v3019_v51, 0.0  ;;  %v1540_v1 = vpop.xlane.xlu1 %1539  ;;  %v3175_v39 = vmul.f32 %v4659_v22, %v6295_v8  ;;  %v1768_v54 = vadd.f32 %v1767_v25, %v1694_v59  ;;  %v7742_v26 = vld [vmem:[#allocation130_spill] sm:$0xff]  ;;  %v7749_v25 = vld [vmem:[#allocation128_spill] sm:$0xff]  ;;  %vm3765_vm2 = vcmask 1044484  }
 0x494   :  { %v3089_v16 = vsel %vm3057_vm3, %v3019_v51, 1.0  ;;  %vm1576_vm4 = vcmp.gt.f32.partialorder %v1540_v1, 0.0  ;;  %v4661_v11 = vpop.eup %4660  ;;  %v3212_v51 = vadd.f32 %v3211_v34, %v3173_v47  ;;  %v1731_v7 = vadd.f32 %v1730_v40, %v1693_v4 }
 0x495   :  { %v1608_v55 = vsel %vm1576_vm4, %v1540_v1, 1.0  ;;  %4670 = vrcp.f32 %v3089_v16  ;;  %v1695_v29 = vmul.f32 %v4661_v11, %v6301_v62  ;;  %v1696_v20 = vmul.f32 %v4661_v11, %v6303_v10  ;;  %v7735_v16 = vld [vmem:[#allocation119_spill] sm:$0xff]  ;;  %v7745_v11 = vld [vmem:[#allocation133_spill] sm:$0xff] }
 0x496   :  { %v3022_v36 = vpop.xlane.xlu0 %3021  ;;  %4672 = vrcp.f32 %v1608_v55  ;;  %v3174_v3 = vmul.f32 %v4655_v28, %v7735_v16  ;;  %v3213_v62 = vadd.f32 %v3212_v51, %v3175_v39  ;;  %v3248_v24 = vadd.f32 %v3247_v63, %v3172_v19  ;;  %v7741_v28 = vld [vmem:[#allocation129_spill] sm:$0xff]  ;;  %v7747_v19 = vld [vmem:[#allocation124_spill] sm:$0xff]  ;;  %v7753_v63 = vld [vmem:[#allocation139_spill] sm:$0xff] }
 0x497   :  { %vm3058_vm5 = vcmp.gt.f32.partialorder %v3022_v36, 0.0  ;;  %v1543_v6 = vpop.xlane.xlu1 %1542  ;;  %v4663_v37 = vpop.eup %4662  ;;  %v1732_v33 = vadd.f32 %v1731_v7, %v1695_v29  ;;  %v1769_v31 = vadd.f32 %v1768_v54, %v1696_v20  ;;  %v7751_v54 = vld [vmem:[#allocation138_spill] sm:$0xff]  ;;  %vm3767_vm3 = vcmask 1045509  }
 0x498   :  { %v3090_v13 = vsel %vm3058_vm5, %v3022_v36, 1.0  ;;  %vm1577_vm6 = vcmp.gt.f32.partialorder %v1543_v6, 0.0  ;;  %v4665_v43 = vpop.eup %4664  ;;  %v3177_v50 = vmul.f32 %v4663_v37, %v6314_v18  ;;  %v7737_v18 = vld [vmem:[#allocation125_spill] sm:$0xff]  ;;  %v3178_v21 = vmul.f32 %v4663_v37, %v7743_v56 }
 0x499   :  { %4674 = vrcp.f32 %v3090_v13  ;;  %v1609_v30 = vsel %vm1577_vm6, %v1543_v6, 1.0  ;;  %v1697_v8 = vmul.f32 %v4665_v43, %v6318_v45  ;;  %v1698_v1 = vmul.f32 %v4665_v43, %v7734_v5  ;;  %v7739_v45 = vld [vmem:[#allocation120_spill] sm:$0xff]  ;;  %v7748_v43 = vld [vmem:[#allocation135_spill] sm:$0xff] }
 0x49a   :  { %v3025_v42 = vpop.xlane.xlu0 %3024  ;;  %4676 = vrcp.f32 %v1609_v30  ;;  %v3176_v13 = vmul.f32 %v4659_v22, %v7739_v45  ;;  %v3214_v6 = vadd.f32 %v3213_v62, %v3177_v50  ;;  %v7746_v22 = vld [vmem:[#allocation134_spill] sm:$0xff]  ;;  %v7750_v50 = vld [vmem:[#allocation137_spill] sm:$0xff]  ;;  %vm3769_vm4 = vcmask 1046534  }
 0x49b   :  { %vm3059_vm7 = vcmp.gt.f32.partialorder %v3025_v42, 0.0  ;;  %v1546_v2 = vpop.xlane.xlu1 %1545  ;;  %v4667_v23 = vpop.eup %4666  ;;  %v1733_v35 = vadd.f32 %v1732_v33, %v1697_v8  ;;  %v1770_v14 = vadd.f32 %v1769_v31, %v1698_v1  ;;  %v7752_v1 = vld [vmem:[#allocation132_spill] sm:$0xff]  ;;  %vm3771_vm5 = vcmask 1047559  }
 0x49c   :  { %v3091_v17 = vsel %vm3059_vm7, %v3025_v42, 1.0  ;;  %vm1578_vm8 = vcmp.gt.f32.partialorder %v1546_v2, 0.0  ;;  %v4669_v46 = vpop.eup %4668  ;;  %v3179_v10 = vmul.f32 %v4667_v23, %v7736_v60  ;;  %v3249_v42 = vadd.f32 %v3248_v24, %v3174_v3  ;;  %v7754_v33 = vld [vmem:[#allocation136_spill] sm:$0xff] }
 0x49d   :  { %4678 = vrcp.f32 %v3091_v17  ;;  %v1610_v38 = vsel %vm1578_vm8, %v1546_v2, 1.0  ;;  %v1699_v36 = vmul.f32 %v4669_v46, %v7737_v18  ;;  %v1700_v55 = vmul.f32 %v4669_v46, %v7738_v61 }
 0x49e   :  { %v3028_v49 = vpop.xlane.xlu0 %3027  ;;  %4680 = vrcp.f32 %v1610_v38  ;;  %v3215_v41 = vadd.f32 %v3214_v6, %v3179_v10  ;;  %v3250_v57 = vadd.f32 %v3249_v42, %v3176_v13  ;;  %v3180_v34 = vmul.f32 %v4667_v23, %v7747_v19  ;;  %v7758_v19 = vld [vmem:[#allocation27_spill] sm:$0xff] }
 0x49f   :  { %vm3060_vm9 = vcmp.gt.f32.partialorder %v3028_v49, 0.0  ;;  %v4671_v52 = vpop.eup %4670  ;;  %v1734_v47 = vadd.f32 %v1733_v35, %v1699_v36  ;;  %v1771_v2 = vadd.f32 %v1770_v14, %v1700_v55  ;;  %vm4878_vm6 = vmmov 0  }
 0x4a0   :  { %v3092_v44 = vsel %vm3060_vm9, %v3028_v49, 1.0  ;;  %v4673_v27 = vpop.eup %4672  ;;  %v3181_v58 = vmul.f32 %v4671_v52, %v7740_v12  ;;  %v3251_v37 = vadd.f32 %v3250_v57, %v3178_v21  ;;  %v3182_v51 = vmul.f32 %v4671_v52, %v7749_v25 }
 0x4a1   :  { %4682 = vrcp.f32 %v3092_v44  ;;  %v1701_v32 = vmul.f32 %v4673_v27, %v7741_v28  ;;  %v1702_v30 = vmul.f32 %v4673_v27, %v7742_v26 }
 0x4a2   :  { %v3216_v40 = vadd.f32 %v3215_v41, %v3181_v58  ;;  %v3252_v5 = vadd.f32 %v3251_v37, %v3180_v34  ;;  %v3592_v34 = vsel %vm3582_vm10, %v7758_v19, 0.0  ;;  %v7760_v37 = vld [vmem:[#allocation35_spill] sm:$0xff] }
 0x4a3   :  { %v4675_v9 = vpop.eup %4674  ;;  %v1735_v59 = vadd.f32 %v1734_v47, %v1701_v32  ;;  %v1772_v49 = vadd.f32 %v1771_v2, %v1702_v30  ;;  %v3611_v25 = vsel %vm3582_vm10, %v7760_v37, 0.0 }
 0x4a4   :  { %v4677_v48 = vpop.eup %4676  ;;  %v3183_v0 = vmul.f32 %v4675_v9, %v7744_v15  ;;  %v3184_v23 = vmul.f32 %v4675_v9, %v7752_v1  ;;  %v3253_v60 = vadd.f32 %v3252_v5, %v3182_v51 }
 0x4a5   :  { %v1703_v53 = vmul.f32 %v4677_v48, %v7745_v11  ;;  %v1704_v4 = vmul.f32 %v4677_v48, %v7746_v22  ;;  %v7755_v48 = vld [vmem:[#allocation140_spill] sm:$0xff]  ;;  %v7756_v22 = vld [vmem:[#allocation25_spill] sm:$0xff] }
 0x4a6   :  { %v3217_v29 = vadd.f32 %v3216_v40, %v3183_v0  ;;  %v3254_v36 = vadd.f32 %v3253_v60, %v3184_v23  ;;  %v7759_v40 = vld [vmem:[#allocation15_spill] sm:$0xff] }
 0x4a7   :  { %v4679_v17 = vpop.eup %4678  ;;  %v1736_v46 = vadd.f32 %v1735_v59, %v1703_v53  ;;  %v1773_v7 = vadd.f32 %v1772_v49, %v1704_v4  ;;  %v3593_v4 = vsel %vm3582_vm10, %v7756_v22, 0.0  ;;  %v3583_v59 = vsel %vm3582_vm10, %v7759_v40, 0.0 }
 0x4a8   :  { %v3185_v39 = vmul.f32 %v4679_v17, %v7748_v43  ;;  %v4681_v38 = vpop.eup %4680  ;;  %v3186_v52 = vmul.f32 %v4679_v17, %v7754_v33  ;;  %v7757_v17 = vld [vmem:[#allocation16_spill] sm:$0xff]  ;;  %v3594_v49 = vadd.f32 %v3593_v4, %v3592_v34 }
 0x4a9   :  { %v1705_v44 = vmul.f32 %v4681_v38, %v7750_v50  ;;  %v1706_v8 = vmul.f32 %v4681_v38, %v7751_v54  ;;  %v3584_v57 = vsel %vm3582_vm10, %v7757_v17, 0.0  ;;  %v7762_v50 = vld [vmem:[#allocation29_spill] sm:$0xff]  ;;  %v7763_v54 = vld [vmem:[#allocation32_spill] sm:$0xff] }
 0x4aa   :  { %v3218_v27 = vadd.f32 %v3217_v29, %v3185_v39  ;;  %v3255_v13 = vadd.f32 %v3254_v36, %v3186_v52  ;;  %v3585_v43 = vadd.f32 %v3584_v57, %v3583_v59  ;;  %v3595_v39 = vrot.slane %v3594_v49, 4  ;;  %v7761_v29 = vld [vmem:[#allocation36_spill] sm:$0xff]  ;;  %v7768_v59 = vld [vmem:[#allocation46_spill] sm:$0xff] }
 0x4ab   :  { %v4683_v20 = vpop.eup %4682  ;;  %v1737_v3 = vadd.f32 %v1736_v46, %v1705_v44  ;;  %v1774_v62 = vadd.f32 %v1773_v7, %v1706_v8  ;;  %v3602_v44 = vsel %vm3582_vm10, %v7762_v50, 0.0  ;;  %v3601_v8 = vsel %vm3582_vm10, %v7763_v54, 0.0 }
 0x4ac   :  { %v3187_v16 = vmul.f32 %v4683_v20, %v7753_v63  ;;  %v3188_v24 = vmul.f32 %v4683_v20, %v7755_v48  ;;  %v3586_v38 = vrot.slane %v3585_v43, 4  ;;  %v3596_v51 = vadd.f32 %v3595_v39, %v3594_v49 }
 0x4ad   :  { %v1738_v31 = vrot.slane %v1737_v3, 4  ;;  %v1775_v18 = vrot.slane %v1774_v62, 4  ;;  %v3610_v20 = vsel %vm3582_vm10, %v7761_v29, 0.0  ;;  %v3603_v1 = vadd.f32 %v3602_v44, %v3601_v8 }
 0x4ae   :  { %v3219_v10 = vadd.f32 %v3218_v27, %v3187_v16  ;;  %v3256_v14 = vadd.f32 %v3255_v13, %v3188_v24  ;;  %v3587_v46 = vadd.f32 %v3586_v38, %v3585_v43  ;;  %v3612_v7 = vadd.f32 %v3611_v25, %v3610_v20 }
 0x4af   :  { %v1739_v61 = vadd.f32 %v1738_v31, %v1737_v3  ;;  %v1776_v55 = vadd.f32 %v1775_v18, %v1774_v62  ;;  %v3597_v5 = vrot.slane %v3596_v51, 2  ;;  %v3604_v62 = vrot.slane %v3603_v1, 4 }
 0x4b0   :  { %v3220_v45 = vrot.slane %v3219_v10, 4  ;;  %v3257_v42 = vrot.slane %v3256_v14, 4  ;;  %v3588_v23 = vrot.slane %v3587_v46, 2  ;;  %v3613_v27 = vrot.slane %v3612_v7, 4 }
 0x4b1   :  { %v1740_v6 = vrot.slane %v1739_v61, 2  ;;  %v1777_v9 = vrot.slane %v1776_v55, 2  ;;  %v3598_v3 = vadd.f32 %v3597_v5, %v3596_v51  ;;  %v3605_v24 = vadd.f32 %v3604_v62, %v3603_v1 }
 0x4b2   :  { %v3221_v35 = vadd.f32 %v3220_v45, %v3219_v10  ;;  %v3258_v41 = vadd.f32 %v3257_v42, %v3256_v14  ;;  %v3589_v33 = vadd.f32 %v3588_v23, %v3587_v46  ;;  %v3614_v52 = vadd.f32 %v3613_v27, %v3612_v7  ;;  %v4298_v7 = vld [vmem:[#allocation8] sm:$0xff]  }
 0x4b3   :  { %v1741_v12 = vadd.f32 %v1740_v6, %v1739_v61  ;;  %v1778_v58 = vadd.f32 %v1777_v9, %v1776_v55  ;;  %v3599_v48 = vrot.slane %v3598_v3, 1  ;;  %v3619_v49 = vsel %vm3582_vm10, %v7768_v59, 0.0 }
 0x4b4   :  { %v3222_v30 = vrot.slane %v3221_v35, 2  ;;  %v3259_v0 = vrot.slane %v3258_v41, 2  ;;  %v3590_v45 = vrot.slane %v3589_v33, 1  ;;  %v3615_v13 = vrot.slane %v3614_v52, 2 }
 0x4b5   :  { %v1742_v28 = vrot.slane %v1741_v12, 1  ;;  %v1779_v26 = vrot.slane %v1778_v58, 1  ;;  %v3600_v14 = vadd.f32 %v3599_v48, %v3598_v3  ;;  %v7375_v23 = vmov 0.0  }
 0x4b6   :  { %v3223_v21 = vadd.f32 %v3222_v30, %v3221_v35  ;;  %v3260_v2 = vadd.f32 %v3259_v0, %v3258_v41  ;;  %v3591_v42 = vadd.f32 %v3590_v45, %v3589_v33  ;;  %v7765_v41 = vld [vmem:[#allocation17_spill] sm:$0xff]  ;;  %4239 = vmatprep.subr.bf16.mxu1 %v7375_v23 }
 0x4b7   :  { %v6644_v32 = vadd.f32 %v1742_v28, %v1741_v12  ;;  %v6648_v56 = vadd.f32 %v1779_v26, %v1778_v58  ;;  %v3606_v28 = vrot.slane %v3605_v24, 2  ;;  %v3728_v44 = vmul.f32 0.0625, %v3600_v14  ;;  %4240 = vmatpush3.bf16.msra.mxu1 %v4298_v7 }
 0x4b8   :  { %v3224_v15 = vrot.slane %v3223_v21, 1  ;;  %v3261_v11 = vrot.slane %v3260_v2, 1  ;;  %v3727_v8 = vmul.f32 0.0625, %v3591_v42  ;;  %4241 = vmatprep.subr.bf16.mxu1 %v7375_v23 }
 0x4b9   :  { %1786 = vbcast.lane.b32.xlu0 %v6644_v32, 264  ;;  %1782 = vbcast.lane.b32.xlu1 %v6644_v32, 256  ;;  %v3607_v51 = vadd.f32 %v3606_v28, %v3605_v24 }
 0x4ba   :  { %v6654_v47 = vadd.f32 %v3224_v15, %v3223_v21  ;;  %v6660_v53 = vadd.f32 %v3261_v11, %v3260_v2  ;;  %v3616_v21 = vadd.f32 %v3615_v13, %v3614_v52  ;;  %v3628_v15 = vsel %vm3582_vm10, %v7765_v41, 0.0  ;;  %v7767_v11 = vld [vmem:[#allocation23_spill] sm:$0xff] }
 0x4bb   :  { %v6757_v45 = vsel %vm3759_vm12, %v3728_v44, %v3727_v8 }
 0x4bc   :  { %v3617_v27 = vrot.slane %v3616_v21, 1 }
 0x4bd   :  { %1845 = vbcast.lane.b32.xlu0 %v6648_v56, 256  ;;  %1790 = vbcast.lane.b32.xlu1 %v6644_v32, 272 }
 0x4be   :  { %v3618_v13 = vadd.f32 %v3617_v27, %v3616_v21 }
 0x4c1   :  { %1853 = vbcast.lane.b32.xlu0 %v6648_v56, 272  ;;  %1794 = vbcast.lane.b32.xlu1 %v6644_v32, 280 }
 0x4c5   :  { %3264 = vbcast.lane.b32.xlu0 %v6654_v47, 256  ;;  %1849 = vbcast.lane.b32.xlu1 %v6648_v56, 264 }
 0x4c9   :  { %3272 = vbcast.lane.b32.xlu0 %v6654_v47, 272  ;;  %1857 = vbcast.lane.b32.xlu1 %v6648_v56, 280 }
 0x4cd   :  { %3327 = vbcast.lane.b32.xlu0 %v6660_v53, 256  ;;  %3268 = vbcast.lane.b32.xlu1 %v6654_v47, 264 }
 0x4d1   :  { %3335 = vbcast.lane.b32.xlu0 %v6660_v53, 272  ;;  %3276 = vbcast.lane.b32.xlu1 %v6654_v47, 280 }
 0x4d5   :  { %1798 = vbcast.lane.b32.xlu0 %v6644_v32, 288  ;;  %3331 = vbcast.lane.b32.xlu1 %v6660_v53, 264 }
 0x4d9   :  { %1861 = vbcast.lane.b32.xlu0 %v6648_v56, 288  ;;  %3339 = vbcast.lane.b32.xlu1 %v6660_v53, 280 }
 0x4dd   :  { %3280 = vbcast.lane.b32.xlu0 %v6654_v47, 288  ;;  %1802 = vbcast.lane.b32.xlu1 %v6644_v32, 296 }
 0x4e1   :  { %3343 = vbcast.lane.b32.xlu0 %v6660_v53, 288  ;;  %1865 = vbcast.lane.b32.xlu1 %v6648_v56, 296 }
 0x4e5   :  { %1806 = vbcast.lane.b32.xlu0 %v6644_v32, 304  ;;  %3284 = vbcast.lane.b32.xlu1 %v6654_v47, 296 }
 0x4e9   :  { %1869 = vbcast.lane.b32.xlu0 %v6648_v56, 304  ;;  %3347 = vbcast.lane.b32.xlu1 %v6660_v53, 296 }
 0x4ed   :  { %3288 = vbcast.lane.b32.xlu0 %v6654_v47, 304  ;;  %1810 = vbcast.lane.b32.xlu1 %v6644_v32, 312 }
 0x4f1   :  { %3351 = vbcast.lane.b32.xlu0 %v6660_v53, 304  ;;  %1873 = vbcast.lane.b32.xlu1 %v6648_v56, 312 }
 0x4f5   :  { %1814 = vbcast.lane.b32.xlu0 %v6644_v32, 320  ;;  %3292 = vbcast.lane.b32.xlu1 %v6654_v47, 312 }
 0x4f9   :  { %1877 = vbcast.lane.b32.xlu0 %v6648_v56, 320  ;;  %3355 = vbcast.lane.b32.xlu1 %v6660_v53, 312 }
 0x4fd   :  { %3296 = vbcast.lane.b32.xlu0 %v6654_v47, 320  ;;  %1818 = vbcast.lane.b32.xlu1 %v6644_v32, 328 }
 0x501   :  { %3359 = vbcast.lane.b32.xlu0 %v6660_v53, 320  ;;  %1881 = vbcast.lane.b32.xlu1 %v6648_v56, 328 }
 0x505   :  { %1822 = vbcast.lane.b32.xlu0 %v6644_v32, 336  ;;  %3300 = vbcast.lane.b32.xlu1 %v6654_v47, 328 }
 0x509   :  { %1885 = vbcast.lane.b32.xlu0 %v6648_v56, 336  ;;  %3363 = vbcast.lane.b32.xlu1 %v6660_v53, 328 }
 0x50d   :  { %3304 = vbcast.lane.b32.xlu0 %v6654_v47, 336  ;;  %1826 = vbcast.lane.b32.xlu1 %v6644_v32, 344 }
 0x511   :  { %3367 = vbcast.lane.b32.xlu0 %v6660_v53, 336  ;;  %1889 = vbcast.lane.b32.xlu1 %v6648_v56, 344 }
 0x515   :  { %1830 = vbcast.lane.b32.xlu0 %v6644_v32, 352  ;;  %3308 = vbcast.lane.b32.xlu1 %v6654_v47, 344 }
 0x519   :  { %1893 = vbcast.lane.b32.xlu0 %v6648_v56, 352  ;;  %3371 = vbcast.lane.b32.xlu1 %v6660_v53, 344 }
 0x51d   :  { %3312 = vbcast.lane.b32.xlu0 %v6654_v47, 352  ;;  %1834 = vbcast.lane.b32.xlu1 %v6644_v32, 360 }
 0x521   :  { %3375 = vbcast.lane.b32.xlu0 %v6660_v53, 352  ;;  %1897 = vbcast.lane.b32.xlu1 %v6648_v56, 360 }
 0x525   :  { %1838 = vbcast.lane.b32.xlu0 %v6644_v32, 368  ;;  %3316 = vbcast.lane.b32.xlu1 %v6654_v47, 360 }
 0x529   :  { %1901 = vbcast.lane.b32.xlu0 %v6648_v56, 368  ;;  %3379 = vbcast.lane.b32.xlu1 %v6660_v53, 360 }
 0x52b   :  { %v1787_v63 = vpop.permute.xlu0 %1786  ;;  %v1783_v16 = vpop.permute.xlu1 %1782 }
 0x52c   :  { %v1908_v60 = vmul.f32 %v1787_v63, %v7757_v17  ;;  %v1907_v10 = vmul.f32 %v1783_v16, %v7759_v40  ;;  %v7770_v16 = vld [vmem:[#allocation28_spill] sm:$0xff] }
 0x52d   :  { %3320 = vbcast.lane.b32.xlu0 %v6654_v47, 368  ;;  %1842 = vbcast.lane.b32.xlu1 %v6644_v32, 376  ;;  %v7764_v32 = vld [vmem:[#allocation18_spill] sm:$0xff] }
 0x52e   :  { %v1941_v31 = vsel %vm1939_vm11, %v1908_v60, 0.0  ;;  %v1940_v18 = vsel %vm1939_vm11, %v1907_v10, 0.0  ;;  %v3629_v26 = vsel %vm3582_vm10, %v7764_v32, 0.0 }
 0x52f   :  { %v1942_v36 = vadd.f32 %v1941_v31, %v1940_v18  ;;  %v1846_v61 = vpop.permute.xlu0 %1845  ;;  %v1791_v55 = vpop.permute.xlu1 %1790  ;;  %v3630_v43 = vadd.f32 %v3629_v26, %v3628_v15  ;;  %v3608_v31 = vrot.slane %v3607_v51, 1 }
 0x530   :  { %v1909_v9 = vmul.f32 %v1791_v55, %v7758_v19  ;;  %v1923_v4 = vmul.f32 %v1846_v61, %v7767_v11 }
 0x531   :  { %v1943_v6 = vrot.slane %v1942_v36, 4  ;;  %3383 = vbcast.lane.b32.xlu0 %v6660_v53, 368  ;;  %1905 = vbcast.lane.b32.xlu1 %v6648_v56, 376  ;;  %v7766_v56 = vld [vmem:[#allocation43_spill] sm:$0xff]  ;;  %v3631_v18 = vrot.slane %v3630_v43, 4 }
 0x532   :  { %v3620_v2 = vsel %vm3582_vm10, %v7766_v56, 0.0  ;;  %v1949_v57 = vsel %vm1939_vm11, %v1909_v9, 0.0  ;;  %v2012_v63 = vsel %vm1939_vm11, %v1923_v4, 0.0 }
 0x533   :  { %v1944_v12 = vadd.f32 %v1943_v6, %v1942_v36  ;;  %v1854_v58 = vpop.permute.xlu0 %1853  ;;  %v1795_v35 = vpop.permute.xlu1 %1794  ;;  %v3621_v5 = vadd.f32 %v3620_v2, %v3619_v49  ;;  %v7771_v36 = vld [vmem:[#allocation26_spill] sm:$0xff]  ;;  %v3632_v42 = vadd.f32 %v3631_v18, %v3630_v43 }
 0x534   :  { %v1910_v30 = vmul.f32 %v1795_v35, %v7756_v22  ;;  %v1925_v3 = vmul.f32 %v1854_v58, %v7770_v16 }
 0x535   :  { %v1945_v0 = vrot.slane %v1944_v12, 2  ;;  %3324 = vbcast.lane.b32.xlu1 %v6654_v47, 376  ;;  %v7769_v47 = vld [vmem:[#allocation24_spill] sm:$0xff]  ;;  %v3622_v55 = vrot.slane %v3621_v5, 4  ;;  %v3633_v44 = vrot.slane %v3632_v42, 2 }
 0x536   :  { %v1950_v34 = vsel %vm1939_vm11, %v1910_v30, 0.0  ;;  %v2021_v6 = vsel %vm1939_vm11, %v1925_v3, 0.0  ;;  %v3609_v30 = vadd.f32 %v3608_v31, %v3607_v51 }
 0x537   :  { %v1951_v39 = vadd.f32 %v1950_v34, %v1949_v57  ;;  %v3265_v38 = vpop.permute.xlu0 %3264  ;;  %v1850_v25 = vpop.permute.xlu1 %1849  ;;  %v1946_v20 = vadd.f32 %v1945_v0, %v1944_v12  ;;  %v3623_v2 = vadd.f32 %v3622_v55, %v3621_v5  ;;  %v7772_v34 = vld [vmem:[#allocation19_spill] sm:$0xff] }
 0x538   :  { %v1924_v46 = vmul.f32 %v1850_v25, %v7769_v47  ;;  %v3389_v9 = vmul.f32 %v3265_v38, %v7759_v40  ;;  %v3646_v40 = vsel %vm3582_vm10, %v7772_v34, 0.0 }
 0x539   :  { %v1952_v1 = vrot.slane %v1951_v39, 4  ;;  %3387 = vbcast.lane.b32.xlu1 %v6660_v53, 376  ;;  %v1947_v53 = vrot.slane %v1946_v20, 1 }
 0x53a   :  { %v2013_v62 = vsel %vm1939_vm11, %v1924_v46, 0.0  ;;  %v3422_v49 = vsel %vm3421_vm13, %v3389_v9, 0.0 }
 0x53b   :  { %v1953_v60 = vadd.f32 %v1952_v1, %v1951_v39  ;;  %v2014_v10 = vadd.f32 %v2013_v62, %v2012_v63  ;;  %v3273_v33 = vpop.permute.xlu0 %3272  ;;  %v1858_v52 = vpop.permute.xlu1 %1857  ;;  %v1948_v15 = vadd.f32 %v1947_v53, %v1946_v20  ;;  %v4299_v1 = vld [vmem:[#allocation8 + $0x8] sm:$0xff]  }
 0x53c   :  { %v1926_v61 = vmul.f32 %v1858_v52, %v7771_v36  ;;  %v3391_v39 = vmul.f32 %v3273_v33, %v7758_v19  ;;  %v3729_v19 = vmul.f32 0.0625, %v3609_v30  ;;  %4242 = vmatpush3.bf16.msra.mxu1 %v4299_v1 }
 0x53d   :  { %v1954_v48 = vrot.slane %v1953_v60, 2  ;;  %v2015_v24 = vrot.slane %v2014_v10, 4  ;;  %v2084_v8 = vmul.f32 0.0625, %v1948_v15 }
 0x53e   :  { %v2022_v12 = vsel %vm1939_vm11, %v1926_v61, 0.0 }
 0x53f   :  { %v1955_v58 = vadd.f32 %v1954_v48, %v1953_v60  ;;  %v2016_v35 = vadd.f32 %v2015_v24, %v2014_v10  ;;  %v2023_v14 = vadd.f32 %v2022_v12, %v2021_v6  ;;  %v3328_v28 = vpop.permute.xlu0 %3327  ;;  %v3269_v26 = vpop.permute.xlu1 %3268  ;;  %v7773_v60 = vld [vmem:[#allocation20_spill] sm:$0xff]  ;;  %v3624_v48 = vrot.slane %v3623_v2, 2  ;;  %v7774_v24 = vld [vmem:[#allocation21_spill] sm:$0xff] }
 0x540   :  { %v3390_v0 = vmul.f32 %v3269_v26, %v7757_v17  ;;  %v6768_v17 = vmul.f32 0.0625, %v3618_v13  ;;  %v3637_v10 = vsel %vm3582_vm10, %v7773_v60, 0.0  ;;  %v3405_v33 = vmul.f32 %v3328_v28, %v7767_v11 }
 0x541   :  { %v1956_v4 = vrot.slane %v1955_v58, 1  ;;  %v2017_v21 = vrot.slane %v2016_v35, 2  ;;  %v2024_v57 = vrot.slane %v2023_v14, 4  ;;  %v3647_v13 = vsel %vm3582_vm10, %v7774_v24, 0.0 }
 0x542   :  { %v3423_v38 = vsel %vm3421_vm13, %v3390_v0, 0.0  ;;  %v6783_v28 = vadd.f32 %v3633_v44, %v3632_v42  ;;  %v3494_v26 = vsel %vm3421_vm13, %v3405_v33, 0.0  ;;  %v6787_v0 = vadd.f32 %v3647_v13, %v3646_v40 }
 0x543   :  { %v1957_v25 = vadd.f32 %v1956_v4, %v1955_v58  ;;  %v2018_v46 = vadd.f32 %v2017_v21, %v2016_v35  ;;  %v2025_v51 = vadd.f32 %v2024_v57, %v2023_v14  ;;  %v3424_v43 = vadd.f32 %v3423_v38, %v3422_v49  ;;  %v3336_v20 = vpop.permute.xlu0 %3335  ;;  %v3277_v7 = vpop.permute.xlu1 %3276 }
 0x544   :  { %v3392_v5 = vmul.f32 %v3277_v7, %v7756_v22  ;;  %v3431_v22 = vsel %vm3421_vm13, %v3391_v39, 0.0  ;;  %v3407_v14 = vmul.f32 %v3336_v20, %v7770_v16  ;;  %v6789_v38 = vadd.f32 %v3624_v48, %v3623_v2 }
 0x545   :  { %v2085_v27 = vmul.f32 0.0625, %v1957_v25  ;;  %v2019_v63 = vrot.slane %v2018_v46, 1  ;;  %v2026_v3 = vrot.slane %v2025_v51, 2  ;;  %v3425_v62 = vrot.slane %v3424_v43, 4  ;;  %v7775_v25 = vld [vmem:[#allocation22_spill] sm:$0xff] }
 0x546   :  { %v3432_v52 = vsel %vm3421_vm13, %v3392_v5, 0.0  ;;  %v3503_v7 = vsel %vm3421_vm13, %v3407_v14, 0.0  ;;  %v3635_v13 = vrot.slane %v6783_v28, 1 }
 0x547   :  { %v6776_v31 = vsel %vm3759_vm12, %v2085_v27, %v2084_v8  ;;  %v2027_v18 = vadd.f32 %v2026_v3, %v2025_v51  ;;  %v3426_v53 = vadd.f32 %v3425_v62, %v3424_v43  ;;  %v1799_v61 = vpop.permute.xlu0 %1798  ;;  %v3332_v55 = vpop.permute.xlu1 %3331  ;;  %v3433_v6 = vadd.f32 %v3432_v52, %v3431_v22 }
 0x548   :  { %v3406_v9 = vmul.f32 %v3332_v55, %v7769_v47  ;;  %v2020_v12 = vadd.f32 %v2019_v63, %v2018_v46  ;;  %v3638_v46 = vsel %vm3582_vm10, %v7775_v25, 0.0  ;;  %v1911_v5 = vmul.f32 %v1799_v61, %v7763_v54  ;;  %v7776_v55 = vld [vmem:[#allocation30_spill] sm:$0xff] }
 0x549   :  { %v2028_v58 = vrot.slane %v2027_v18, 1  ;;  %v3427_v35 = vrot.slane %v3426_v53, 2  ;;  %v3434_v30 = vrot.slane %v3433_v6, 4  ;;  %v6797_v27 = vadd.f32 %v3638_v46, %v3637_v10 }
 0x54a   :  { %v3495_v15 = vsel %vm3421_vm13, %v3406_v9, 0.0  ;;  %v2092_v43 = vmul.f32 0.0625, %v2020_v12  ;;  %v3649_v52 = vrot.slane %v6787_v0, 4  ;;  %v1958_v12 = vsel %vm1939_vm11, %v1911_v5, 0.0 }
 0x54b   :  { %v2029_v4 = vadd.f32 %v2028_v58, %v2027_v18  ;;  %v3428_v21 = vadd.f32 %v3427_v35, %v3426_v53  ;;  %v3496_v57 = vadd.f32 %v3495_v15, %v3494_v26  ;;  %v1862_v49 = vpop.permute.xlu0 %1861  ;;  %v3340_v39 = vpop.permute.xlu1 %3339  ;;  %v3435_v51 = vadd.f32 %v3434_v30, %v3433_v6 }
 0x54c   :  { %v3408_v42 = vmul.f32 %v3340_v39, %v7771_v36  ;;  %v6806_v53 = vsel %vm3761_vm14, %v3729_v19, %v6757_v45  ;;  %v1927_v10 = vmul.f32 %v1862_v49, %v7776_v55  ;;  %v3626_v35 = vrot.slane %v6789_v38, 1  ;;  %v7777_v49 = vld [vmem:[#allocation31_spill] sm:$0xff] }
 0x54d   :  { %v2093_v20 = vmul.f32 0.0625, %v2029_v4  ;;  %v3497_v44 = vrot.slane %v3496_v57, 4  ;;  %v3429_v40 = vrot.slane %v3428_v21, 1  ;;  %v3436_v8 = vrot.slane %v3435_v51, 2 }
 0x54e   :  { %v3504_v1 = vsel %vm3421_vm13, %v3408_v42, 0.0  ;;  %v3640_v19 = vrot.slane %v6797_v27, 4  ;;  %v3665_v4 = vsel %vm3582_vm10, %v7771_v36, 0.0  ;;  %v2030_v46 = vsel %vm1939_vm11, %v1927_v10, 0.0 }
 0x54f   :  { %v6800_v2 = vsel %vm3759_vm12, %v2093_v20, %v2092_v43  ;;  %v3498_v63 = vadd.f32 %v3497_v44, %v3496_v57  ;;  %v3505_v3 = vadd.f32 %v3504_v1, %v3503_v7  ;;  %v3281_v62 = vpop.permute.xlu0 %3280  ;;  %v1803_v33 = vpop.permute.xlu1 %1802  ;;  %v3437_v22 = vadd.f32 %v3436_v8, %v3435_v51 }
 0x550   :  { %v1912_v18 = vmul.f32 %v1803_v33, %v7762_v50  ;;  %v3430_v6 = vadd.f32 %v3429_v40, %v3428_v21  ;;  %v3393_v7 = vmul.f32 %v3281_v62, %v7763_v54  ;;  %v3664_v40 = vsel %vm3582_vm10, %v7770_v16, 0.0 }
 0x551   :  { %v3499_v61 = vrot.slane %v3498_v63, 2  ;;  %v3506_v48 = vrot.slane %v3505_v3, 4  ;;  %v3438_v9 = vrot.slane %v3437_v22, 1  ;;  %v3656_v54 = vsel %vm3582_vm10, %v7769_v47, 0.0 }
 0x552   :  { %v1959_v58 = vsel %vm1939_vm11, %v1912_v18, 0.0  ;;  %v3566_v43 = vmul.f32 0.0625, %v3430_v6  ;;  %v3655_v16 = vsel %vm3582_vm10, %v7767_v11, 0.0 }
 0x553   :  { %v3500_v14 = vadd.f32 %v3499_v61, %v3498_v63  ;;  %v3507_v26 = vadd.f32 %v3506_v48, %v3505_v3  ;;  %v1960_v30 = vadd.f32 %v1959_v58, %v1958_v12  ;;  %v3344_v15 = vpop.permute.xlu0 %3343  ;;  %v1866_v45 = vpop.permute.xlu1 %1865  ;;  %v3439_v57 = vadd.f32 %v3438_v9, %v3437_v22 }
 0x554   :  { %v1928_v21 = vmul.f32 %v1866_v45, %v7777_v49  ;;  %v3666_v3 = vadd.f32 %v3665_v4, %v3664_v40  ;;  %v3440_v48 = vsel %vm3421_vm13, %v3393_v7, 0.0  ;;  %v3409_v6 = vmul.f32 %v3344_v15, %v7776_v55 }
 0x555   :  { %v3501_v39 = vrot.slane %v3500_v14, 1  ;;  %v3508_v51 = vrot.slane %v3507_v26, 2  ;;  %v1961_v42 = vrot.slane %v1960_v30, 4  ;;  %v3567_v20 = vmul.f32 0.0625, %v3439_v57 }
 0x556   :  { %v2031_v44 = vsel %vm1939_vm11, %v1928_v21, 0.0  ;;  %v3657_v45 = vadd.f32 %v3656_v54, %v3655_v16  ;;  %v3650_v15 = vadd.f32 %v3649_v52, %v6787_v0  ;;  %v3673_v0 = vsel %vm3582_vm10, %v7776_v55, 0.0  ;;  %v7778_v54 = vld [vmem:[#allocation37_spill] sm:$0xff] }
 0x557   :  { %v3509_v8 = vadd.f32 %v3508_v51, %v3507_v26  ;;  %v1962_v5 = vadd.f32 %v1961_v42, %v1960_v30  ;;  %v2032_v36 = vadd.f32 %v2031_v44, %v2030_v46  ;;  %v6822_v1 = vpop.permute.xlu0 %1806  ;;  %v3285_v63 = vpop.permute.xlu1 %3284  ;;  %v6825_v33 = vsel %vm3759_vm12, %v3567_v20, %v3566_v43 }
 0x558   :  { %v3502_v22 = vadd.f32 %v3501_v39, %v3500_v14  ;;  %v3394_v18 = vmul.f32 %v3285_v63, %v7762_v50  ;;  %v3667_v30 = vrot.slane %v3666_v3, 4  ;;  %v3641_v51 = vadd.f32 %v3640_v19, %v6797_v27 }
 0x559   :  { %v3510_v62 = vrot.slane %v3509_v8, 1  ;;  %v1963_v61 = vrot.slane %v1962_v5, 2  ;;  %v2033_v10 = vrot.slane %v2032_v36, 4  ;;  %v3512_v42 = vsel %vm3421_vm13, %v3409_v6, 0.0 }
 0x55a   :  { %v3441_v9 = vsel %vm3421_vm13, %v3394_v18, 0.0  ;;  %v3574_v4 = vmul.f32 0.0625, %v3502_v22  ;;  %v3674_v27 = vsel %vm3582_vm10, %v7777_v49, 0.0  ;;  %v3668_v19 = vadd.f32 %v3667_v30, %v3666_v3 }
 0x55b   :  { %v3511_v12 = vadd.f32 %v3510_v62, %v3509_v8  ;;  %v1964_v58 = vadd.f32 %v1963_v61, %v1962_v5  ;;  %v2034_v14 = vadd.f32 %v2033_v10, %v2032_v36  ;;  %v3442_v50 = vadd.f32 %v3441_v9, %v3440_v48  ;;  %v6835_v26 = vpop.permute.xlu0 %1869  ;;  %v3348_v47 = vpop.permute.xlu1 %3347  ;;  %v7779_v61 = vld [vmem:[#allocation38_spill] sm:$0xff] }
 0x55c   :  { %v3410_v57 = vmul.f32 %v3348_v47, %v7777_v49  ;;  %v3658_v36 = vrot.slane %v3657_v45, 4  ;;  %v3682_v62 = vsel %vm3582_vm10, %v7778_v54, 0.0  ;;  %v3683_v10 = vsel %vm3582_vm10, %v7779_v61, 0.0 }
 0x55d   :  { %v3575_v21 = vmul.f32 0.0625, %v3511_v12  ;;  %v1965_v11 = vrot.slane %v1964_v58, 1  ;;  %v2035_v39 = vrot.slane %v2034_v14, 2  ;;  %v3443_v46 = vrot.slane %v3442_v50, 4 }
 0x55e   :  { %v3513_v43 = vsel %vm3421_vm13, %v3410_v57, 0.0  ;;  %v3627_v48 = vadd.f32 %v3626_v35, %v6789_v38  ;;  %v3675_v55 = vadd.f32 %v3674_v27, %v3673_v0  ;;  %v3842_v47 = vsel %vm3763_vm15, %v6768_v17, %v6806_v53 }
 0x55f   :  { %v6845_v20 = vsel %vm3759_vm12, %v3575_v21, %v3574_v4  ;;  %v1966_v7 = vadd.f32 %v1965_v11, %v1964_v58  ;;  %v2036_v44 = vadd.f32 %v2035_v39, %v2034_v14  ;;  %v3444_v40 = vadd.f32 %v3443_v46, %v3442_v50  ;;  %v6847_v8 = vpop.permute.xlu0 %3288  ;;  %v1811_v5 = vpop.permute.xlu1 %1810 }
 0x560   :  { %v3514_v52 = vadd.f32 %v3513_v43, %v3512_v42  ;;  %v3659_v58 = vadd.f32 %v3658_v36, %v3657_v45  ;;  %v3651_v50 = vrot.slane %v3650_v15, 2  ;;  %v3669_v30 = vrot.slane %v3668_v19, 2 }
 0x561   :  { %v2086_v63 = vmul.f32 0.0625, %v1966_v7  ;;  %v2037_v22 = vrot.slane %v2036_v44, 1  ;;  %v3445_v18 = vrot.slane %v3444_v40, 2  ;;  %v3636_v35 = vadd.f32 %v3635_v13, %v6783_v28 }
 0x562   :  { %v3515_v16 = vrot.slane %v3514_v52, 4  ;;  %v3642_v57 = vrot.slane %v3641_v51, 2  ;;  %v3684_v21 = vadd.f32 %v3683_v10, %v3682_v62  ;;  %v3676_v39 = vrot.slane %v3675_v55, 4 }
 0x563   :  { %v2038_v6 = vadd.f32 %v2037_v22, %v2036_v44  ;;  %v3446_v9 = vadd.f32 %v3445_v18, %v3444_v40  ;;  %v6860_v49 = vpop.permute.xlu0 %3351  ;;  %v1874_v3 = vpop.permute.xlu1 %1873  ;;  %v6864_v12 = vsel %vm3761_vm14, %v2086_v63, %v6776_v31  ;;  %v3731_v31 = vmul.f32 0.0625, %v3627_v48  ;;  %v7780_v48 = vld [vmem:[#allocation33_spill] sm:$0xff] }
 0x564   :  { %v3516_v14 = vadd.f32 %v3515_v16, %v3514_v52  ;;  %v1914_v46 = vmul.f32 %v1811_v5, %v7760_v37  ;;  %v3660_v53 = vrot.slane %v3659_v58, 2  ;;  %v1930_v28 = vmul.f32 %v1874_v3, %v7779_v61 }
 0x565   :  { %v2094_v4 = vmul.f32 0.0625, %v2038_v6  ;;  %v3447_v38 = vrot.slane %v3446_v9, 1  ;;  %v3652_v13 = vadd.f32 %v3651_v50, %v3650_v15  ;;  %v3670_v44 = vadd.f32 %v3669_v30, %v3668_v19 }
 0x566   :  { %v3517_v11 = vrot.slane %v3516_v14, 2  ;;  %v1913_v40 = vmul.f32 %v6822_v1, %v7761_v29  ;;  %v3732_v0 = vmul.f32 0.0625, %v3636_v35  ;;  %v1929_v5 = vmul.f32 %v6835_v26, %v7778_v54 }
 0x567   :  { %v3448_v45 = vadd.f32 %v3447_v38, %v3446_v9  ;;  %v6873_v42 = vpop.permute.xlu0 %1814  ;;  %v3293_v43 = vpop.permute.xlu1 %3292  ;;  %v6877_v17 = vsel %vm3761_vm14, %v2094_v4, %v6800_v2  ;;  %v6884_v52 = vadd.f32 %v3642_v57, %v3641_v51  ;;  %v3843_v2 = vsel %vm3765_vm2, %v3731_v31, %v3842_v47  ;;  %v7781_v9 = vld [vmem:[#allocation34_spill] sm:$0xff]  ;;  %v7782_v4 = vld [vmem:[#allocation44_spill] sm:$0xff] }
 0x568   :  { %v3518_v7 = vadd.f32 %v3517_v11, %v3516_v14  ;;  %v3685_v63 = vrot.slane %v3684_v21, 4  ;;  %v3677_v22 = vadd.f32 %v3676_v39, %v3675_v55  ;;  %v1968_v18 = vsel %vm1939_vm11, %v1914_v46, 0.0  ;;  %v7783_v39 = vld [vmem:[#allocation45_spill] sm:$0xff] }
 0x569   :  { %v3568_v36 = vmul.f32 0.0625, %v3448_v45  ;;  %v3661_v19 = vadd.f32 %v3660_v53, %v3659_v58  ;;  %v2040_v26 = vsel %vm1939_vm11, %v1930_v28, 0.0  ;;  %v3653_v16 = vrot.slane %v3652_v13, 1 }
 0x56a   :  { %v3519_v27 = vrot.slane %v3518_v7, 1  ;;  %v3671_v51 = vrot.slane %v3670_v44, 1  ;;  %v3700_v6 = vsel %vm3582_vm10, %v7780_v48, 0.0  ;;  %v3701_v55 = vsel %vm3582_vm10, %v7781_v9, 0.0 }
 0x56b   :  { %v6888_v62 = vpop.permute.xlu0 %1877  ;;  %v3356_v15 = vpop.permute.xlu1 %3355  ;;  %v6892_v1 = vsel %vm3761_vm14, %v3568_v36, %v6825_v33  ;;  %v1967_v3 = vsel %vm1939_vm11, %v1913_v40, 0.0  ;;  %v2039_v14 = vsel %vm1939_vm11, %v1929_v5, 0.0  ;;  %v3396_v33 = vmul.f32 %v3293_v43, %v7760_v37 }
 0x56c   :  { %v3520_v10 = vadd.f32 %v3519_v27, %v3518_v7  ;;  %v1969_v47 = vadd.f32 %v1968_v18, %v1967_v3  ;;  %v3686_v58 = vadd.f32 %v3685_v63, %v3684_v21  ;;  %v3678_v30 = vrot.slane %v3677_v22, 2 }
 0x56d   :  { %v3691_v38 = vsel %vm3582_vm10, %v7782_v4, 0.0  ;;  %v2041_v35 = vadd.f32 %v2040_v26, %v2039_v14  ;;  %v3702_v31 = vadd.f32 %v3701_v55, %v3700_v6  ;;  %v3692_v45 = vsel %vm3582_vm10, %v7783_v39, 0.0  ;;  %v7788_v26 = vld [vmem:[#allocation40_spill] sm:$0xff]  ;;  %v7790_v55 = vld [vmem:[#allocation42_spill] sm:$0xff] }
 0x56e   :  { %v3576_v50 = vmul.f32 0.0625, %v3520_v10  ;;  %v3395_v46 = vmul.f32 %v6847_v8, %v7761_v29  ;;  %v3644_v37 = vrot.slane %v6884_v52, 1  ;;  %v6915_v21 = vadd.f32 %v3653_v16, %v3652_v13 }
 0x56f   :  { %v6904_v57 = vpop.permute.xlu0 %3296  ;;  %v1819_v11 = vpop.permute.xlu1 %1818  ;;  %v6918_v43 = vsel %vm3767_vm3, %v3732_v0, %v3843_v2  ;;  %v3672_v7 = vadd.f32 %v3671_v51, %v3670_v44  ;;  %v3662_v28 = vrot.slane %v3661_v19, 1  ;;  %v1970_v40 = vrot.slane %v1969_v47, 4  ;;  %v7787_v2 = vld [vmem:[#allocation39_spill] sm:$0xff]  ;;  %v7789_v51 = vld [vmem:[#allocation41_spill] sm:$0xff] }
 0x570   :  { %v6912_v53 = vsel %vm3761_vm14, %v3576_v50, %v6845_v20  ;;  %7785 = vst [vmem:[#allocation48_spill] sm:$0xff] %v6915_v21  ;;  %7786 = vst [vmem:[#allocation49_spill] sm:$0xff] %v6918_v43  ;;  %v3450_v36 = vsel %vm3421_vm13, %v3396_v33, 0.0  ;;  %v3687_v5 = vrot.slane %v3686_v58, 2  ;;  %v3679_v27 = vadd.f32 %v3678_v30, %v3677_v22 }
 0x571   :  { %7784 = vst [vmem:[#allocation47_spill] sm:$0xff] %v6912_v53  ;;  %v3693_v63 = vadd.f32 %v3692_v45, %v3691_v38  ;;  %v2042_v29 = vrot.slane %v2041_v35, 4  ;;  %v3703_v18 = vrot.slane %v3702_v31, 4  ;;  %v3449_v10 = vsel %vm3421_vm13, %v3395_v46, 0.0 }
 0x572   :  { %v3412_v13 = vmul.f32 %v3356_v15, %v7779_v61  ;;  %v1916_v0 = vmul.f32 %v1819_v11, %v7766_v56  ;;  %v3718_v44 = vsel %vm3582_vm10, %v7787_v2, 0.0  ;;  %v3709_v16 = vsel %vm3582_vm10, %v7788_v26, 0.0 }
 0x573   :  { %v6921_v8 = vpop.permute.xlu0 %3359  ;;  %v1882_v20 = vpop.permute.xlu1 %1881  ;;  %v3719_v22 = vsel %vm3582_vm10, %v7789_v51, 0.0  ;;  %v3451_v6 = vadd.f32 %v3450_v36, %v3449_v10  ;;  %v3710_v3 = vsel %vm3582_vm10, %v7790_v55, 0.0  ;;  %v1971_v14 = vadd.f32 %v1970_v40, %v1969_v47 }
 0x574   :  { %v3411_v50 = vmul.f32 %v6860_v49, %v7778_v54  ;;  %v1915_v61 = vmul.f32 %v6873_v42, %v7768_v59  ;;  %v3663_v15 = vadd.f32 %v3662_v28, %v3661_v19  ;;  %v3688_v33 = vadd.f32 %v3687_v5, %v3686_v58 }
 0x575   :  { %v3680_v30 = vrot.slane %v3679_v27, 1  ;;  %v2043_v38 = vadd.f32 %v2042_v29, %v2041_v35  ;;  %v3694_v46 = vrot.slane %v3693_v63, 4  ;;  %v3720_v23 = vadd.f32 %v3719_v22, %v3718_v44 }
 0x576   :  { %v3522_v36 = vsel %vm3421_vm13, %v3412_v13, 0.0  ;;  %v1977_v10 = vsel %vm1939_vm11, %v1916_v0, 0.0  ;;  %v3704_v47 = vadd.f32 %v3703_v18, %v3702_v31  ;;  %v3711_v40 = vadd.f32 %v3710_v3, %v3709_v16 }
 0x577   :  { %v6938_v11 = vpop.permute.xlu0 %1822  ;;  %v3301_v45 = vpop.permute.xlu1 %3300  ;;  %v3452_v21 = vrot.slane %v3451_v6, 4  ;;  %v1932_v54 = vmul.f32 %v1882_v20, %v7783_v39  ;;  %v1972_v49 = vrot.slane %v1971_v14, 2  ;;  %v3521_v42 = vsel %vm3421_vm13, %v3411_v50, 0.0 }
 0x578   :  { %v1976_v19 = vsel %vm1939_vm11, %v1915_v61, 0.0  ;;  %v1931_v58 = vmul.f32 %v6888_v62, %v7782_v4  ;;  %v2044_v35 = vrot.slane %v2043_v38, 2  ;;  %v3523_v28 = vadd.f32 %v3522_v36, %v3521_v42 }
 0x579   :  { %v1978_v5 = vadd.f32 %v1977_v10, %v1976_v19  ;;  %v3645_v31 = vadd.f32 %v3644_v37, %v6884_v52  ;;  %v3736_v18 = vmul.f32 0.0625, %v3672_v7  ;;  %v3735_v0 = vmul.f32 0.0625, %v3663_v15 }
 0x57a   :  { %v3695_v44 = vadd.f32 %v3694_v46, %v3693_v63  ;;  %v3721_v20 = vrot.slane %v3720_v23, 4  ;;  %v3705_v16 = vrot.slane %v3704_v47, 2  ;;  %v3712_v22 = vrot.slane %v3711_v40, 4 }
 0x57b   :  { %v6947_v29 = vpop.permute.xlu0 %1885  ;;  %v3364_v13 = vpop.permute.xlu1 %3363  ;;  %v3453_v3 = vadd.f32 %v3452_v21, %v3451_v6  ;;  %v2049_v50 = vsel %vm1939_vm11, %v1932_v54, 0.0  ;;  %v3689_v61 = vrot.slane %v3688_v33, 1  ;;  %v3681_v43 = vadd.f32 %v3680_v30, %v3679_v27 }
 0x57c   :  { %v1973_v62 = vadd.f32 %v1972_v49, %v1971_v14  ;;  %v2048_v36 = vsel %vm1939_vm11, %v1931_v58, 0.0  ;;  %v2045_v10 = vadd.f32 %v2044_v35, %v2043_v38  ;;  %v3524_v42 = vrot.slane %v3523_v28, 4 }
 0x57d   :  { %v1979_v19 = vrot.slane %v1978_v5, 4  ;;  %v3398_v53 = vmul.f32 %v3301_v45, %v7766_v56  ;;  %v3696_v7 = vrot.slane %v3695_v44, 2  ;;  %v3722_v63 = vadd.f32 %v3721_v20, %v3720_v23 }
 0x57e   :  { %v2050_v15 = vadd.f32 %v2049_v50, %v2048_v36  ;;  %v6955_v46 = vmul.f32 0.0625, %v3645_v31  ;;  %v3706_v21 = vadd.f32 %v3705_v16, %v3704_v47  ;;  %v3713_v6 = vadd.f32 %v3712_v22, %v3711_v40 }
 0x57f   :  { %v6953_v52 = vpop.permute.xlu0 %3304  ;;  %v1827_v37 = vpop.permute.xlu1 %1826  ;;  %v3454_v54 = vrot.slane %v3453_v3, 2  ;;  %v3397_v27 = vmul.f32 %v6904_v57, %v7768_v59  ;;  %v3690_v14 = vadd.f32 %v3689_v61, %v3688_v33  ;;  %v3737_v30 = vmul.f32 0.0625, %v3681_v43 }
 0x580   :  { %v1974_v38 = vrot.slane %v1973_v62, 1  ;;  %v3847_v49 = vsel %vm3759_vm12, %v3736_v18, %v3735_v0  ;;  %v2046_v56 = vrot.slane %v2045_v10, 1  ;;  %v3525_v45 = vadd.f32 %v3524_v42, %v3523_v28 }
 0x581   :  { %v1980_v58 = vadd.f32 %v1979_v19, %v1978_v5  ;;  %v3459_v35 = vsel %vm3421_vm13, %v3398_v53, 0.0  ;;  %v3697_v20 = vadd.f32 %v3696_v7, %v3695_v44  ;;  %v2051_v47 = vrot.slane %v2050_v15, 4 }
 0x582   :  { %v1918_v40 = vmul.f32 %v1827_v37, %v7764_v32  ;;  %v3723_v16 = vrot.slane %v3722_v63, 2  ;;  %v3714_v22 = vrot.slane %v3713_v6, 2  ;;  %v3455_v59 = vadd.f32 %v3454_v54, %v3453_v3 }
 0x583   :  { %v6961_v23 = vpop.permute.xlu0 %3367  ;;  %v1890_v31 = vpop.permute.xlu1 %1889  ;;  %v3458_v57 = vsel %vm3421_vm13, %v3397_v27, 0.0  ;;  %v3707_v43 = vrot.slane %v3706_v21, 1  ;;  %v6965_v33 = vmul.f32 0.0625, %v3690_v14  ;;  %v1975_v18 = vadd.f32 %v1974_v38, %v1973_v62 }
 0x584   :  { %v1917_v28 = vmul.f32 %v6938_v11, %v7765_v41  ;;  %v3460_v53 = vadd.f32 %v3459_v35, %v3458_v57  ;;  %v2047_v5 = vadd.f32 %v2046_v56, %v2045_v10  ;;  %v3526_v0 = vrot.slane %v3525_v45, 2 }
 0x585   :  { %v1981_v50 = vrot.slane %v1980_v58, 2  ;;  %v6970_v36 = vsel %vm3761_vm14, %v3737_v30, %v3847_v49  ;;  %v3698_v42 = vrot.slane %v3697_v20, 1  ;;  %v2052_v3 = vadd.f32 %v2051_v47, %v2050_v15 }
 0x586   :  { %v1986_v19 = vsel %vm1939_vm11, %v1918_v40, 0.0  ;;  %v6973_v37 = vadd.f32 %v3723_v16, %v3722_v63  ;;  %v3456_v7 = vrot.slane %v3455_v59, 1  ;;  %v3414_v62 = vmul.f32 %v3364_v13, %v7783_v39 }
 0x587   :  { %v1831_v44 = vpop.permute.xlu0 %1830  ;;  %v3309_v61 = vpop.permute.xlu1 %3308  ;;  %v6976_v54 = vadd.f32 %v3707_v43, %v3706_v21  ;;  %v6978_v11 = vadd.f32 %v3714_v22, %v3713_v6  ;;  %v2087_v10 = vmul.f32 0.0625, %v1975_v18  ;;  %v3413_v27 = vmul.f32 %v6921_v8, %v7782_v4 }
 0x588   :  { %v1985_v14 = vsel %vm1939_vm11, %v1917_v28, 0.0  ;;  %v3461_v30 = vrot.slane %v3460_v53, 4  ;;  %v2095_v38 = vmul.f32 0.0625, %v2047_v5  ;;  %v3527_v15 = vadd.f32 %v3526_v0, %v3525_v45 }
 0x589   :  { %v1982_v49 = vadd.f32 %v1981_v50, %v1980_v58  ;;  %v1987_v56 = vadd.f32 %v1986_v19, %v1985_v14  ;;  %v2053_v47 = vrot.slane %v2052_v3, 2  ;;  %v1934_v39 = vmul.f32 %v1890_v31, %v7781_v9 }
 0x58a   :  { %v6984_v13 = vadd.f32 %v3698_v42, %v3697_v20  ;;  %v3725_v21 = vrot.slane %v6973_v37, 1  ;;  %v3457_v6 = vadd.f32 %v3456_v7, %v3455_v59  ;;  %v1933_v4 = vmul.f32 %v6947_v29, %v7780_v48 }
 0x58b   :  { %v1894_v63 = vpop.permute.xlu0 %1893  ;;  %v3372_v35 = vpop.permute.xlu1 %3371  ;;  %v3531_v8 = vsel %vm3421_vm13, %v3414_v62, 0.0  ;;  %v3716_v40 = vrot.slane %v6978_v11, 1  ;;  %v3530_v45 = vsel %vm3421_vm13, %v3413_v27, 0.0  ;;  %v3462_v58 = vadd.f32 %v3461_v30, %v3460_v53 }
 0x58c   :  { %v1919_v16 = vmul.f32 %v1831_v44, %v7773_v60  ;;  %v6995_v31 = vsel %vm3763_vm15, %v2087_v10, %v6864_v12  ;;  %v3528_v20 = vrot.slane %v3527_v15, 1  ;;  %v1983_v22 = vrot.slane %v1982_v49, 1 }
 0x58d   :  { %v1988_v57 = vrot.slane %v1987_v56, 4  ;;  %v6999_v29 = vsel %vm3763_vm15, %v2095_v38, %v6877_v17  ;;  %v2054_v18 = vadd.f32 %v2053_v47, %v2052_v3  ;;  %v3532_v28 = vadd.f32 %v3531_v8, %v3530_v45 }
 0x58e   :  { %v2058_v5 = vsel %vm1939_vm11, %v1934_v39, 0.0  ;;  %v7003_v0 = vmul.f32 0.0625, %v3457_v6  ;;  %v2057_v12 = vsel %vm1939_vm11, %v1933_v4, 0.0  ;;  %v3399_v50 = vmul.f32 %v6953_v52, %v7765_v41 }
 0x58f   :  { %v3313_v59 = vpop.permute.xlu0 %3312  ;;  %v1835_v43 = vpop.permute.xlu1 %1834  ;;  %v3400_v44 = vmul.f32 %v3309_v61, %v7764_v32  ;;  %v3463_v42 = vrot.slane %v3462_v58, 2  ;;  %v1994_v19 = vsel %vm1939_vm11, %v1919_v16, 0.0  ;;  %v1935_v17 = vmul.f32 %v1894_v63, %v7788_v26 }
 0x590   :  { %v1920_v53 = vmul.f32 %v1835_v43, %v7775_v25  ;;  %v7012_v7 = vadd.f32 %v3528_v20, %v3527_v15  ;;  %v1989_v62 = vadd.f32 %v1988_v57, %v1987_v56  ;;  %v2059_v10 = vadd.f32 %v2058_v5, %v2057_v12 }
 0x591   :  { %v1984_v38 = vadd.f32 %v1983_v22, %v1982_v49  ;;  %v2055_v47 = vrot.slane %v2054_v18, 1  ;;  %v3533_v39 = vrot.slane %v3532_v28, 4  ;;  %v3467_v32 = vsel %vm3421_vm13, %v3399_v50, 0.0 }
 0x592   :  { %v1995_v3 = vsel %vm1939_vm11, %v1920_v53, 0.0  ;;  %v3468_v52 = vsel %vm3421_vm13, %v3400_v44, 0.0  ;;  %v3416_v61 = vmul.f32 %v3372_v35, %v7781_v9  ;;  %v3464_v6 = vadd.f32 %v3463_v42, %v3462_v58 }
 0x593   :  { %v1996_v27 = vadd.f32 %v1995_v3, %v1994_v19  ;;  %v3376_v14 = vpop.permute.xlu0 %3375  ;;  %v1898_v30 = vpop.permute.xlu1 %1897  ;;  %v2066_v15 = vsel %vm1939_vm11, %v1935_v17, 0.0  ;;  %v3401_v56 = vmul.f32 %v3313_v59, %v7773_v60  ;;  %v1990_v8 = vrot.slane %v1989_v62, 2 }
 0x594   :  { %v1936_v41 = vmul.f32 %v1898_v30, %v7790_v55  ;;  %v3415_v49 = vmul.f32 %v6961_v23, %v7780_v48  ;;  %v2060_v45 = vrot.slane %v2059_v10, 4  ;;  %v2088_v57 = vmul.f32 0.0625, %v1984_v38 }
 0x595   :  { %v1997_v63 = vrot.slane %v1996_v27, 4  ;;  %v3469_v43 = vadd.f32 %v3468_v52, %v3467_v32  ;;  %v2056_v35 = vadd.f32 %v2055_v47, %v2054_v18  ;;  %v3534_v58 = vadd.f32 %v3533_v39, %v3532_v28 }
 0x596   :  { %v2067_v4 = vsel %vm1939_vm11, %v1936_v41, 0.0  ;;  %v3540_v53 = vsel %vm3421_vm13, %v3416_v61, 0.0  ;;  %v3465_v59 = vrot.slane %v3464_v6, 1  ;;  %v3476_v12 = vsel %vm3421_vm13, %v3401_v56, 0.0 }
 0x597   :  { %v2068_v16 = vadd.f32 %v2067_v4, %v2066_v15  ;;  %v1839_v20 = vpop.permute.xlu0 %1838  ;;  %v3317_v22 = vpop.permute.xlu1 %3316  ;;  %v1998_v5 = vadd.f32 %v1997_v63, %v1996_v27  ;;  %v3417_v50 = vmul.f32 %v3376_v14, %v7788_v26  ;;  %v1991_v23 = vadd.f32 %v1990_v8, %v1989_v62 }
 0x598   :  { %v3402_v9 = vmul.f32 %v3317_v22, %v7775_v25  ;;  %v3539_v44 = vsel %vm3421_vm13, %v3415_v49, 0.0  ;;  %v2061_v42 = vadd.f32 %v2060_v45, %v2059_v10  ;;  %v3470_v25 = vrot.slane %v3469_v43, 4 }
 0x599   :  { %v2069_v60 = vrot.slane %v2068_v16, 4  ;;  %v3541_v18 = vadd.f32 %v3540_v53, %v3539_v44  ;;  %v1999_v28 = vrot.slane %v1998_v5, 2  ;;  %v2096_v30 = vmul.f32 0.0625, %v2056_v35 }
 0x59a   :  { %v3477_v48 = vsel %vm3421_vm13, %v3402_v9, 0.0  ;;  %v3535_v38 = vrot.slane %v3534_v58, 2  ;;  %v1921_v39 = vmul.f32 %v1839_v20, %v7772_v34  ;;  %v3548_v26 = vsel %vm3421_vm13, %v3417_v50, 0.0 }
 0x59b   :  { %v3478_v19 = vadd.f32 %v3477_v48, %v3476_v12  ;;  %v1902_v17 = vpop.permute.xlu0 %1901  ;;  %v3380_v3 = vpop.permute.xlu1 %3379  ;;  %v2070_v47 = vadd.f32 %v2069_v60, %v2068_v16  ;;  %v7035_v10 = vsel %vm3765_vm2, %v2088_v57, %v6995_v31  ;;  %v3466_v41 = vadd.f32 %v3465_v59, %v3464_v6 }
 0x59c   :  { %v3418_v27 = vmul.f32 %v3380_v3, %v7790_v55  ;;  %v1992_v32 = vrot.slane %v1991_v23, 1  ;;  %v2062_v52 = vrot.slane %v2061_v42, 2  ;;  %v3471_v55 = vadd.f32 %v3470_v25, %v3469_v43 }
 0x59d   :  { %v3479_v14 = vrot.slane %v3478_v19, 4  ;;  %v3542_v15 = vrot.slane %v3541_v18, 4  ;;  %v2000_v56 = vadd.f32 %v1999_v28, %v1998_v5  ;;  %v7038_v8 = vadd.f32 %v3535_v38, %v3534_v58 }
 0x59e   :  { %v3549_v62 = vsel %vm3421_vm13, %v3418_v27, 0.0  ;;  %v2071_v49 = vrot.slane %v2070_v47, 2  ;;  %v2003_v45 = vsel %vm1939_vm11, %v1921_v39, 0.0  ;;  %v7043_v31 = vsel %vm3765_vm2, %v2096_v30, %v6999_v29 }
 0x59f   :  { %v3550_v61 = vadd.f32 %v3549_v62, %v3548_v26  ;;  %v1843_v63 = vpop.permute.xlu1 %1842  ;;  %v3321_v16 = vpop.permute.xlu0 %3320  ;;  %v3480_v6 = vadd.f32 %v3479_v14, %v3478_v19  ;;  %v1937_v20 = vmul.f32 %v1902_v17, %v7787_v2  ;;  %v7047_v43 = vmul.f32 0.0625, %v3466_v41 }
 0x5a0   :  { %v1922_v4 = vmul.f32 %v1843_v63, %v7774_v24  ;;  %v1993_v5 = vadd.f32 %v1992_v32, %v1991_v23  ;;  %v2063_v9 = vadd.f32 %v2062_v52, %v2061_v42  ;;  %v3472_v53 = vrot.slane %v3471_v55, 2 }
 0x5a1   :  { %v3551_v22 = vrot.slane %v3550_v61, 4  ;;  %v3543_v60 = vadd.f32 %v3542_v15, %v3541_v18  ;;  %v2001_v59 = vrot.slane %v2000_v56, 1  ;;  %v3537_v29 = vrot.slane %v7038_v8, 1 }
 0x5a2   :  { %v2004_v57 = vsel %vm1939_vm11, %v1922_v4, 0.0  ;;  %v2072_v50 = vadd.f32 %v2071_v49, %v2070_v47  ;;  %v3403_v48 = vmul.f32 %v3321_v16, %v7772_v34  ;;  %v3481_v19 = vrot.slane %v3480_v6, 2 }
 0x5a3   :  { %v2005_v35 = vadd.f32 %v2004_v57, %v2003_v45  ;;  %v1906_v58 = vpop.permute.xlu1 %1905  ;;  %v2075_v17 = vsel %vm1939_vm11, %v1937_v20, 0.0  ;;  %v3552_v3 = vadd.f32 %v3551_v22, %v3550_v61  ;;  %v2089_v42 = vmul.f32 0.0625, %v1993_v5  ;;  %v3384_v27 = vpop.permute.xlu0 %3383 }
 0x5a4   :  { %v1938_v12 = vmul.f32 %v1906_v58, %v7789_v51  ;;  %v2064_v25 = vrot.slane %v2063_v9, 1  ;;  %v3473_v38 = vadd.f32 %v3472_v53, %v3471_v55  ;;  %v3544_v39 = vrot.slane %v3543_v60, 2 }
 0x5a5   :  { %v2006_v44 = vrot.slane %v2005_v35, 4  ;;  %v2002_v47 = vadd.f32 %v2001_v59, %v2000_v56  ;;  %v2073_v14 = vrot.slane %v2072_v50, 1  ;;  %v3485_v34 = vsel %vm3421_vm13, %v3403_v48, 0.0 }
 0x5a6   :  { %v2076_v23 = vsel %vm1939_vm11, %v1938_v12, 0.0  ;;  %v3482_v32 = vadd.f32 %v3481_v19, %v3480_v6  ;;  %v3553_v52 = vrot.slane %v3552_v3, 2  ;;  %v3419_v61 = vmul.f32 %v3384_v27, %v7787_v2 }
 0x5a7   :  { %v2007_v28 = vadd.f32 %v2006_v44, %v2005_v35  ;;  %v2077_v18 = vadd.f32 %v2076_v23, %v2075_v17  ;;  %v3325_v30 = vpop.permute.xlu1 %3324  ;;  %v2065_v15 = vadd.f32 %v2064_v25, %v2063_v9  ;;  %v3545_v56 = vadd.f32 %v3544_v39, %v3543_v60 }
 0x5a8   :  { %v3404_v26 = vmul.f32 %v3325_v30, %v7774_v24  ;;  %v3474_v24 = vrot.slane %v3473_v38, 1  ;;  %v2090_v20 = vmul.f32 0.0625, %v2002_v47  ;;  %v2074_v6 = vadd.f32 %v2073_v14, %v2072_v50 }
 0x5a9   :  { %v2008_v62 = vrot.slane %v2007_v28, 2  ;;  %v2078_v41 = vrot.slane %v2077_v18, 4  ;;  %v3483_v35 = vrot.slane %v3482_v32, 1  ;;  %v3554_v58 = vadd.f32 %v3553_v52, %v3552_v3 }
 0x5aa   :  { %v3486_v63 = vsel %vm3421_vm13, %v3404_v26, 0.0  ;;  %v3557_v2 = vsel %vm3421_vm13, %v3419_v61, 0.0  ;;  %v2097_v44 = vmul.f32 0.0625, %v2065_v15  ;;  %v3475_v19 = vadd.f32 %v3474_v24, %v3473_v38 }
 0x5ab   :  { %v2009_v4 = vadd.f32 %v2008_v62, %v2007_v28  ;;  %v2079_v55 = vadd.f32 %v2078_v41, %v2077_v18  ;;  %v3487_v49 = vadd.f32 %v3486_v63, %v3485_v34  ;;  %v3388_v45 = vpop.permute.xlu1 %3387  ;;  %v3546_v60 = vrot.slane %v3545_v56, 1 }
 0x5ac   :  { %v3420_v16 = vmul.f32 %v3388_v45, %v7789_v51  ;;  %v3768_v51 = vsel %vm3767_vm3, %v2089_v42, %v7035_v10  ;;  %v3555_v28 = vrot.slane %v3554_v58, 1  ;;  %v2098_v27 = vmul.f32 0.0625, %v2074_v6 }
 0x5ad   :  { %v2080_v22 = vrot.slane %v2079_v55, 2  ;;  %v3488_v57 = vrot.slane %v3487_v49, 4  ;;  %v2010_v5 = vrot.slane %v2009_v4, 1  ;;  %v3770_v3 = vsel %vm3769_vm4, %v2090_v20, %v3768_v51 }
 0x5ae   :  { %v3558_v53 = vsel %vm3421_vm13, %v3420_v16, 0.0  ;;  %v3484_v18 = vadd.f32 %v3483_v35, %v3482_v32  ;;  %v3538_v38 = vadd.f32 %v3537_v29, %v7038_v8  ;;  %v3571_v14 = vmul.f32 0.0625, %v3475_v19 }
 0x5af   :  { %v2081_v9 = vadd.f32 %v2080_v22, %v2079_v55  ;;  %v3489_v59 = vadd.f32 %v3488_v57, %v3487_v49  ;;  %v3559_v12 = vadd.f32 %v3558_v53, %v3557_v2  ;;  %v2011_v48 = vadd.f32 %v2010_v5, %v2009_v4 }
 0x5b0   :  { %v3777_v10 = vsel %vm3767_vm3, %v2097_v44, %v7043_v31  ;;  %v3804_v42 = vsel %vm3763_vm15, %v7003_v0, %v6892_v1  ;;  %v3547_v34 = vadd.f32 %v3546_v60, %v3545_v56  ;;  %v3577_v52 = vmul.f32 0.0625, %v7012_v7 }
 0x5b1   :  { %v3490_v17 = vrot.slane %v3489_v59, 2  ;;  %v3560_v23 = vrot.slane %v3559_v12, 4  ;;  %v2091_v25 = vmul.f32 0.0625, %v2011_v48  ;;  %v2082_v50 = vrot.slane %v2081_v9, 1 }
 0x5b2   :  { %v3778_v61 = vsel %vm3769_vm4, %v2098_v27, %v3777_v10  ;;  %v3572_v63 = vmul.f32 0.0625, %v3484_v18  ;;  %v3556_v8 = vadd.f32 %v3555_v28, %v3554_v58  ;;  %v3805_v31 = vsel %vm3765_vm2, %v7047_v43, %v3804_v42  ;;  %v7794_v58 = vld [vmem:[#allocation48_spill] sm:$0xff] }
 0x5b3   :  { %v3491_v30 = vadd.f32 %v3490_v17, %v3489_v59  ;;  %v3561_v39 = vadd.f32 %v3560_v23, %v3559_v12  ;;  %v3772_v26 = vsel %vm3771_vm5, %v2091_v25, %v3770_v3  ;;  %v2083_v47 = vadd.f32 %v2082_v50, %v2081_v9 }
 0x5b4   :  { %3780 = vrot.lane.b32.xlu0 %v3772_v26, %s4870_s1  ;;  %v3578_v55 = vmul.f32 0.0625, %v3538_v38  ;;  %v3806_v1 = vsel %vm3767_vm3, %v3571_v14, %v3805_v31  ;;  %v3717_v0 = vadd.f32 %v3716_v40, %v6978_v11  ;;  %v3739_v7 = vmul.f32 0.0625, %v6984_v13  ;;  %v7792_v40 = vld [vmem:[#allocation47_spill] sm:$0xff] }
 0x5b5   :  { %v3562_v62 = vrot.slane %v3561_v39, 2  ;;  %v2099_v41 = vmul.f32 0.0625, %v2083_v47  ;;  %v3492_v32 = vrot.slane %v3491_v30, 1  ;;  %v3579_v49 = vmul.f32 0.0625, %v3547_v34 }
 0x5b6   :  { %v3807_v56 = vsel %vm3769_vm4, %v3572_v63, %v3806_v1  ;;  %v3580_v16 = vmul.f32 0.0625, %v3556_v8  ;;  %v3740_v20 = vmul.f32 0.0625, %v6976_v54  ;;  %v3849_v43 = vsel %vm3763_vm15, %v6965_v33, %v6970_v36  ;;  %v7793_v54 = vld [vmem:[#allocation49_spill] sm:$0xff] }
 0x5b7   :  { %v3563_v29 = vadd.f32 %v3562_v62, %v3561_v39  ;;  %v3779_v15 = vsel %vm3771_vm5, %v2099_v41, %v3778_v61  ;;  %v3493_v4 = vadd.f32 %v3492_v32, %v3491_v30  ;;  %v7791_v22 = vmov 0.0   ;;  %v4082_v30 = vld [vmem:[%s7135_s5] ss:$0 sm:$0xff] }
 0x5b8   :  { %3782 = vrot.lane.b32.xlu1 %v3779_v15, %s4870_s1  ;;  %4243 = vmatprep.mubr.msk.bf16.mxu1 %vm4878_vm6, %v7791_v22  ;;  %v3811_v13 = vsel %vm3763_vm15, %v3577_v52, %v7792_v40  ;;  %v3726_v5 = vadd.f32 %v3725_v21, %v6973_v37  ;;  %v3845_v6 = vsel %vm3769_vm4, %v6955_v46, %v7793_v54  ;;  %v3741_v36 = vmul.f32 0.0625, %v3717_v0 }
 0x5b9   :  { %v3573_v45 = vmul.f32 0.0625, %v3493_v4  ;;  %v3564_v24 = vrot.slane %v3563_v29, 1  ;;  %v3812_v33 = vsel %vm3765_vm2, %v3578_v55, %v3811_v13  ;;  %v3850_v35 = vsel %vm3765_vm2, %v3739_v7, %v3849_v43 }
 0x5ba   :  { %v3734_v2 = vmul.f32 0.0625, %v7794_v58  ;;  %v3813_v9 = vsel %vm3767_vm3, %v3579_v49, %v3812_v33  ;;  %v3742_v12 = vmul.f32 0.0625, %v3726_v5  ;;  %v3851_v48 = vsel %vm3767_vm3, %v3740_v20, %v3850_v35 }
 0x5bb   :  { %v3808_v57 = vsel %vm3771_vm5, %v3573_v45, %v3807_v56  ;;  %v3565_v11 = vadd.f32 %v3564_v24, %v3563_v29  ;;  %v3814_v59 = vsel %vm3769_vm4, %v3580_v16, %v3813_v9  ;;  %v3852_v46 = vsel %vm3769_vm4, %v3741_v36, %v3851_v48 }
 0x5bc   :  { %3816 = vrot.lane.b32.xlu0 %v3808_v57, %s4870_s1  ;;  %v3846_v37 = vsel %vm3771_vm5, %v3734_v2, %v3845_v6  ;;  %v3853_v44 = vsel %vm3771_vm5, %v3742_v12, %v3852_v46 }
 0x5bd   :  { %v3581_v53 = vmul.f32 0.0625, %v3565_v11 }
 0x5bf   :  { %v3815_v21 = vsel %vm3771_vm5, %v3581_v53, %v3814_v59 }
 0x5c0   :  { %3854 = vrot.lane.b32.xlu0 %v3846_v37, %s4879_s25  ;;  %3818 = vrot.lane.b32.xlu1 %v3815_v21, %s4870_s1 }
 0x5c4   :  { %3856 = vrot.lane.b32.xlu1 %v3853_v44, %s4879_s25 }
 0x626   :  { %v3781_v19 = vpop.permute.xlu0 %3780 }
 0x62a   :  { %v3783_v60 = vpop.permute.xlu1 %3782 }
 0x62e   :  { %v3817_v51 = vpop.permute.xlu0 %3816 }
 0x62f   :  { %v3822_v25 = vsel %vm681_vm1, %v3781_v19, %v3817_v51 }
 0x632   :  { %v3819_v17 = vpop.permute.xlu1 %3818  ;;  %v3855_v23 = vpop.permute.xlu0 %3854 }
 0x633   :  { %v3823_v50 = vsel %vm681_vm1, %v3783_v60, %v3819_v17  ;;  %v3860_v3 = vadd.f32 %v3855_v23, %v3822_v25 }
 0x636   :  { %v3857_v28 = vpop.permute.xlu1 %3856 }
 0x637   :  { %v3861_v27 = vadd.f32 %v3857_v28, %v3823_v50 }
 0x639   :  { %v3862_v18 = vpack.c.bf16 %v3861_v27, %v3860_v3 }
 0x63b   :  { %4244 = vmatmul.mubr.msk.bf16.vlgmr.msra.gmra.mrb[64].mxu1 %vm407_vm0, %v3862_v18 }
 0x70e   :  { %v3923_v39 = vpop.f32.mrb[64].mxu1 }
 0x70f   :  { %v3924_v26 = vadd.f32 %v4082_v30, %v3923_v39  ;;  %v4245_v47 = vpop.f32.mrb[65].mxu1 }
 0x710   :  { %v3926_v38 = vpop.f32.mrb[66].mxu1 }
 0x711   :  { %3930 = vst [vmem:[#allocation10] sm:$0xff] %v3924_v26  ;;  %v3927_v14 = vadd.f32 %v4082_v30, %v3926_v38  ;;  %v4246_v10 = vpop.f32.mrb[67].mxu1 }
 0x713   :  { %3931 = vst [vmem:[#allocation10 + $0x8] sm:$0xff] %v3927_v14 }
 0x714   :  { %4847 = shalt.err (!%p4844_p8)
}
 0x715   :  { %s4848_s7 = scalar_lea.hbm %s7136_s6, 256 }
 0x716   :  { %p4849_p9 = scmp.ne.s32.totalorder %s7136_s6, %s4848_s7  ;;  %p4852_p10 = scmp.lt.u32.totalorder %s4848_s7, %s7136_s6 }
 0x718   :  { %p4854_p11 = pnand %p4852_p10, %p4849_p9 }
 0x71a   :  { %4857 = shalt.err (!%p4854_p11)
}
 0x71b   :  { %s4881_s11 = smov 128   ;;  %s4882_s12 = smov 8  }
 0x71c   :  { %3943 = dma.vmem_to_hbm [thread:$0]  %s3938_s28, 256, %s7136_s6, [#allocation4], %s4881_s11, %s4881_s11, %s4882_s12  }
 0x71d   :  { %4864 = dma.done.wait [#allocation4], 256  }
 0x71e   :  { %4865 = vsyncadd [#allocation4], 4294967040 }
 0x71f   :  { %3947 = vsyncpa [#allocation3], 1 }
 0x720   :  { %3948 = vsyncpa [#allocation6], 1 }
 0x721   :  { %3949 = vsyncpa [#allocation9], 1 }
 0x722   :  { %3950 = vsyncpa [#allocation4], 1 }

</bundles_post_ra>
